<compile_context>
chip_gen: v5e
topology: v5e:2x2
jax: 0.10.0
libtpu: 0.0.40
codegen_flags: <defaults>
</compile_context>

<pallas_src>
import functools

import jax
import jax.numpy as jnp
from jax.experimental import pallas as pl
from jax.experimental.pallas import tpu as pltpu


def _round_up(v, m):
    return (v + m - 1) // m * m


def _fused_resblock_kernel(x_ref, w1_ref, b1_ref, w2_ref, b2_ref, out_ref,
                           lhs_ref, *, H, W, C, Cp, Wp):
    """relu(x + bn2(conv2(relu(bn1(conv1(x)))))) for one image, fully in VMEM.

    x_ref    : (1, H, W, C)     f32   input image (also the f32 residual skip)
    w{1,2}   : (3*C, 3*Cp)      bf16  BN-scale-folded weights; kh folded into
                                       the contraction dim, kw packed along the
                                       output dim at stride Cp
    b{1,2}   : (1, Cp)          f32   folded BN bias
    out_ref  : (1, H, W, C)     f32
    lhs_ref  : (H, Wp, 3*C)     bf16  row-stacked matmul LHS (scratch, reused
                                       for both convs)
    """
    bf16 = jnp.bfloat16
    padw = Wp - W - 1          # right halo column (W+1) plus alignment tail

    def build_lhs(src):
        # src: (H, W, C) float.  lhs[h, w, kh*C + c] = padded_src[h + kh, w, c]
        # (padded with a 1-pixel zero halo).  All stores below are full-width
        # (Wp) and sublane aligned; only the halo rows/cols are zero-filled.
        xw = jnp.concatenate(
            [jnp.zeros((H, 1, C), bf16),
             src.astype(bf16),
             jnp.zeros((H, padw, C), bf16)], axis=1)          # (H, Wp, C)
        zrow = jnp.zeros((1, Wp, C), bf16)
        # kh = 0 : rows [zero, src[0:H-1]]
        lhs_ref[0:1, :, 0:C] = zrow
        lhs_ref[1:H, :, 0:C] = xw[0:H - 1]
        # kh = 1 : rows src[0:H]
        lhs_ref[:, :, C:2 * C] = xw
        # kh = 2 : rows [src[1:H], zero]
        lhs_ref[0:H - 1, :, 2 * C:3 * C] = xw[1:H]
        lhs_ref[H - 1:H, :, 2 * C:3 * C] = zrow

    def conv3x3(w_ref):
        # ONE MXU matmul with K = 3*C; the 3 kw taps of every output channel
        # land side by side (lane offsets 0, Cp, 2*Cp) and are combined with
        # shifted adds — no accumulator scratch, no partial-sum VMEM traffic.
        a = lhs_ref[...].reshape(H * Wp, 3 * C)
        acc = jnp.dot(a, w_ref[...], preferred_element_type=jnp.float32)
        acc3 = acc.reshape(H, Wp, 3 * Cp)
        return (acc3[:, 0:W, 0:C]
                + acc3[:, 1:W + 1, Cp:Cp + C]
                + acc3[:, 2:W + 2, 2 * Cp:2 * Cp + C])        # (H, W, C) f32

    # conv1 -> folded-BN1 bias -> ReLU (intermediate never leaves VMEM).
    build_lhs(x_ref[0])
    b1 = b1_ref[...][:, 0:C].reshape(1, 1, C)
    h = jnp.maximum(conv3x3(w1_ref) + b1, 0.0)

    # conv2 -> folded-BN2 bias -> residual add (exact f32 x) -> ReLU.
    build_lhs(h)
    b2 = b2_ref[...][:, 0:C].reshape(1, 1, C)
    f = conv3x3(w2_ref) + b2
    out_ref[0] = jnp.maximum(f + x_ref[0], 0.0).astype(out_ref.dtype)


def _fold_bn(gamma, beta, mean, var, eps):
    scale = gamma / jnp.sqrt(var + eps)
    return scale, beta - mean * scale


def _pack_conv_weights(w_oihw, scale, Cp):
    """OIHW -> (3*cin, 3*Cp): kh folded into K, kw packed along N, BN-scale folded."""
    O, I, KH, KW = w_oihw.shape
    w = jnp.transpose(w_oihw, (2, 3, 1, 0)) * scale.reshape(1, 1, 1, O)  # (kh,kw,I,O)
    w = jnp.pad(w, ((0, 0), (0, 0), (0, 0), (0, Cp - O)))                # O -> Cp
    w = jnp.transpose(w, (0, 2, 1, 3)).reshape(KH * I, KW * Cp)          # (kh*I, kw*Cp)
    return w.astype(jnp.bfloat16)


def res_block_imagenet_nhwc(x_nhwc, params, eps=1e-5):
    """NHWC-native fused forward (preferred entry point inside a network)."""
    N, H, W, C = x_nhwc.shape
    O, I = params["w1"].shape[:2]
    assert O == I == C, "s=1 basic block requires out_channels == in_channels"

    Cp = _round_up(C, 128)       # lane-dense matmul-output channel block
    Wp = _round_up(W + 2, 16)    # bf16 sublane-aligned padded row width

    scale1, bias1 = _fold_bn(params["g1"], params["b1"],
                             params["m1"], params["v1"], eps)
    scale2, bias2 = _fold_bn(params["g2"], params["b2"],
                             params["m2"], params["v2"], eps)
    w1 = _pack_conv_weights(params["w1"], scale1, Cp)
    w2 = _pack_conv_weights(params["w2"], scale2, Cp)
    b1 = jnp.pad(bias1, (0, Cp - C)).reshape(1, Cp).astype(jnp.float32)
    b2 = jnp.pad(bias2, (0, Cp - C)).reshape(1, Cp).astype(jnp.float32)

    kernel = functools.partial(_fused_resblock_kernel,
                               H=H, W=W, C=C, Cp=Cp, Wp=Wp)

    # Constant operands: whole-array VMEM residency (no per-step double buffer).
    const_spec = pl.BlockSpec(memory_space=pltpu.MemorySpace.VMEM)

    return pl.pallas_call(
        kernel,
        out_shape=jax.ShapeDtypeStruct((N, H, W, C), x_nhwc.dtype),
        grid=(N,),
        in_specs=[
            pl.BlockSpec((1, H, W, C), lambda n: (n, 0, 0, 0)),
            const_spec,   # w1
            const_spec,   # b1
            const_spec,   # w2
            const_spec,   # b2
        ],
        out_specs=pl.BlockSpec((1, H, W, C), lambda n: (n, 0, 0, 0)),
        scratch_shapes=[pltpu.VMEM((H, Wp, 3 * C), jnp.bfloat16)],
        compiler_params=pltpu.CompilerParams(
            dimension_semantics=("parallel",),
            vmem_limit_bytes=32 * 1024 * 1024,
        ),
    )(x_nhwc, w1, b1, w2, b2)


def res_block_imagenet(x_nchw, params, eps=1e-5):
    """PyTorch-facing NCHW adapter.

    In a full network, keep activations NHWC and call res_block_imagenet_nhwc
    directly — these two transposes are full HBM read+write passes.
    """
    x = jnp.transpose(x_nchw, (0, 2, 3, 1))                    # NCHW -> NHWC
    out = res_block_imagenet_nhwc(x, params, eps)
    return jnp.transpose(out, (0, 3, 1, 2))                    # NHWC -> NCHW


def _reference(x_nchw, params, eps=1e-5):
    """Pure-JAX f32 reference of the PyTorch forward (sanity check)."""
    x = jnp.transpose(x_nchw, (0, 2, 3, 1))

    def conv(h, w_oihw):
        w = jnp.transpose(w_oihw, (2, 3, 1, 0))                # HWIO
        return jax.lax.conv_general_dilated(
            h, w, window_strides=(1, 1), padding=((1, 1), (1, 1)),
            dimension_numbers=("NHWC", "HWIO", "NHWC"),
            precision=jax.lax.Precision.HIGHEST)

    def bn(h, g, b, m, v):
        return (h - m) / jnp.sqrt(v + eps) * g + b

    h = jax.nn.relu(bn(conv(x, params["w1"]),
                       params["g1"], params["b1"], params["m1"], params["v1"]))
    f = bn(conv(h, params["w2"]),
           params["g2"], params["b2"], params["m2"], params["v2"])
    out = jax.nn.relu(x + f)
    return jnp.transpose(out, (0, 3, 1, 2))


def make_params(key, ins, outs):
    k1, k2 = jax.random.split(key)
    return {
        "w1": 0.1 * jax.random.normal(k1, (outs, ins, 3, 3), jnp.float32),
        "w2": 0.1 * jax.random.normal(k2, (outs, outs, 3, 3), jnp.float32),
        "g1": 1.0 + 0.01 * jnp.arange(outs, dtype=jnp.float32),
        "b1": 0.02 * jnp.arange(outs, dtype=jnp.float32),
        "m1": 0.005 * jnp.arange(outs, dtype=jnp.float32),
        "v1": 1.0 + 0.03 * jnp.arange(outs, dtype=jnp.float32),
        "g2": 1.0 - 0.01 * jnp.arange(outs, dtype=jnp.float32),
        "b2": -0.02 * jnp.arange(outs, dtype=jnp.float32),
        "m2": 0.01 * jnp.arange(outs, dtype=jnp.float32),
        "v2": 1.0 + 0.05 * jnp.arange(outs, dtype=jnp.float32),
    }


if __name__ == "__main__":
    N, C, H, W = 2, 8, 16, 16          # ins == outs, s == 1
    key = jax.random.PRNGKey(0)
    kx, kp = jax.random.split(key)
    x = jax.random.normal(kx, (N, C, H, W), jnp.float32)
    params = make_params(kp, ins=C, outs=C)

    out = jax.jit(res_block_imagenet)(x, params)
    out = jax.block_until_ready(out)
    assert out.shape == (N, C, H, W) and out.dtype == jnp.float32

    # Sanity-check against a pure-JAX f32 reference (bf16 matmul operands =>
    # loose tolerance; gross index/fold/packing bugs would be O(1) errors).
    ref = _reference(x, params)
    err = float(jnp.max(jnp.abs(out - ref)))
    assert err < 1e-1, f"max |out - ref| too large: {err}"
    print("KERNEL_OK")
</pallas_src>

<mosaic_0001>
module attributes {stable_mosaic.version = 11 : i64} {
  func.func @_fused_resblock_kernel(%arg0: i32, %arg1: memref<1x16x16x8xf32, #tpu.memory_space<vmem>>, %arg2: memref<24x384xbf16, #tpu.memory_space<vmem>>, %arg3: memref<1x128xf32, #tpu.memory_space<vmem>>, %arg4: memref<24x384xbf16, #tpu.memory_space<vmem>>, %arg5: memref<1x128xf32, #tpu.memory_space<vmem>>, %arg6: memref<1x16x16x8xf32, #tpu.memory_space<vmem>>, %arg7: memref<16x32x24xbf16, #tpu.memory_space<vmem>>) attributes {dimension_semantics = [#tpu.dimension_semantics<parallel>], iteration_bounds = array<i64: 2>, scalar_prefetch = 0 : i64, scratch_operands = 1 : i64, tpu.core_type = #tpu.core_type<tc>, window_params = [{transform_indices = @transform_0, window_bounds = array<i64: 1, 16, 16, 8>}, {pipeline_mode = #tpu.pipeline_mode<synchronous>, transform_indices = @transform_1, window_bounds = array<i64: 24, 384>}, {pipeline_mode = #tpu.pipeline_mode<synchronous>, transform_indices = @transform_2, window_bounds = array<i64: 1, 128>}, {pipeline_mode = #tpu.pipeline_mode<synchronous>, transform_indices = @transform_3, window_bounds = array<i64: 24, 384>}, {pipeline_mode = #tpu.pipeline_mode<synchronous>, transform_indices = @transform_4, window_bounds = array<i64: 1, 128>}, {transform_indices = @transform_5, window_bounds = array<i64: 1, 16, 16, 8>}]} {
    %c0 = arith.constant 0 : index
    %c0_0 = arith.constant 0 : index
    %c0_1 = arith.constant 0 : index
    %c0_2 = arith.constant 0 : index
    %0 = vector.load %arg1[%c0, %c0_0, %c0_1, %c0_2] : memref<1x16x16x8xf32, #tpu.memory_space<vmem>>, vector<1x16x16x8xf32>
    %1 = vector.shape_cast %0 : vector<1x16x16x8xf32> to vector<16x16x8xf32>
    %cst = arith.constant 0.000000e+00 : bf16
    %2 = vector.broadcast %cst : bf16 to vector<16x1x8xbf16>
    %3 = arith.truncf %1 : vector<16x16x8xf32> to vector<16x16x8xbf16>
    %cst_3 = arith.constant 0.000000e+00 : bf16
    %4 = vector.broadcast %cst_3 : bf16 to vector<16x15x8xbf16>
    %5 = tpu.concatenate %2, %3, %4 in 1 : vector<16x1x8xbf16>, vector<16x16x8xbf16>, vector<16x15x8xbf16> -> vector<16x32x8xbf16>
    %cst_4 = arith.constant 0.000000e+00 : bf16
    %6 = vector.broadcast %cst_4 : bf16 to vector<1x32x8xbf16>
    %c0_5 = arith.constant 0 : index
    %c0_6 = arith.constant 0 : index
    %c0_7 = arith.constant 0 : index
    %7 = vector.load %arg7[%c0_5, %c0_6, %c0_7] : memref<16x32x24xbf16, #tpu.memory_space<vmem>>, vector<1x32x8xbf16>
    tpu.vector_store %arg7[%c0_5, %c0_6, %c0_7], %6 {strides = array<i32>} : memref<16x32x24xbf16, #tpu.memory_space<vmem>>, vector<1x32x8xbf16>,
    %8 = vector.extract_strided_slice %5 {offsets = [0, 0, 0], sizes = [15, 32, 8], strides = [1, 1, 1]} : vector<16x32x8xbf16> to vector<15x32x8xbf16>
    %c1 = arith.constant 1 : index
    %c0_8 = arith.constant 0 : index
    %c0_9 = arith.constant 0 : index
    %9 = vector.load %arg7[%c1, %c0_8, %c0_9] : memref<16x32x24xbf16, #tpu.memory_space<vmem>>, vector<15x32x8xbf16>
    tpu.vector_store %arg7[%c1, %c0_8, %c0_9], %8 {strides = array<i32>} : memref<16x32x24xbf16, #tpu.memory_space<vmem>>, vector<15x32x8xbf16>,
    %c0_10 = arith.constant 0 : index
    %c0_11 = arith.constant 0 : index
    %c8 = arith.constant 8 : index
    %10 = vector.load %arg7[%c0_10, %c0_11, %c8] : memref<16x32x24xbf16, #tpu.memory_space<vmem>>, vector<16x32x8xbf16>
    tpu.vector_store %arg7[%c0_10, %c0_11, %c8], %5 {strides = array<i32>} : memref<16x32x24xbf16, #tpu.memory_space<vmem>>, vector<16x32x8xbf16>,
    %11 = vector.extract_strided_slice %5 {offsets = [1, 0, 0], sizes = [15, 32, 8], strides = [1, 1, 1]} : vector<16x32x8xbf16> to vector<15x32x8xbf16>
    %c0_12 = arith.constant 0 : index
    %c0_13 = arith.constant 0 : index
    %c16 = arith.constant 16 : index
    %12 = vector.load %arg7[%c0_12, %c0_13, %c16] : memref<16x32x24xbf16, #tpu.memory_space<vmem>>, vector<15x32x8xbf16>
    tpu.vector_store %arg7[%c0_12, %c0_13, %c16], %11 {strides = array<i32>} : memref<16x32x24xbf16, #tpu.memory_space<vmem>>, vector<15x32x8xbf16>,
    %c15 = arith.constant 15 : index
    %c0_14 = arith.constant 0 : index
    %c16_15 = arith.constant 16 : index
    %13 = vector.load %arg7[%c15, %c0_14, %c16_15] : memref<16x32x24xbf16, #tpu.memory_space<vmem>>, vector<1x32x8xbf16>
    tpu.vector_store %arg7[%c15, %c0_14, %c16_15], %6 {strides = array<i32>} : memref<16x32x24xbf16, #tpu.memory_space<vmem>>, vector<1x32x8xbf16>,
    %c0_16 = arith.constant 0 : index
    %c0_17 = arith.constant 0 : index
    %14 = vector.load %arg3[%c0_16, %c0_17] : memref<1x128xf32, #tpu.memory_space<vmem>>, vector<1x128xf32>
    %15 = vector.extract_strided_slice %14 {offsets = [0, 0], sizes = [1, 8], strides = [1, 1]} : vector<1x128xf32> to vector<1x8xf32>
    %16 = vector.shape_cast %15 : vector<1x8xf32> to vector<1x1x8xf32>
    %c0_18 = arith.constant 0 : index
    %c0_19 = arith.constant 0 : index
    %c0_20 = arith.constant 0 : index
    %17 = vector.load %arg7[%c0_18, %c0_19, %c0_20] : memref<16x32x24xbf16, #tpu.memory_space<vmem>>, vector<16x32x24xbf16>
    %18 = vector.shape_cast %17 : vector<16x32x24xbf16> to vector<512x24xbf16>
    %c0_21 = arith.constant 0 : index
    %c0_22 = arith.constant 0 : index
    %19 = vector.load %arg2[%c0_21, %c0_22] : memref<24x384xbf16, #tpu.memory_space<vmem>>, vector<24x384xbf16>
    %cst_23 = arith.constant dense<0.000000e+00> : vector<512x384xf32>
    %20 = tpu.matmul %18, %19, %cst_23 {dimension_numbers = #tpu.dot_dimension_numbers<[1], [0], [0], [1], [0, 0, 1, 1], [], []>} : vector<512x24xbf16>, vector<24x384xbf16>, vector<512x384xf32> -> vector<512x384xf32>
    %21 = vector.shape_cast %20 : vector<512x384xf32> to vector<16x32x384xf32>
    %22 = vector.extract_strided_slice %21 {offsets = [0, 0, 0], sizes = [16, 16, 8], strides = [1, 1, 1]} : vector<16x32x384xf32> to vector<16x16x8xf32>
    %23 = vector.extract_strided_slice %21 {offsets = [0, 1, 128], sizes = [16, 16, 8], strides = [1, 1, 1]} : vector<16x32x384xf32> to vector<16x16x8xf32>
    %24 = arith.addf %22, %23 : vector<16x16x8xf32>
    %25 = vector.extract_strided_slice %21 {offsets = [0, 2, 256], sizes = [16, 16, 8], strides = [1, 1, 1]} : vector<16x32x384xf32> to vector<16x16x8xf32>
    %26 = arith.addf %24, %25 : vector<16x16x8xf32>
    %27 = vector.broadcast %16 : vector<1x1x8xf32> to vector<16x16x8xf32>
    %28 = arith.addf %26, %27 : vector<16x16x8xf32>
    %cst_24 = arith.constant 0.000000e+00 : f32
    %29 = vector.broadcast %cst_24 : f32 to vector<16x16x8xf32>
    %30 = arith.maximumf %28, %29 : vector<16x16x8xf32>
    %cst_25 = arith.constant 0.000000e+00 : bf16
    %31 = vector.broadcast %cst_25 : bf16 to vector<16x1x8xbf16>
    %32 = arith.truncf %30 : vector<16x16x8xf32> to vector<16x16x8xbf16>
    %cst_26 = arith.constant 0.000000e+00 : bf16
    %33 = vector.broadcast %cst_26 : bf16 to vector<16x15x8xbf16>
    %34 = tpu.concatenate %31, %32, %33 in 1 : vector<16x1x8xbf16>, vector<16x16x8xbf16>, vector<16x15x8xbf16> -> vector<16x32x8xbf16>
    %cst_27 = arith.constant 0.000000e+00 : bf16
    %35 = vector.broadcast %cst_27 : bf16 to vector<1x32x8xbf16>
    %c0_28 = arith.constant 0 : index
    %c0_29 = arith.constant 0 : index
    %c0_30 = arith.constant 0 : index
    %36 = vector.load %arg7[%c0_28, %c0_29, %c0_30] : memref<16x32x24xbf16, #tpu.memory_space<vmem>>, vector<1x32x8xbf16>
    tpu.vector_store %arg7[%c0_28, %c0_29, %c0_30], %35 {strides = array<i32>} : memref<16x32x24xbf16, #tpu.memory_space<vmem>>, vector<1x32x8xbf16>,
    %37 = vector.extract_strided_slice %34 {offsets = [0, 0, 0], sizes = [15, 32, 8], strides = [1, 1, 1]} : vector<16x32x8xbf16> to vector<15x32x8xbf16>
    %c1_31 = arith.constant 1 : index
    %c0_32 = arith.constant 0 : index
    %c0_33 = arith.constant 0 : index
    %38 = vector.load %arg7[%c1_31, %c0_32, %c0_33] : memref<16x32x24xbf16, #tpu.memory_space<vmem>>, vector<15x32x8xbf16>
    tpu.vector_store %arg7[%c1_31, %c0_32, %c0_33], %37 {strides = array<i32>} : memref<16x32x24xbf16, #tpu.memory_space<vmem>>, vector<15x32x8xbf16>,
    %c0_34 = arith.constant 0 : index
    %c0_35 = arith.constant 0 : index
    %c8_36 = arith.constant 8 : index
    %39 = vector.load %arg7[%c0_34, %c0_35, %c8_36] : memref<16x32x24xbf16, #tpu.memory_space<vmem>>, vector<16x32x8xbf16>
    tpu.vector_store %arg7[%c0_34, %c0_35, %c8_36], %34 {strides = array<i32>} : memref<16x32x24xbf16, #tpu.memory_space<vmem>>, vector<16x32x8xbf16>,
    %40 = vector.extract_strided_slice %34 {offsets = [1, 0, 0], sizes = [15, 32, 8], strides = [1, 1, 1]} : vector<16x32x8xbf16> to vector<15x32x8xbf16>
    %c0_37 = arith.constant 0 : index
    %c0_38 = arith.constant 0 : index
    %c16_39 = arith.constant 16 : index
    %41 = vector.load %arg7[%c0_37, %c0_38, %c16_39] : memref<16x32x24xbf16, #tpu.memory_space<vmem>>, vector<15x32x8xbf16>
    tpu.vector_store %arg7[%c0_37, %c0_38, %c16_39], %40 {strides = array<i32>} : memref<16x32x24xbf16, #tpu.memory_space<vmem>>, vector<15x32x8xbf16>,
    %c15_40 = arith.constant 15 : index
    %c0_41 = arith.constant 0 : index
    %c16_42 = arith.constant 16 : index
    %42 = vector.load %arg7[%c15_40, %c0_41, %c16_42] : memref<16x32x24xbf16, #tpu.memory_space<vmem>>, vector<1x32x8xbf16>
    tpu.vector_store %arg7[%c15_40, %c0_41, %c16_42], %35 {strides = array<i32>} : memref<16x32x24xbf16, #tpu.memory_space<vmem>>, vector<1x32x8xbf16>,
    %c0_43 = arith.constant 0 : index
    %c0_44 = arith.constant 0 : index
    %43 = vector.load %arg5[%c0_43, %c0_44] : memref<1x128xf32, #tpu.memory_space<vmem>>, vector<1x128xf32>
    %44 = vector.extract_strided_slice %43 {offsets = [0, 0], sizes = [1, 8], strides = [1, 1]} : vector<1x128xf32> to vector<1x8xf32>
    %45 = vector.shape_cast %44 : vector<1x8xf32> to vector<1x1x8xf32>
    %c0_45 = arith.constant 0 : index
    %c0_46 = arith.constant 0 : index
    %c0_47 = arith.constant 0 : index
    %46 = vector.load %arg7[%c0_45, %c0_46, %c0_47] : memref<16x32x24xbf16, #tpu.memory_space<vmem>>, vector<16x32x24xbf16>
    %47 = vector.shape_cast %46 : vector<16x32x24xbf16> to vector<512x24xbf16>
    %c0_48 = arith.constant 0 : index
    %c0_49 = arith.constant 0 : index
    %48 = vector.load %arg4[%c0_48, %c0_49] : memref<24x384xbf16, #tpu.memory_space<vmem>>, vector<24x384xbf16>
    %cst_50 = arith.constant dense<0.000000e+00> : vector<512x384xf32>
    %49 = tpu.matmul %47, %48, %cst_50 {dimension_numbers = #tpu.dot_dimension_numbers<[1], [0], [0], [1], [0, 0, 1, 1], [], []>} : vector<512x24xbf16>, vector<24x384xbf16>, vector<512x384xf32> -> vector<512x384xf32>
    %50 = vector.shape_cast %49 : vector<512x384xf32> to vector<16x32x384xf32>
    %51 = vector.extract_strided_slice %50 {offsets = [0, 0, 0], sizes = [16, 16, 8], strides = [1, 1, 1]} : vector<16x32x384xf32> to vector<16x16x8xf32>
    %52 = vector.extract_strided_slice %50 {offsets = [0, 1, 128], sizes = [16, 16, 8], strides = [1, 1, 1]} : vector<16x32x384xf32> to vector<16x16x8xf32>
    %53 = arith.addf %51, %52 : vector<16x16x8xf32>
    %54 = vector.extract_strided_slice %50 {offsets = [0, 2, 256], sizes = [16, 16, 8], strides = [1, 1, 1]} : vector<16x32x384xf32> to vector<16x16x8xf32>
    %55 = arith.addf %53, %54 : vector<16x16x8xf32>
    %56 = vector.broadcast %45 : vector<1x1x8xf32> to vector<16x16x8xf32>
    %57 = arith.addf %55, %56 : vector<16x16x8xf32>
    %c0_51 = arith.constant 0 : index
    %c0_52 = arith.constant 0 : index
    %c0_53 = arith.constant 0 : index
    %c0_54 = arith.constant 0 : index
    %58 = vector.load %arg1[%c0_51, %c0_52, %c0_53, %c0_54] : memref<1x16x16x8xf32, #tpu.memory_space<vmem>>, vector<1x16x16x8xf32>
    %59 = vector.shape_cast %58 : vector<1x16x16x8xf32> to vector<16x16x8xf32>
    %60 = arith.addf %57, %59 : vector<16x16x8xf32>
    %cst_55 = arith.constant 0.000000e+00 : f32
    %61 = vector.broadcast %cst_55 : f32 to vector<16x16x8xf32>
    %62 = arith.maximumf %60, %61 : vector<16x16x8xf32>
    %c0_56 = arith.constant 0 : index
    %c0_57 = arith.constant 0 : index
    %c0_58 = arith.constant 0 : index
    %c0_59 = arith.constant 0 : index
    %63 = vector.load %arg6[%c0_56, %c0_57, %c0_58, %c0_59] : memref<1x16x16x8xf32, #tpu.memory_space<vmem>>, vector<1x16x16x8xf32>
    %64 = vector.shape_cast %63 : vector<1x16x16x8xf32> to vector<16x16x8xf32>
    %65 = vector.shape_cast %62 : vector<16x16x8xf32> to vector<1x16x16x8xf32>
    tpu.vector_store %arg6[%c0_56, %c0_57, %c0_58, %c0_59], %65 {strides = array<i32>} : memref<1x16x16x8xf32, #tpu.memory_space<vmem>>, vector<1x16x16x8xf32>,
    return
  }
  func.func @transform_0(%arg0: i32) -> (i32, i32, i32, i32) {
    %c0_i32 = arith.constant 0 : i32
    %c0_i32_0 = arith.constant 0 : i32
    %c0_i32_1 = arith.constant 0 : i32
    %c0_i32_2 = arith.constant 0 : i32
    return %arg0, %c0_i32, %c0_i32_0, %c0_i32_1 : i32, i32, i32, i32
  }
  func.func @transform_1(%arg0: i32) -> (i32, i32) {
    %c0_i32 = arith.constant 0 : i32
    %c0_i32_0 = arith.constant 0 : i32
    %c0_i32_1 = arith.constant 0 : i32
    return %c0_i32, %c0_i32_0 : i32, i32
  }
  func.func @transform_2(%arg0: i32) -> (i32, i32) {
    %c0_i32 = arith.constant 0 : i32
    %c0_i32_0 = arith.constant 0 : i32
    %c0_i32_1 = arith.constant 0 : i32
    return %c0_i32, %c0_i32_0 : i32, i32
  }
  func.func @transform_3(%arg0: i32) -> (i32, i32) {
    %c0_i32 = arith.constant 0 : i32
    %c0_i32_0 = arith.constant 0 : i32
    %c0_i32_1 = arith.constant 0 : i32
    return %c0_i32, %c0_i32_0 : i32, i32
  }
  func.func @transform_4(%arg0: i32) -> (i32, i32) {
    %c0_i32 = arith.constant 0 : i32
    %c0_i32_0 = arith.constant 0 : i32
    %c0_i32_1 = arith.constant 0 : i32
    return %c0_i32, %c0_i32_0 : i32, i32
  }
  func.func @transform_5(%arg0: i32) -> (i32, i32, i32, i32) {
    %c0_i32 = arith.constant 0 : i32
    %c0_i32_0 = arith.constant 0 : i32
    %c0_i32_1 = arith.constant 0 : i32
    %c0_i32_2 = arith.constant 0 : i32
    return %arg0, %c0_i32, %c0_i32_0, %c0_i32_1 : i32, i32, i32, i32
  }
}

</mosaic_0001>

<bundles_post_ra>
// kernel: res_block_imagenet.1
= control target key start
LH: loop header
LB: loop body
LE: loop exit
PB: predicated region body
PF: predicated region fallthrough
CT: control target
= control target key end

     0   :  { %s5707_s18 = smov 0   ;;  %s7622_s0 = inlined_call_operand.vmem [shape: f32[2,16,16,8], index: 0, kind: input, shape index: {}]   ;;  %s7623_s1 = inlined_call_operand.vmem [shape: bf16[24,384], index: 1, kind: input, shape index: {}]   ;;  %s7624_s2 = inlined_call_operand.vmem [shape: f32[1,128], index: 2, kind: input, shape index: {}]   ;;  %s7625_s3 = inlined_call_operand.vmem [shape: bf16[24,384], index: 3, kind: input, shape index: {}]   ;;  %s7626_s4 = inlined_call_operand.vmem [shape: f32[1,128], index: 4, kind: input, shape index: {}]   ;;  %s7627_s5 = inlined_call_operand.vmem [shape: f32[2,16,16,8], index: 5, kind: output, shape index: {}]  }
   0x1 LB: > { %s5074_s19 = sadd.s32 4294967295, %s5672_s18   ;;  %p5078_p0 = scmp.ge.s32.totalorder %s5672_s18, 1  ;;  %s5672_s18 = sphi %s5707_s18, %s15_s18  }
   0x2   : > { %p187_p1 = scmp.lt.s32.totalorder %s5672_s18, 3 }
   0x4   : > { %p188_p2 = pnand %p5078_p0, %p187_p1 }
   0x5   : > { %p215_p3 = scmp.lt.s32.totalorder (!%p188_p2), %s5074_s19, 1  ;;  %s5674_s24 = smov (!%p188_p2), 8  }
   0x6   : > { %191 = sbr.rel (%p188_p2) target bundleno = 1386 (0x56a), region = 40  ;;  %s5675_s25 = smov (!%p188_p2), 16  }
   0xb   : > { %s7631_s19 = smov (!%p215_p3, %s5074_s19), 1  ;;  %vm514_vm0 = vcmask 1040384   ;;  %vm515_vm1 = vsmask.f32 256  ;;  %vm549_vm3 = vcmask 60416   ;;  %vm1690_vm4 = vcmask 1043456  }
   0xc   : > { %s5557_s20 = sshll.u32 %s7631_s19, 8  ;;  %vm5731_vm2 = vmand %vm514_vm0, %vm515_vm1  ;;  %vm1027_vm5 = vcmask 126016   ;;  %vm1272_vm6 = vcmask 191616   ;;  %vm1593_vm7 = vcmask 195584   ;;  %vm2191_vm8 = vcmask 1046528  }
   0xd   : > { %s5723_s23 = scalar_lea.vmem %s7622_s0, %s5557_s20  ;;  %vm2384_vm9 = vcmask 1045504   ;;  %s7073_s28 = scalar_lea.vmem %s7627_s5, %s5557_s20  ;;  %vm4986_vm10 = vcmask 64512  }
   0xe   : > { %v242_v0 = vld [vmem:[%s5723_s23 + $0x80] sm:$0xff]  ;;  %v243_v1 = vld [vmem:[%s5723_s23 + $0x88] sm:$0xff]  ;;  %v244_v2 = vld [vmem:[%s5723_s23 + $0x90] sm:$0xff] }
   0xf   : > { %v274_v3 = vpack.c.bf16 %v242_v0, %v242_v0  ;;  %v275_v4 = vpack.c.bf16 %v243_v1, %v243_v1  ;;  %v245_v5 = vld [vmem:[%s5723_s23 + $0x98] sm:$0xff]  ;;  %v276_v6 = vpack.c.bf16 %v244_v2, %v244_v2  ;;  %v246_v19 = vld [vmem:[%s5723_s23 + $0xa0] sm:$0xff]  ;;  %v247_v20 = vld [vmem:[%s5723_s23 + $0xa8] sm:$0xff] }
  0x10   : > { %v277_v7 = vpack.c.bf16 %v245_v5, %v245_v5  ;;  %v278_v23 = vpack.c.bf16 %v246_v19, %v246_v19  ;;  %v279_v24 = vpack.c.bf16 %v247_v20, %v247_v20  ;;  %v248_v52 = vld [vmem:[%s5723_s23 + $0xb0] sm:$0xff]  ;;  %v249_v53 = vld [vmem:[%s5723_s23 + $0xb8] sm:$0xff] }
  0x11   : > { %v338_v8 = vunpack.c.l.b16 %v274_v3  ;;  %v339_v9 = vunpack.c.l.b16 %v275_v4  ;;  %v340_v10 = vunpack.c.l.b16 %v276_v6  ;;  %v280_v57 = vpack.c.bf16 %v248_v52, %v248_v52 }
  0x12   : > { %v341_v11 = vunpack.c.l.b16 %v277_v7  ;;  %v342_v29 = vunpack.c.l.b16 %v278_v23  ;;  %v343_v31 = vunpack.c.l.b16 %v279_v24  ;;  %v281_v58 = vpack.c.bf16 %v249_v53, %v249_v53 }
  0x13   : > { %v362_v12 = vpack.c.b16 %v339_v9, %v338_v8  ;;  %v344_v61 = vunpack.c.l.b16 %v280_v57 }
  0x14   : > { %v363_v13 = vpack.c.b16 %v341_v11, %v340_v10  ;;  %v364_v37 = vpack.c.b16 %v343_v31, %v342_v29  ;;  %v345_v62 = vunpack.c.l.b16 %v281_v58  ;;  %v250_v10 = vld [vmem:[%s5723_s23 + $0xc0] sm:$0xff]  ;;  %v251_v11 = vld [vmem:[%s5723_s23 + $0xc8] sm:$0xff] }
  0x15   : > { %v427_v14 = vshrl.u32 %v362_v12, 16  ;;  %v430_v15 = vshll.u32 %v362_v12, 16  ;;  %v282_v12 = vpack.c.bf16 %v250_v10, %v250_v10 }
  0x16   : > { %v434_v16 = vshrl.u32 %v363_v13, 16  ;;  %v437_v17 = vshll.u32 %v363_v13, 16  ;;  %v441_v42 = vshrl.u32 %v364_v37, 16  ;;  %v444_v48 = vshll.u32 %v364_v37, 16 }
  0x17   : > { %v429_v18 = vrot.slane %v427_v14, 7  ;;  %v365_v2 = vpack.c.b16 %v345_v62, %v344_v61  ;;  %v283_v13 = vpack.c.bf16 %v251_v11, %v251_v11  ;;  %v253_v61 = vld [vmem:[%s5723_s23 + $0xd8] sm:$0xff]  ;;  %v5213_v11 = vld [vmem:[%s7623_s1] sm:$0xf] }
  0x18   : > { %v436_v22 = vrot.slane %v434_v16, 7  ;;  %v443_v47 = vrot.slane %v441_v42, 7 }
  0x19   : > { %v432_v25 = vor.u32 %v430_v15, %v429_v18  ;;  %v541_v26 = vsel %vm5731_vm2, %v429_v18, 0  ;;  %v448_v4 = vshrl.u32 %v365_v2, 16  ;;  %v451_v7 = vshll.u32 %v365_v2, 16 }
  0x1a   : > { %v439_v27 = vor.u32 %v437_v17, %v436_v22  ;;  %v618_v28 = vunpack.c.l.b16 %v541_v26  ;;  %v619_v38 = vunpack.c.h.b16 %v541_v26  ;;  %v542_v46 = vsel %vm5731_vm2, %v436_v22, 0 }
  0x1b   : > { %v525_v30 = vsel %vm5731_vm2, 0, %v432_v25  ;;  %v622_v49 = vunpack.c.l.b16 %v542_v46  ;;  %v623_v50 = vunpack.c.h.b16 %v542_v46  ;;  %v446_v51 = vor.u32 %v444_v48, %v443_v47 }
  0x1c   : > { %v616_v32 = vunpack.c.l.b16 %v525_v30  ;;  %v526_v33 = vsel %vm5731_vm2, 0, %v439_v27  ;;  %v5741_v34 = vpack.c.b16 %v618_v28, %v618_v28  ;;  %v617_v40 = vunpack.c.h.b16 %v525_v30 }
  0x1d   : > { %v620_v35 = vunpack.c.l.b16 %v526_v33  ;;  %v621_v41 = vunpack.c.h.b16 %v526_v33  ;;  %v5753_v43 = vpack.c.b16 %v619_v38, %v619_v38  ;;  %v682_v54 = vpack.c.b16 %v622_v49, %v622_v49  ;;  %v240_v38 = vld [vmem:[%s5723_s23 + $0x70] sm:$0xff] }
  0x1e   : > { %v5743_v36 = vpack.c.b16 %v616_v32, %v616_v32  ;;  %903 = vrot.lane.b32.xlu2 %v5741_v34, %s5674_s24  ;;  %v5755_v44 = vpack.c.b16 %v617_v40, %v617_v40  ;;  %v5769_v55 = vpack.c.b16 %v623_v50, %v623_v50  ;;  %v527_v56 = vsel %vm5731_vm2, 0, %v446_v51  ;;  %799 = vst.msk [vmem:[#allocation2 + $0x98] sm:$0xf] %vm549_vm3, %v5741_v34 }
  0x1f   : > { %v5747_v39 = vpack.c.b16 %v620_v35, %v620_v35  ;;  %v5757_v45 = vpack.c.b16 %v621_v41, %v621_v41  ;;  %v625_v59 = vunpack.c.h.b16 %v527_v56  ;;  %v624_v60 = vunpack.c.l.b16 %v527_v56  ;;  %800 = vst.msk [vmem:[#allocation2 + $0x9c] sm:$0xf] %vm549_vm3, %v5753_v43 }
  0x20   : > { %899 = vrot.lane.b32.xlu0 %v5743_v36, %s5674_s24  ;;  %v543_v1 = vsel %vm5731_vm2, %v443_v47, 0  ;;  %v450_v6 = vrot.slane %v448_v4, 7  ;;  %v346_v15 = vunpack.c.l.b16 %v282_v12  ;;  %v347_v16 = vunpack.c.l.b16 %v283_v13  ;;  %797 = vst.msk [vmem:[#allocation2 + $0x90] sm:$0xf] %vm549_vm3, %v5743_v36  ;;  %v5592_v12 = vld [vmem:[%s7623_s1 + $0x8] sm:$0xf0] }
  0x21   : > { %1156 = vrot.lane.b32.xlu1 %v5747_v39, %s5675_s25  ;;  %v685_v63 = vpack.c.b16 %v625_v59, %v625_v59  ;;  %v684_v0 = vpack.c.b16 %v624_v60, %v624_v60  ;;  %v626_v3 = vunpack.c.l.b16 %v543_v1  ;;  %v627_v8 = vunpack.c.h.b16 %v543_v1  ;;  %798 = vst.msk [vmem:[#allocation2 + $0x94] sm:$0xf] %vm549_vm3, %v5755_v44  ;;  %v252_v60 = vld [vmem:[%s5723_s23 + $0xd0] sm:$0xff] }
  0x22   : > { %v453_v9 = vor.u32 %v451_v7, %v450_v6  ;;  %v366_v18 = vpack.c.b16 %v347_v16, %v346_v15  ;;  %v544_v27 = vsel %vm5731_vm2, %v450_v6, 0  ;;  %801 = vst.msk [vmem:[#allocation2 + $0xa0] sm:$0xf] %vm549_vm3, %v5747_v39  ;;  %v272_v40 = vpack.c.bf16 %v240_v38, %v240_v38 }
  0x23   : > { %v686_v5 = vpack.c.b16 %v626_v3, %v626_v3  ;;  %v687_v14 = vpack.c.b16 %v627_v8, %v627_v8  ;;  %v631_v29 = vunpack.c.h.b16 %v544_v27  ;;  %802 = vst.msk [vmem:[#allocation2 + $0xa4] sm:$0xf] %vm549_vm3, %v5757_v45  ;;  %v630_v30 = vunpack.c.l.b16 %v544_v27 }
  0x24   : > { %v528_v17 = vsel %vm5731_vm2, 0, %v453_v9  ;;  %v455_v20 = vshrl.u32 %v366_v18, 16  ;;  %v458_v23 = vshll.u32 %v366_v18, 16  ;;  %803 = vst.msk [vmem:[#allocation2 + $0xa8] sm:$0xf] %vm549_vm3, %v682_v54  ;;  %v336_v42 = vunpack.c.l.b16 %v272_v40 }
  0x25   : > { %v628_v19 = vunpack.c.l.b16 %v528_v17  ;;  %v629_v22 = vunpack.c.h.b16 %v528_v17  ;;  %804 = vst.msk [vmem:[#allocation2 + $0xac] sm:$0xf] %vm549_vm3, %v5769_v55  ;;  %v5819_v32 = vpack.c.b16 %v631_v29, %v631_v29  ;;  %v690_v35 = vpack.c.b16 %v630_v30, %v630_v30  ;;  %v5591_v17 = vld [vmem:[%s7623_s1 + $0x4] sm:$0xf]  ;;  %v5215_v18 = vld [vmem:[%s7623_s1 + $0xc] sm:$0xf0] }
  0x26   : > { %905 = vrot.lane.b32.xlu2 %v5753_v43, %s5674_s24  ;;  %v457_v24 = vrot.slane %v455_v20, 7  ;;  %805 = vst.msk [vmem:[#allocation2 + $0xb0] sm:$0xf] %vm549_vm3, %v684_v0  ;;  %v285_v1 = vpack.c.bf16 %v253_v61, %v253_v61  ;;  %v5214_v20 = vor.u32 %v5592_v12, %v5213_v11  ;;  %v1408_v29 = vld [vmem:[%s7623_s1 + $0x20] sm:$0xf] }
  0x27   : > { %v688_v25 = vpack.c.b16 %v628_v19, %v628_v19  ;;  %v689_v26 = vpack.c.b16 %v629_v22, %v629_v22  ;;  %806 = vst.msk [vmem:[#allocation2 + $0xb4] sm:$0xf] %vm549_vm3, %v685_v63  ;;  %v5218_v22 = vor.u32 %v5591_v17, %v5215_v18 }
  0x28   : > { %901 = vrot.lane.b32.xlu0 %v5755_v44, %s5674_s24  ;;  %v460_v28 = vor.u32 %v458_v23, %v457_v24  ;;  %807 = vst.msk [vmem:[#allocation2 + $0xb8] sm:$0xf] %vm549_vm3, %v686_v5 }
  0x29   : > { %1158 = vrot.lane.b32.xlu1 %v5757_v45, %s5675_s25  ;;  %808 = vst.msk [vmem:[#allocation2 + $0xbc] sm:$0xf] %vm549_vm3, %v687_v14 }
  0x2a   : > { %v5815_v31 = vsel %vm5731_vm2, 0, %v460_v28  ;;  %809 = vst.msk [vmem:[#allocation2 + $0xc0] sm:$0xf] %vm549_vm3, %v688_v25 }
  0x2b   : > { %v633_v33 = vunpack.c.h.b16 %v5815_v31  ;;  %810 = vst.msk [vmem:[#allocation2 + $0xc4] sm:$0xf] %vm549_vm3, %v689_v26  ;;  %v632_v8 = vunpack.c.l.b16 %v5815_v31 }
  0x2c   : > { %811 = vst.msk [vmem:[#allocation2 + $0xc8] sm:$0xf] %vm549_vm3, %v690_v35 }
  0x2d   : > { %v5831_v37 = vpack.c.b16 %v633_v33, %v633_v33  ;;  %812 = vst.msk [vmem:[#allocation2 + $0xcc] sm:$0xf] %vm549_vm3, %v5819_v32  ;;  %v692_v19 = vpack.c.b16 %v632_v8, %v632_v8 }
  0x2e   : > { %907 = vrot.lane.b32.xlu2 %v5747_v39, %s5674_s24  ;;  %v241_v39 = vld [vmem:[%s5723_s23 + $0x78] sm:$0xff] }
  0x2f   : > { %814 = vst.msk [vmem:[#allocation2 + $0xd4] sm:$0xf] %vm549_vm3, %v5831_v37  ;;  %v273_v41 = vpack.c.bf16 %v241_v39, %v241_v39 }
  0x30   : > { %1160 = vrot.lane.b32.xlu0 %v682_v54, %s5675_s25  ;;  %813 = vst.msk [vmem:[#allocation2 + $0xd0] sm:$0xf] %vm549_vm3, %v692_v19 }
  0x31   : > { %1162 = vrot.lane.b32.xlu1 %v5769_v55, %s5675_s25 }
  0x36   : > { %1166 = vrot.lane.b32.xlu2 %v685_v63, %s5675_s25 }
  0x38   : > { %909 = vrot.lane.b32.xlu0 %v5757_v45, %s5674_s24  ;;  %v337_v45 = vunpack.c.l.b16 %v273_v41 }
  0x39   : > { %1164 = vrot.lane.b32.xlu1 %v684_v0, %s5675_s25 }
  0x3a   : > { %v361_v46 = vpack.c.b16 %v337_v45, %v336_v42 }
  0x3c   : > { %v420_v47 = vshrl.u32 %v361_v46, 16  ;;  %v423_v49 = vshll.u32 %v361_v46, 16 }
  0x3e   : > { %1168 = vrot.lane.b32.xlu2 %v686_v5, %s5675_s25  ;;  %v422_v48 = vrot.slane %v420_v47, 7 }
  0x40   : > { %911 = vrot.lane.b32.xlu0 %v682_v54, %s5674_s24  ;;  %v425_v50 = vor.u32 %v423_v49, %v422_v48  ;;  %v545_v54 = vsel %vm5731_vm2, %v457_v24, 0  ;;  %v540_v10 = vsel %vm5731_vm2, %v422_v48, 0 }
  0x41   : > { %913 = vrot.lane.b32.xlu1 %v5769_v55, %s5674_s24  ;;  %v635_v55 = vunpack.c.h.b16 %v545_v54  ;;  %v634_v56 = vunpack.c.l.b16 %v545_v54  ;;  %v614_v16 = vunpack.c.l.b16 %v540_v10  ;;  %v615_v33 = vunpack.c.h.b16 %v540_v10 }
  0x42   : > { %v524_v51 = vsel %vm5731_vm2, 0, %v425_v50  ;;  %v254_v50 = vld [vmem:[%s5723_s23 + $0xe0] sm:$0xff] }
  0x43   : > { %v612_v52 = vunpack.c.l.b16 %v524_v51  ;;  %v613_v57 = vunpack.c.h.b16 %v524_v51  ;;  %v5854_v58 = vpack.c.b16 %v635_v55, %v635_v55  ;;  %v5856_v59 = vpack.c.b16 %v634_v56, %v634_v56  ;;  %v255_v51 = vld [vmem:[%s5723_s23 + $0xe8] sm:$0xff] }
  0x44   : > { %v5892_v24 = vpack.c.b16 %v614_v16, %v614_v16  ;;  %v287_v54 = vpack.c.bf16 %v255_v51, %v255_v51 }
  0x45   : > { %v5848_v53 = vpack.c.b16 %v612_v52, %v612_v52  ;;  %v5860_v62 = vpack.c.b16 %v613_v57, %v613_v57  ;;  %816 = vst.msk [vmem:[#allocation2 + $0xdc] sm:$0xf] %vm549_vm3, %v5854_v58  ;;  %v286_v52 = vpack.c.bf16 %v254_v50, %v254_v50 }
  0x46   : > { %917 = vrot.lane.b32.xlu2 %v685_v63, %s5674_s24  ;;  %v1407_v63 = vld [vmem:[%s7623_s1 + $0x18] sm:$0xff]  ;;  %815 = vst.msk [vmem:[#allocation2 + $0xd8] sm:$0xf] %vm549_vm3, %v5856_v59  ;;  %v351_v57 = vunpack.c.l.b16 %v287_v54 }
  0x47   : > { %793 = vst.msk [vmem:[#allocation2 + $0x80] sm:$0xf] %vm549_vm3, %v5848_v53  ;;  %v1581_v2 = vunpack.c.l.b16 %v1407_v63  ;;  %v1582_v3 = vunpack.c.h.b16 %v1407_v63  ;;  %v350_v56 = vunpack.c.l.b16 %v286_v52 }
  0x48   : > { %1170 = vrot.lane.b32.xlu0 %v687_v14, %s5675_s25  ;;  %794 = vst.msk [vmem:[#allocation2 + $0x84] sm:$0xf] %vm549_vm3, %v5860_v62 }
  0x49   : > { %915 = vrot.lane.b32.xlu1 %v684_v0, %s5674_s24  ;;  %v284_v0 = vpack.c.bf16 %v252_v60, %v252_v60  ;;  %v1587_v6 = vpack.c.b16 %v1581_v2, %v1581_v2  ;;  %v1588_v7 = vpack.c.b16 %v1582_v3, %v1582_v3  ;;  %795 = vst.msk [vmem:[#allocation2 + $0x88] sm:$0xf] %vm549_vm3, %v5892_v24 }
  0x4b   : > { %v348_v4 = vunpack.c.l.b16 %v284_v0  ;;  %v1695_v15 = vsel %vm1690_vm4, %v1588_v7, 0 }
  0x4c   : > { %5631 = vmatpush.bf16.msra.mxu3 %v1695_v15  ;;  %1843 = vmatpush.bf16.msra.mxu1 %v1695_v15 }
  0x4e   : > { %919 = vrot.lane.b32.xlu2 %v686_v5, %s5674_s24  ;;  %v349_v5 = vunpack.c.l.b16 %v285_v1 }
  0x50   : > { %1172 = vrot.lane.b32.xlu0 %v688_v25, %s5675_s25  ;;  %v367_v13 = vpack.c.b16 %v349_v5, %v348_v4  ;;  %5632 = vmatpush.bf16.msra.mxu3 %v5218_v22 }
  0x51   : > { %1174 = vrot.lane.b32.xlu1 %v689_v26, %s5675_s25  ;;  %1844 = vmatpush.bf16.msra.mxu1 %v5218_v22 }
  0x52   : > { %v462_v23 = vshrl.u32 %v367_v13, 16 }
  0x56   : > { %1178 = vrot.lane.b32.xlu2 %v5819_v32, %s5675_s25 }
  0x58   : > { %921 = vrot.lane.b32.xlu0 %v687_v14, %s5674_s24  ;;  %v1692_v14 = vsel %vm1690_vm4, %v1587_v6, 0 }
  0x59   : > { %1176 = vrot.lane.b32.xlu1 %v690_v35, %s5675_s25  ;;  %5629 = vmatpush.bf16.msra.mxu2 %v1692_v14 }
  0x5a   : > { %1706 = vmatpush.bf16.msra.mxu0 %v1692_v14 }
  0x5d   : > { %5630 = vmatpush.bf16.msra.mxu2 %v5214_v20 }
  0x5e   : > { %1180 = vrot.lane.b32.xlu2 %v692_v19, %s5675_s25  ;;  %1707 = vmatpush.bf16.msra.mxu0 %v5214_v20 }
  0x60   : > { %923 = vrot.lane.b32.xlu0 %v688_v25, %s5674_s24  ;;  %v464_v25 = vrot.slane %v462_v23, 7  ;;  %v256_v23 = vld [vmem:[%s5723_s23 + $0xf0] sm:$0xff] }
  0x61   : > { %925 = vrot.lane.b32.xlu1 %v689_v26, %s5674_s24  ;;  %v465_v26 = vshll.u32 %v367_v13, 16 }
  0x62   : > { %v546_v45 = vsel %vm5731_vm2, %v464_v25, 0 }
  0x63   : > { %v467_v27 = vor.u32 %v465_v26, %v464_v25  ;;  %v639_v46 = vunpack.c.h.b16 %v546_v45  ;;  %v638_v8 = vunpack.c.l.b16 %v546_v45  ;;  %v257_v25 = vld [vmem:[%s5723_s23 + $0xf8] sm:$0xff]  ;;  %v288_v26 = vpack.c.bf16 %v256_v23, %v256_v23 }
  0x65   : > { %v530_v28 = vsel %vm5731_vm2, 0, %v467_v27  ;;  %v699_v48 = vpack.c.b16 %v639_v46, %v639_v46  ;;  %v698_v11 = vpack.c.b16 %v638_v8, %v638_v8  ;;  %v289_v27 = vpack.c.bf16 %v257_v25, %v257_v25 }
  0x66   : > { %v636_v30 = vunpack.c.l.b16 %v530_v28  ;;  %929 = vrot.lane.b32.xlu2 %v5819_v32, %s5674_s24  ;;  %v637_v47 = vunpack.c.h.b16 %v530_v28 }
  0x67   : > { %820 = vst.msk [vmem:[#allocation2 + $0xec] sm:$0xf] %vm549_vm3, %v699_v48 }
  0x68   : > { %1182 = vrot.lane.b32.xlu0 %v5831_v37, %s5675_s25  ;;  %v696_v38 = vpack.c.b16 %v636_v30, %v636_v30  ;;  %v697_v49 = vpack.c.b16 %v637_v47, %v637_v47  ;;  %819 = vst.msk [vmem:[#allocation2 + $0xe8] sm:$0xf] %vm549_vm3, %v698_v11  ;;  %v353_v30 = vunpack.c.l.b16 %v289_v27 }
  0x69   : > { %927 = vrot.lane.b32.xlu1 %v690_v35, %s5674_s24  ;;  %v1583_v35 = vunpack.c.l.b16 %v1408_v29  ;;  %v352_v29 = vunpack.c.l.b16 %v288_v26 }
  0x6a   : > { %817 = vst.msk [vmem:[#allocation2 + $0xe0] sm:$0xf] %vm549_vm3, %v696_v38 }
  0x6b   : > { %v1589_v39 = vpack.c.b16 %v1583_v35, %v1583_v35  ;;  %818 = vst.msk [vmem:[#allocation2 + $0xe4] sm:$0xf] %vm549_vm3, %v697_v49 }
  0x6d   : > { %v1698_v40 = vsel %vm1690_vm4, %v1589_v39, 0 }
  0x6e   : > { %1996 = vmatpush.bf16.msrb.mxu2 %v1698_v40  ;;  %931 = vrot.lane.b32.xlu2 %v692_v19, %s5674_s24 }
  0x70   : > { %1184 = vrot.lane.b32.xlu0 %v5856_v59, %s5675_s25 }
  0x71   : > { %1186 = vrot.lane.b32.xlu1 %v5854_v58, %s5675_s25 }
  0x76   : > { %1190 = vrot.lane.b32.xlu2 %v697_v49, %s5675_s25 }
  0x78   : > { %v904_v9 = vpop.permute.xlu2 %903  ;;  %933 = vrot.lane.b32.xlu0 %v5831_v37, %s5674_s24  ;;  %v5906_v37 = vpack.c.b16 %v615_v33, %v615_v33  ;;  %v369_v33 = vpack.c.b16 %v353_v30, %v352_v29 }
  0x79   : > { %1062 = vst.msk [vmem:[#allocation2 + $0x88] sm:$0xf] %vm1027_vm5, %v904_v9  ;;  %1188 = vrot.lane.b32.xlu1 %v696_v38, %s5675_s25 }
  0x7a   : > { %796 = vst.msk [vmem:[#allocation2 + $0x8c] sm:$0xf] %vm549_vm3, %v5906_v37  ;;  %v479_v40 = vshll.u32 %v369_v33, 16 }
  0x7e   : > { %1192 = vrot.lane.b32.xlu2 %v698_v11, %s5675_s25 }
  0x80   : > { %v906_v31 = vpop.permute.xlu2 %905  ;;  %935 = vrot.lane.b32.xlu0 %v5856_v59, %s5674_s24  ;;  %v368_v59 = vpack.c.b16 %v351_v57, %v350_v56 }
  0x81   : > { %1063 = vst.msk [vmem:[#allocation2 + $0x8c] sm:$0xf] %vm1027_vm5, %v906_v31  ;;  %937 = vrot.lane.b32.xlu1 %v5854_v58, %s5674_s24 }
  0x82   : > { %v469_v60 = vshrl.u32 %v368_v59, 16  ;;  %v472_v63 = vshll.u32 %v368_v59, 16 }
  0x84   : > { %v471_v61 = vrot.slane %v469_v60, 7 }
  0x86   : > { %v474_v1 = vor.u32 %v472_v63, %v471_v61  ;;  %941 = vrot.lane.b32.xlu2 %v697_v49, %s5674_s24  ;;  %v547_v18 = vsel %vm5731_vm2, %v471_v61, 0 }
  0x87   : > { %v642_v19 = vunpack.c.l.b16 %v547_v18 }
  0x88   : > { %v908_v41 = vpop.permute.xlu2 %907  ;;  %1194 = vrot.lane.b32.xlu0 %v699_v48, %s5675_s25  ;;  %v531_v4 = vsel %vm5731_vm2, 0, %v474_v1 }
  0x89   : > { %1064 = vst.msk [vmem:[#allocation2 + $0x90] sm:$0xf] %vm1027_vm5, %v908_v41  ;;  %939 = vrot.lane.b32.xlu1 %v696_v38, %s5674_s24  ;;  %v641_v6 = vunpack.c.h.b16 %v531_v4  ;;  %v640_v7 = vunpack.c.l.b16 %v531_v4  ;;  %v702_v22 = vpack.c.b16 %v642_v19, %v642_v19  ;;  %v476_v38 = vshrl.u32 %v369_v33, 16  ;;  %v226_v4 = vld [vmem:[%s5723_s23] sm:$0xff] }
  0x8b   : > { %v701_v9 = vpack.c.b16 %v641_v6, %v641_v6  ;;  %v700_v10 = vpack.c.b16 %v640_v7, %v640_v7  ;;  %823 = vst.msk [vmem:[#allocation2 + $0xf8] sm:$0xf] %vm549_vm3, %v702_v22  ;;  %v478_v39 = vrot.slane %v476_v38, 7  ;;  %v258_v6 = vpack.c.bf16 %v226_v4, %v226_v4 }
  0x8d   : > { %822 = vst.msk [vmem:[#allocation2 + $0xf4] sm:$0xf] %vm549_vm3, %v701_v9  ;;  %v548_v57 = vsel %vm5731_vm2, %v478_v39, 0 }
  0x8e   : > { %821 = vst.msk [vmem:[#allocation2 + $0xf0] sm:$0xf] %vm549_vm3, %v700_v10  ;;  %943 = vrot.lane.b32.xlu2 %v698_v11, %s5674_s24  ;;  %v829_v59 = vunpack.c.l.b16 %v548_v57 }
  0x90   : > { %v1167_v5 = vpop.permute.xlu2 %1166  ;;  %1196 = vrot.lane.b32.xlu0 %v700_v10, %s5675_s25 }
  0x91   : > { %1198 = vrot.lane.b32.xlu1 %v701_v9, %s5675_s25 }
  0x92   : > { %v900_v32 = vpop.permute.xlu0 %899 }
  0x93   : > { %1060 = vst.msk [vmem:[#allocation2 + $0x80] sm:$0xf] %vm1027_vm5, %v900_v32  ;;  %v1157_v42 = vpop.permute.xlu1 %1156 }
  0x94   : > { %1305 = vst.msk [vmem:[#allocation2 + $0x80] sm:$0xf] %vm1272_vm6, %v1157_v42  ;;  %v481_v42 = vor.u32 %v479_v40, %v478_v39 }
  0x96   : > { %v532_v46 = vsel %vm5731_vm2, 0, %v481_v42 }
  0x97   : > { %v828_v47 = vunpack.c.h.b16 %v532_v46  ;;  %v827_v61 = vunpack.c.l.b16 %v532_v46 }
  0x98   : > { %v1169_v14 = vpop.permute.xlu2 %1168  ;;  %945 = vrot.lane.b32.xlu0 %v699_v48, %s5674_s24  ;;  %v643_v48 = vunpack.c.h.b16 %v547_v18 }
  0x99   : > { %1200 = vrot.lane.b32.xlu1 %v702_v22, %s5675_s25  ;;  %v832_v49 = vpack.c.b16 %v828_v47, %v828_v47  ;;  %v831_v1 = vpack.c.b16 %v827_v61, %v827_v61 }
  0x9a   : > { %v902_v55 = vpop.permute.xlu0 %901  ;;  %v703_v50 = vpack.c.b16 %v643_v48, %v643_v48 }
  0x9b   : > { %1061 = vst.msk [vmem:[#allocation2 + $0x84] sm:$0xf] %vm1027_vm5, %v902_v55  ;;  %v1159_v58 = vpop.permute.xlu1 %1158 }
  0x9c   : > { %1306 = vst.msk [vmem:[#allocation2 + $0x84] sm:$0xf] %vm1272_vm6, %v1159_v58  ;;  %1202 = vrot.lane.b32.xlu2 %v703_v50, %s5675_s25  ;;  %v830_v58 = vunpack.c.h.b16 %v548_v57 }
  0x9d   : > { %824 = vst.msk [vmem:[#allocation2 + $0xfc] sm:$0xf] %vm549_vm3, %v703_v50 }
  0x9e   : > { %v834_v63 = vpack.c.b16 %v830_v58, %v830_v58 }
  0xa0   : > { %v918_v20 = vpop.permute.xlu2 %917  ;;  %947 = vrot.lane.b32.xlu0 %v700_v10, %s5674_s24 }
  0xa1   : > { %1069 = vst.msk [vmem:[#allocation2 + $0xa4] sm:$0xf] %vm1027_vm5, %v918_v20  ;;  %949 = vrot.lane.b32.xlu1 %v701_v9, %s5674_s24  ;;  %v322_v9 = vunpack.c.l.b16 %v258_v6 }
  0xa2   : > { %v1161_v0 = vpop.permute.xlu0 %1160 }
  0xa3   : > { %v5575_v2 = vld [vmem:[#allocation2 + $0x80] sm:$0xff]  ;;  %v1163_v3 = vpop.permute.xlu1 %1162  ;;  %1307 = vst.msk [vmem:[#allocation2 + $0x88] sm:$0xf] %vm1272_vm6, %v1161_v0  ;;  %v833_v0 = vpack.c.b16 %v829_v59, %v829_v59 }
  0xa4   : > { %1308 = vst.msk [vmem:[#allocation2 + $0x8c] sm:$0xf] %vm1272_vm6, %v1163_v3  ;;  %5239 = vmatmul.msk.bf16.vlgmr.msra.gmra.mxu2 %vm1593_vm7, %v5575_v2  ;;  %5271 = vmatmul.msk.bf16.vlgmr.msra.gmra.mxu3 %vm1593_vm7, %v5575_v2 }
  0xa5   : > { %1204 = vrot.lane.b32.xlu2 %v831_v1, %s5675_s25 }
  0xa8   : > { %v920_v35 = vpop.permute.xlu2 %919  ;;  %1206 = vrot.lane.b32.xlu0 %v832_v49, %s5675_s25 }
  0xa9   : > { %1070 = vst.msk [vmem:[#allocation2 + $0xa8] sm:$0xf] %vm1027_vm5, %v920_v35  ;;  %951 = vrot.lane.b32.xlu1 %v702_v22, %s5674_s24 }
  0xaa   : > { %v910_v12 = vpop.permute.xlu0 %909 }
  0xab   : > { %1065 = vst.msk [vmem:[#allocation2 + $0x94] sm:$0xf] %vm1027_vm5, %v910_v12  ;;  %v1165_v13 = vpop.permute.xlu1 %1164  ;;  %v5576_v15 = vld [vmem:[#allocation2 + $0x88] sm:$0xff] }
  0xac   : > { %1309 = vst.msk [vmem:[#allocation2 + $0x90] sm:$0xf] %vm1272_vm6, %v1165_v13 }
  0xad   : > { %1310 = vst.msk [vmem:[#allocation2 + $0x94] sm:$0xf] %vm1272_vm6, %v1167_v5  ;;  %v227_v5 = vld [vmem:[%s5723_s23 + $0x8] sm:$0xff]  ;;  %953 = vrot.lane.b32.xlu2 %v703_v50, %s5674_s24 }
  0xae   : > { %v259_v7 = vpack.c.bf16 %v227_v5, %v227_v5 }
  0xb0   : > { %v1179_v52 = vpop.permute.xlu2 %1178  ;;  %1208 = vrot.lane.b32.xlu0 %v833_v0, %s5675_s25  ;;  %v323_v10 = vunpack.c.l.b16 %v259_v7 }
  0xb1   : > { %1210 = vrot.lane.b32.xlu1 %v834_v63, %s5675_s25 }
  0xb2   : > { %v912_v16 = vpop.permute.xlu0 %911  ;;  %v354_v11 = vpack.c.b16 %v323_v10, %v322_v9 }
  0xb3   : > { %1066 = vst.msk [vmem:[#allocation2 + $0x98] sm:$0xf] %vm1027_vm5, %v912_v16  ;;  %v914_v17 = vpop.permute.xlu1 %913 }
  0xb4   : > { %1067 = vst.msk [vmem:[#allocation2 + $0x9c] sm:$0xf] %vm1027_vm5, %v914_v17  ;;  %5240 = vmatmul.msk.bf16.gmra.mxu2 %vm1593_vm7, %v5576_v15  ;;  %5272 = vmatmul.msk.bf16.gmra.mxu3 %vm1593_vm7, %v5576_v15  ;;  %v5577_v41 = vld [vmem:[#allocation2 + $0x90] sm:$0xff]  ;;  %v371_v13 = vshrl.u32 %v354_v11, 16  ;;  %v229_v15 = vld [vmem:[%s5723_s23 + $0x18] sm:$0xff]  ;;  %v374_v17 = vshll.u32 %v354_v11, 16 }
  0xb5   : > { %1311 = vst.msk [vmem:[#allocation2 + $0x98] sm:$0xf] %vm1272_vm6, %v1169_v14  ;;  %v228_v14 = vld [vmem:[%s5723_s23 + $0x10] sm:$0xff]  ;;  %v261_v19 = vpack.c.bf16 %v229_v15, %v229_v15  ;;  %955 = vrot.lane.b32.xlu2 %v831_v1, %s5674_s24 }
  0xb6   : > { %v373_v16 = vrot.slane %v371_v13, 7  ;;  %v260_v18 = vpack.c.bf16 %v228_v14, %v228_v14 }
  0xb7   : > { %v325_v25 = vunpack.c.l.b16 %v261_v19 }
  0xb8   : > { %v1181_v2 = vpop.permute.xlu2 %1180  ;;  %957 = vrot.lane.b32.xlu0 %v832_v49, %s5674_s24  ;;  %v376_v22 = vor.u32 %v374_v17, %v373_v16  ;;  %v324_v23 = vunpack.c.l.b16 %v260_v18  ;;  %v6023_v50 = vsel %vm5731_vm2, %v373_v16, 0 }
  0xb9   : > { %959 = vrot.lane.b32.xlu1 %v833_v0, %s5674_s24 }
  0xba   : > { %v1171_v28 = vpop.permute.xlu0 %1170  ;;  %v517_v26 = vsel %vm5731_vm2, 0, %v376_v22  ;;  %v355_v27 = vpack.c.b16 %v325_v25, %v324_v23  ;;  %v587_v25 = vunpack.c.h.b16 %v6023_v50 }
  0xbb   : > { %1312 = vst.msk [vmem:[#allocation2 + $0x9c] sm:$0xf] %vm1272_vm6, %v1171_v28  ;;  %v916_v31 = vpop.permute.xlu1 %915  ;;  %v584_v28 = vunpack.c.l.b16 %v517_v26  ;;  %v585_v29 = vunpack.c.h.b16 %v517_v26 }
  0xbc   : > { %1068 = vst.msk [vmem:[#allocation2 + $0xa0] sm:$0xf] %vm1027_vm5, %v916_v31  ;;  %v378_v30 = vshrl.u32 %v355_v27, 16  ;;  %v381_v40 = vshll.u32 %v355_v27, 16  ;;  %v647_v27 = vpack.c.b16 %v587_v25, %v587_v25 }
  0xbd   : > { %v644_v35 = vpack.c.b16 %v584_v28, %v584_v28  ;;  %v645_v38 = vpack.c.b16 %v585_v29, %v585_v29  ;;  %961 = vrot.lane.b32.xlu2 %v834_v63, %s5674_s24 }
  0xbe   : > { %v380_v39 = vrot.slane %v378_v30, 7  ;;  %768 = vst.msk [vmem:[#allocation2 + $0x1c] sm:$0xf] %vm549_vm3, %v647_v27 }
  0xbf   : > { %765 = vst.msk [vmem:[#allocation2 + $0x10] sm:$0xf] %vm549_vm3, %v644_v35 }
  0xc0   : > { %v930_v20 = vpop.permute.xlu2 %929  ;;  %835 = vrot.lane.b32.xlu0 %v644_v35, %s5674_s24  ;;  %766 = vst.msk [vmem:[#allocation2 + $0x14] sm:$0xf] %vm549_vm3, %v645_v38  ;;  %v534_v59 = vsel %vm5731_vm2, %v380_v39, 0 }
  0xc1   : > { %1075 = vst.msk [vmem:[#allocation2 + $0xbc] sm:$0xf] %vm1027_vm5, %v930_v20  ;;  %837 = vrot.lane.b32.xlu1 %v645_v38, %s5674_s24  ;;  %v591_v61 = vunpack.c.h.b16 %v534_v59  ;;  %v590_v63 = vunpack.c.l.b16 %v534_v59 }
  0xc2   : > { %v1173_v32 = vpop.permute.xlu0 %1172  ;;  %v5578_v55 = vld [vmem:[#allocation2 + $0x98] sm:$0xff] }
  0xc3   : > { %v1175_v45 = vpop.permute.xlu1 %1174  ;;  %1313 = vst.msk [vmem:[#allocation2 + $0xa0] sm:$0xf] %vm1272_vm6, %v1173_v32  ;;  %v383_v32 = vor.u32 %v381_v40, %v380_v39  ;;  %v651_v0 = vpack.c.b16 %v591_v61, %v591_v61  ;;  %v650_v1 = vpack.c.b16 %v590_v63, %v590_v63  ;;  %v232_v39 = vld [vmem:[%s5723_s23 + $0x30] sm:$0xff]  ;;  %v233_v40 = vld [vmem:[%s5723_s23 + $0x38] sm:$0xff] }
  0xc4   : > { %1314 = vst.msk [vmem:[#allocation2 + $0xa4] sm:$0xf] %vm1272_vm6, %v1175_v45  ;;  %5241 = vmatmul.msk.bf16.gmra.mxu2 %vm1593_vm7, %v5577_v41  ;;  %5273 = vmatmul.msk.bf16.gmra.mxu3 %vm1593_vm7, %v5577_v41 }
  0xc5   : > { %v518_v42 = vsel %vm5731_vm2, 0, %v383_v32  ;;  %772 = vst.msk [vmem:[#allocation2 + $0x2c] sm:$0xf] %vm549_vm3, %v651_v0  ;;  %v265_v32 = vpack.c.bf16 %v233_v40, %v233_v40 }
  0xc6   : > { %v589_v46 = vunpack.c.h.b16 %v518_v42  ;;  %771 = vst.msk [vmem:[#allocation2 + $0x28] sm:$0xf] %vm549_vm3, %v650_v1  ;;  %v588_v10 = vunpack.c.l.b16 %v518_v42 }
  0xc8   : > { %v932_v41 = vpop.permute.xlu2 %931  ;;  %v649_v47 = vpack.c.b16 %v589_v46, %v589_v46  ;;  %v648_v13 = vpack.c.b16 %v588_v10, %v588_v10 }
  0xc9   : > { %1076 = vst.msk [vmem:[#allocation2 + $0xc0] sm:$0xf] %vm1027_vm5, %v932_v41  ;;  %v264_v41 = vpack.c.bf16 %v232_v39, %v232_v39 }
  0xca   : > { %v922_v51 = vpop.permute.xlu0 %921  ;;  %770 = vst.msk [vmem:[#allocation2 + $0x24] sm:$0xf] %vm549_vm3, %v649_v47  ;;  %1094 = vrot.lane.b32.xlu0 %v649_v47, %s5675_s25  ;;  %1092 = vrot.lane.b32.xlu2 %v648_v13, %s5675_s25 }
  0xcb   : > { %1071 = vst.msk [vmem:[#allocation2 + $0xac] sm:$0xf] %vm1027_vm5, %v922_v51  ;;  %v1177_v54 = vpop.permute.xlu1 %1176  ;;  %v5579_v12 = vld [vmem:[#allocation2 + $0xa0] sm:$0xff]  ;;  %v5221_v51 = vld [vmem:[%s7623_s1 + $0x8] sm:$0xf]  ;;  %v328_v42 = vunpack.c.l.b16 %v264_v41 }
  0xcc   : > { %1315 = vst.msk [vmem:[#allocation2 + $0xa8] sm:$0xf] %vm1272_vm6, %v1177_v54  ;;  %v5593_v54 = vld [vmem:[%s7623_s1 + $0x10] sm:$0xf0] }
  0xcd   : > { %1316 = vst.msk [vmem:[#allocation2 + $0xac] sm:$0xf] %vm1272_vm6, %v1179_v52  ;;  %v586_v52 = vunpack.c.l.b16 %v6023_v50 }
  0xce   : > { %769 = vst.msk [vmem:[#allocation2 + $0x20] sm:$0xf] %vm549_vm3, %v648_v13 }
  0xd0   : > { %v1191_v49 = vpop.permute.xlu2 %1190 }
  0xd2   : > { %v924_v56 = vpop.permute.xlu0 %923  ;;  %1096 = vrot.lane.b32.xlu0 %v650_v1, %s5675_s25  ;;  %841 = vrot.lane.b32.xlu2 %v647_v27, %s5674_s24 }
  0xd3   : > { %1072 = vst.msk [vmem:[#allocation2 + $0xb0] sm:$0xf] %vm1027_vm5, %v924_v56  ;;  %v926_v60 = vpop.permute.xlu1 %925  ;;  %v646_v56 = vpack.c.b16 %v586_v52, %v586_v52 }
  0xd4   : > { %5242 = vmatmul.msk.bf16.gmra.mxu2 %vm1593_vm7, %v5578_v55  ;;  %5274 = vmatmul.msk.bf16.gmra.mxu3 %vm1593_vm7, %v5578_v55  ;;  %1073 = vst.msk [vmem:[#allocation2 + $0xb4] sm:$0xf] %vm1027_vm5, %v926_v60  ;;  %v5580_v45 = vld [vmem:[#allocation2 + $0xa8] sm:$0xff]  ;;  %v5222_v55 = vor.u32 %v5593_v54, %v5221_v51 }
  0xd5   : > { %1317 = vst.msk [vmem:[#allocation2 + $0xb0] sm:$0xf] %vm1272_vm6, %v1181_v2  ;;  %839 = vrot.lane.b32.xlu1 %v646_v56, %s5674_s24  ;;  %v230_v2 = vld [vmem:[%s5723_s23 + $0x20] sm:$0xff] }
  0xd6   : > { %1997 = vmatpush.bf16.msrb.mxu2 %v5222_v55  ;;  %767 = vst.msk [vmem:[#allocation2 + $0x18] sm:$0xf] %vm549_vm3, %v646_v56  ;;  %v262_v4 = vpack.c.bf16 %v230_v2, %v230_v2 }
  0xd8   : > { %v326_v6 = vunpack.c.l.b16 %v262_v4  ;;  %v1193_v9 = vpop.permute.xlu2 %1192 }
  0xda   : > { %v1183_v3 = vpop.permute.xlu0 %1182  ;;  %845 = vrot.lane.b32.xlu0 %v649_v47, %s5674_s24  ;;  %843 = vrot.lane.b32.xlu2 %v648_v13, %s5674_s24 }
  0xdb   : > { %1318 = vst.msk [vmem:[#allocation2 + $0xb4] sm:$0xf] %vm1272_vm6, %v1183_v3  ;;  %v928_v8 = vpop.permute.xlu1 %927  ;;  %v231_v3 = vld [vmem:[%s5723_s23 + $0x28] sm:$0xff] }
  0xdc   : > { %1074 = vst.msk [vmem:[#allocation2 + $0xb8] sm:$0xf] %vm1027_vm5, %v928_v8  ;;  %v263_v5 = vpack.c.bf16 %v231_v3, %v231_v3 }
  0xdd   : > { %1098 = vrot.lane.b32.xlu1 %v651_v0, %s5675_s25 }
  0xde   : > { %v327_v7 = vunpack.c.l.b16 %v263_v5 }
  0xe0   : > { %v356_v11 = vpack.c.b16 %v327_v7, %v326_v6  ;;  %v942_v26 = vpop.permute.xlu2 %941 }
  0xe1   : > { %1081 = vst.msk [vmem:[#allocation2 + $0xd4] sm:$0xf] %vm1027_vm5, %v942_v26 }
  0xe2   : > { %v1185_v33 = vpop.permute.xlu0 %1184  ;;  %v5581_v60 = vld [vmem:[#allocation2 + $0xb0] sm:$0xff]  ;;  %v385_v14 = vshrl.u32 %v356_v11, 16  ;;  %v388_v16 = vshll.u32 %v356_v11, 16  ;;  %847 = vrot.lane.b32.xlu0 %v650_v1, %s5674_s24 }
  0xe3   : > { %v1187_v31 = vpop.permute.xlu1 %1186  ;;  %1319 = vst.msk [vmem:[#allocation2 + $0xb8] sm:$0xf] %vm1272_vm6, %v1185_v33 }
  0xe4   : > { %5243 = vmatmul.msk.bf16.gmra.mxu2 %vm1593_vm7, %v5579_v12  ;;  %5275 = vmatmul.msk.bf16.gmra.mxu3 %vm1593_vm7, %v5579_v12  ;;  %1320 = vst.msk [vmem:[#allocation2 + $0xbc] sm:$0xf] %vm1272_vm6, %v1187_v31  ;;  %v387_v15 = vrot.slane %v385_v14, 7 }
  0xe6   : > { %v390_v17 = vor.u32 %v388_v16, %v387_v15  ;;  %v6072_v31 = vsel %vm5731_vm2, %v387_v15, 0 }
  0xe7   : > { %v595_v35 = vunpack.c.h.b16 %v6072_v31  ;;  %v594_v13 = vunpack.c.l.b16 %v6072_v31 }
  0xe8   : > { %v519_v19 = vsel %vm5731_vm2, 0, %v390_v17  ;;  %v944_v33 = vpop.permute.xlu2 %943 }
  0xe9   : > { %v592_v20 = vunpack.c.l.b16 %v519_v19  ;;  %1082 = vst.msk [vmem:[#allocation2 + $0xd8] sm:$0xf] %vm1027_vm5, %v944_v33  ;;  %v6077_v38 = vpack.c.b16 %v595_v35, %v595_v35 }
  0xea   : > { %v934_v48 = vpop.permute.xlu0 %933 }
  0xeb   : > { %1077 = vst.msk [vmem:[#allocation2 + $0xc4] sm:$0xf] %vm1027_vm5, %v934_v48  ;;  %v1189_v57 = vpop.permute.xlu1 %1188  ;;  %v5582_v18 = vld [vmem:[#allocation2 + $0xb8] sm:$0xff]  ;;  %v652_v23 = vpack.c.b16 %v592_v20, %v592_v20  ;;  %1106 = vrot.lane.b32.xlu0 %v6077_v38, %s5675_s25 }
  0xec   : > { %1322 = vst.msk [vmem:[#allocation2 + $0xc4] sm:$0xf] %vm1272_vm6, %v1191_v49  ;;  %v593_v49 = vunpack.c.h.b16 %v519_v19 }
  0xed   : > { %1321 = vst.msk [vmem:[#allocation2 + $0xc0] sm:$0xf] %vm1272_vm6, %v1189_v57  ;;  %1100 = vrot.lane.b32.xlu1 %v652_v23, %s5675_s25 }
  0xee   : > { %773 = vst.msk [vmem:[#allocation2 + $0x30] sm:$0xf] %vm549_vm3, %v652_v23  ;;  %v653_v54 = vpack.c.b16 %v593_v49, %v593_v49 }
  0xef   : > { %776 = vst.msk [vmem:[#allocation2 + $0x3c] sm:$0xf] %vm549_vm3, %v6077_v38 }
  0xf0   : > { %1102 = vrot.lane.b32.xlu2 %v653_v54, %s5675_s25  ;;  %774 = vst.msk [vmem:[#allocation2 + $0x34] sm:$0xf] %vm549_vm3, %v653_v54 }
  0xf2   : > { %v936_v58 = vpop.permute.xlu0 %935 }
  0xf3   : > { %1078 = vst.msk [vmem:[#allocation2 + $0xc8] sm:$0xf] %vm1027_vm5, %v936_v58  ;;  %v938_v8 = vpop.permute.xlu1 %937 }
  0xf4   : > { %5244 = vmatmul.msk.bf16.gmra.mxu2 %vm1593_vm7, %v5580_v45  ;;  %5276 = vmatmul.msk.bf16.gmra.mxu3 %vm1593_vm7, %v5580_v45  ;;  %1079 = vst.msk [vmem:[#allocation2 + $0xcc] sm:$0xf] %vm1027_vm5, %v938_v8  ;;  %v5583_v30 = vld [vmem:[#allocation2 + $0xc0] sm:$0xff]  ;;  %v329_v45 = vunpack.c.l.b16 %v265_v32 }
  0xf5   : > { %1323 = vst.msk [vmem:[#allocation2 + $0xc8] sm:$0xf] %vm1272_vm6, %v1193_v9  ;;  %849 = vrot.lane.b32.xlu1 %v651_v0, %s5674_s24 }
  0xf6   : > { %v357_v50 = vpack.c.b16 %v329_v45, %v328_v42  ;;  %v1203_v51 = vpop.permute.xlu2 %1202 }
  0xf8   : > { %v392_v55 = vshrl.u32 %v357_v50, 16  ;;  %v395_v57 = vshll.u32 %v357_v50, 16 }
  0xfa   : > { %v1195_v12 = vpop.permute.xlu0 %1194  ;;  %v394_v56 = vrot.slane %v392_v55, 7 }
  0xfb   : > { %1324 = vst.msk [vmem:[#allocation2 + $0xcc] sm:$0xf] %vm1272_vm6, %v1195_v12  ;;  %v940_v22 = vpop.permute.xlu1 %939 }
  0xfc   : > { %1080 = vst.msk [vmem:[#allocation2 + $0xd0] sm:$0xf] %vm1027_vm5, %v940_v22  ;;  %v397_v58 = vor.u32 %v395_v57, %v394_v56 }
  0xfd   : > { %851 = vrot.lane.b32.xlu1 %v652_v23, %s5674_s24  ;;  %v6118_v23 = vsel %vm5731_vm2, %v394_v56, 0 }
  0xfe   : > { %v520_v1 = vsel %vm5731_vm2, 0, %v397_v58  ;;  %v598_v26 = vunpack.c.l.b16 %v6118_v23 }
  0xff   : > { %v597_v2 = vunpack.c.h.b16 %v520_v1  ;;  %v596_v3 = vunpack.c.l.b16 %v520_v1  ;;  %v1205_v15 = vpop.permute.xlu2 %1204  ;;  %v5676_v1 = vmov 0  }
 0x100   : > { %v658_v27 = vpack.c.b16 %v598_v26, %v598_v26  ;;  %550 = vst.msk [vmem:[#allocation2] sm:$0xf] %vm549_vm3, %v5676_v1 }
 0x101   : > { %v657_v7 = vpack.c.b16 %v597_v2, %v597_v2  ;;  %v656_v8 = vpack.c.b16 %v596_v3, %v596_v3  ;;  %551 = vst.msk [vmem:[#allocation2 + $0x4] sm:$0xf] %vm549_vm3, %v5676_v1  ;;  %v599_v3 = vunpack.c.h.b16 %v6118_v23 }
 0x102   : > { %v1197_v29 = vpop.permute.xlu0 %1196  ;;  %v5584_v0 = vld [vmem:[#allocation2 + $0xc8] sm:$0xff]  ;;  %779 = vst.msk [vmem:[#allocation2 + $0x48] sm:$0xf] %vm549_vm3, %v658_v27 }
 0x103   : > { %v1199_v28 = vpop.permute.xlu1 %1198  ;;  %1325 = vst.msk [vmem:[#allocation2 + $0xd0] sm:$0xf] %vm1272_vm6, %v1197_v29  ;;  %1108 = vrot.lane.b32.xlu0 %v656_v8, %s5675_s25  ;;  %v235_v29 = vld [vmem:[%s5723_s23 + $0x48] sm:$0xff] }
 0x104   : > { %5245 = vmatmul.msk.bf16.gmra.mxu2 %vm1593_vm7, %v5581_v60  ;;  %5277 = vmatmul.msk.bf16.gmra.mxu3 %vm1593_vm7, %v5581_v60  ;;  %1326 = vst.msk [vmem:[#allocation2 + $0xd4] sm:$0xf] %vm1272_vm6, %v1199_v28  ;;  %v234_v28 = vld [vmem:[%s5723_s23 + $0x40] sm:$0xff]  ;;  %v267_v31 = vpack.c.bf16 %v235_v29, %v235_v29 }
 0x105   : > { %1110 = vrot.lane.b32.xlu1 %v657_v7, %s5675_s25  ;;  %778 = vst.msk [vmem:[#allocation2 + $0x44] sm:$0xf] %vm549_vm3, %v657_v7 }
 0x106   : > { %777 = vst.msk [vmem:[#allocation2 + $0x40] sm:$0xf] %vm549_vm3, %v656_v8  ;;  %v331_v35 = vunpack.c.l.b16 %v267_v31 }
 0x107   : > { %v954_v40 = vpop.permute.xlu2 %953  ;;  %552 = vst.msk [vmem:[#allocation2 + $0x8] sm:$0xf] %vm549_vm3, %v5676_v1 }
 0x108   : > { %1087 = vst.msk [vmem:[#allocation2 + $0xec] sm:$0xf] %vm1027_vm5, %v954_v40 }
 0x109   : > { %553 = vst.msk [vmem:[#allocation2 + $0xc] sm:$0xf] %vm549_vm3, %v5676_v1 }
 0x10a   : > { %v946_v48 = vpop.permute.xlu0 %945 }
 0x10b   : > { %1083 = vst.msk [vmem:[#allocation2 + $0xdc] sm:$0xf] %vm1027_vm5, %v946_v48  ;;  %v1201_v52 = vpop.permute.xlu1 %1200  ;;  %857 = vrot.lane.b32.xlu0 %v6077_v38, %s5674_s24  ;;  %v5585_v22 = vld [vmem:[#allocation2 + $0xd0] sm:$0xff] }
 0x10c   : > { %1328 = vst.msk [vmem:[#allocation2 + $0xdc] sm:$0xf] %vm1272_vm6, %v1203_v51 }
 0x10d   : > { %1327 = vst.msk [vmem:[#allocation2 + $0xd8] sm:$0xf] %vm1272_vm6, %v1201_v52  ;;  %1112 = vrot.lane.b32.xlu1 %v658_v27, %s5675_s25 }
 0x112   : > { %v948_v5 = vpop.permute.xlu0 %947 }
 0x113   : > { %1084 = vst.msk [vmem:[#allocation2 + $0xe0] sm:$0xf] %vm1027_vm5, %v948_v5  ;;  %v950_v12 = vpop.permute.xlu1 %949  ;;  %859 = vrot.lane.b32.xlu0 %v656_v8, %s5674_s24 }
 0x114   : > { %5246 = vmatmul.msk.bf16.gmra.mxu2 %vm1593_vm7, %v5582_v18  ;;  %5278 = vmatmul.msk.bf16.gmra.mxu3 %vm1593_vm7, %v5582_v18  ;;  %1085 = vst.msk [vmem:[#allocation2 + $0xe4] sm:$0xf] %vm1027_vm5, %v950_v12  ;;  %v654_v18 = vpack.c.b16 %v594_v13, %v594_v13 }
 0x115   : > { %1329 = vst.msk [vmem:[#allocation2 + $0xe0] sm:$0xf] %vm1272_vm6, %v1205_v15  ;;  %861 = vrot.lane.b32.xlu1 %v657_v7, %s5674_s24  ;;  %v6167_v7 = vpack.c.b16 %v599_v3, %v599_v3 }
 0x116   : > { %1104 = vrot.lane.b32.xlu2 %v654_v18, %s5675_s25  ;;  %775 = vst.msk [vmem:[#allocation2 + $0x38] sm:$0xf] %vm549_vm3, %v654_v18 }
 0x117   : > { %780 = vst.msk [vmem:[#allocation2 + $0x4c] sm:$0xf] %vm549_vm3, %v6167_v7 }
 0x11a   : > { %v1207_v16 = vpop.permute.xlu0 %1206 }
 0x11b   : > { %1330 = vst.msk [vmem:[#allocation2 + $0xe4] sm:$0xf] %vm1272_vm6, %v1207_v16  ;;  %v952_v25 = vpop.permute.xlu1 %951 }
 0x11c   : > { %1086 = vst.msk [vmem:[#allocation2 + $0xe8] sm:$0xf] %vm1027_vm5, %v952_v25 }
 0x11d   : > { %863 = vrot.lane.b32.xlu1 %v658_v27, %s5674_s24 }
 0x11e   : > { %853 = vrot.lane.b32.xlu2 %v653_v54, %s5674_s24  ;;  %v5586_v54 = vld [vmem:[#allocation2 + $0xd8] sm:$0xff] }
 0x122   : > { %v1209_v42 = vpop.permute.xlu0 %1208  ;;  %v5587_v13 = vld [vmem:[#allocation2 + $0xe0] sm:$0xff] }
 0x123   : > { %v1211_v32 = vpop.permute.xlu1 %1210  ;;  %1331 = vst.msk [vmem:[#allocation2 + $0xe8] sm:$0xf] %vm1272_vm6, %v1209_v42 }
 0x124   : > { %5247 = vmatmul.msk.bf16.gmra.mxu2 %vm1593_vm7, %v5583_v30  ;;  %5279 = vmatmul.msk.bf16.gmra.mxu3 %vm1593_vm7, %v5583_v30  ;;  %v266_v30 = vpack.c.bf16 %v234_v28, %v234_v28  ;;  %1332 = vst.msk [vmem:[#allocation2 + $0xec] sm:$0xf] %vm1272_vm6, %v1211_v32 }
 0x126   : > { %v330_v33 = vunpack.c.l.b16 %v266_v30  ;;  %855 = vrot.lane.b32.xlu2 %v654_v18, %s5674_s24 }
 0x127   : > { %v1773_v46 = vpop.f32.mrf.mxu2  ;;  %v1918_v47 = vpop.f32.mrf.mxu3 }
 0x128   : > { %v2232_v61 = vrot.slane %v1918_v47, 1  ;;  %v358_v41 = vpack.c.b16 %v331_v35, %v330_v33 }
 0x12a   : > { %v399_v45 = vshrl.u32 %v358_v41, 16  ;;  %v402_v47 = vshll.u32 %v358_v41, 16 }
 0x12b   : > { %v960_v8 = vpop.permute.xlu1 %959 }
 0x12c   : > { %1090 = vst.msk [vmem:[#allocation2 + $0xf8] sm:$0xf] %vm1027_vm5, %v960_v8 }
 0x12d   : > { %1336 = vst.msk [vmem:[#allocation2 + $0xf8] sm:$0xf] %vm1272_vm6, %v5676_v1 }
 0x12e   : > { %1114 = vrot.lane.b32.xlu2 %v6167_v7, %s5675_s25 }
 0x12f   : > { %v1775_v59 = vpop.f32.mrf.mxu2  ;;  %v1920_v60 = vpop.f32.mrf.mxu3 }
 0x130   : > { %v2233_v63 = vrot.slane %v1920_v60, 1  ;;  %v956_v60 = vpop.permute.xlu2 %955 }
 0x131   : > { %1088 = vst.msk [vmem:[#allocation2 + $0xf0] sm:$0xf] %vm1027_vm5, %v956_v60 }
 0x132   : > { %v2234_v4 = vsel %vm2191_vm8, %v2232_v61, %v2233_v63  ;;  %v958_v61 = vpop.permute.xlu0 %957  ;;  %1334 = vst.msk [vmem:[#allocation2 + $0xf0] sm:$0xf] %vm1272_vm6, %v5676_v1 }
 0x133   : > { %v6096_v6 = vadd.f32 %v2234_v4, %v1773_v46  ;;  %v401_v46 = vrot.slane %v399_v45, 7  ;;  %1089 = vst.msk [vmem:[#allocation2 + $0xf4] sm:$0xf] %vm1027_vm5, %v958_v61  ;;  %v838_v23 = vpop.permute.xlu1 %837 }
 0x134   : > { %5248 = vmatmul.msk.bf16.gmra.mxu2 %vm1593_vm7, %v5584_v0  ;;  %5280 = vmatmul.msk.bf16.gmra.mxu3 %vm1593_vm7, %v5584_v0  ;;  %1335 = vst.msk [vmem:[#allocation2 + $0xf4] sm:$0xf] %vm1272_vm6, %v5676_v1 }
 0x135   : > { %v404_v48 = vor.u32 %v402_v47, %v401_v46  ;;  %1029 = vst.msk [vmem:[#allocation2 + $0x4] sm:$0xf] %vm1027_vm5, %v838_v23 }
 0x137   : > { %v1778_v9 = vpop.f32.mrf.mxu2  ;;  %v1923_v10 = vpop.f32.mrf.mxu3  ;;  %v6137_v55 = vsel %vm5731_vm2, 0, %v404_v48 }
 0x138   : > { %v2235_v11 = vrot.slane %v1923_v10, 1  ;;  %v601_v56 = vunpack.c.h.b16 %v6137_v55  ;;  %v962_v9 = vpop.permute.xlu2 %961  ;;  %v600_v35 = vunpack.c.l.b16 %v6137_v55 }
 0x139   : > { %1091 = vst.msk [vmem:[#allocation2 + $0xfc] sm:$0xf] %vm1027_vm5, %v962_v9 }
 0x13a   : > { %v2236_v14 = vsel %vm2191_vm8, %v2233_v63, %v2235_v11  ;;  %v836_v10 = vpop.permute.xlu0 %835  ;;  %1337 = vst.msk [vmem:[#allocation2 + $0xfc] sm:$0xf] %vm1272_vm6, %v5676_v1 }
 0x13b   : > { %v6108_v17 = vadd.f32 %v2236_v14, %v1775_v59  ;;  %v6143_v59 = vpack.c.b16 %v601_v56, %v601_v56  ;;  %v537_v14 = vsel %vm5731_vm2, %v401_v46, 0  ;;  %1028 = vst.msk [vmem:[#allocation2] sm:$0xf] %vm1027_vm5, %v836_v10 }
 0x13c   : > { %v603_v15 = vunpack.c.h.b16 %v537_v14  ;;  %v602_v16 = vunpack.c.l.b16 %v537_v14 }
 0x13d   : > { %1118 = vrot.lane.b32.xlu0 %v6143_v59, %s5675_s25  ;;  %782 = vst.msk [vmem:[#allocation2 + $0x54] sm:$0xf] %vm549_vm3, %v6143_v59 }
 0x13e   : > { %v6185_v18 = vpack.c.b16 %v603_v15, %v603_v15 }
 0x13f   : > { %v1779_v19 = vpop.f32.mrf.mxu2  ;;  %v1925_v20 = vpop.f32.mrf.mxu3 }
 0x140   : > { %v662_v19 = vpack.c.b16 %v602_v16, %v602_v16  ;;  %v236_v20 = vld [vmem:[%s5723_s23 + $0x50] sm:$0xff]  ;;  %1122 = vrot.lane.b32.xlu1 %v6185_v18, %s5675_s25  ;;  %784 = vst.msk [vmem:[#allocation2 + $0x5c] sm:$0xf] %vm549_vm3, %v6185_v18  ;;  %v1093_v27 = vpop.permute.xlu2 %1092 }
 0x141   : > { %v268_v25 = vpack.c.bf16 %v236_v20, %v236_v20  ;;  %1273 = vst.msk [vmem:[#allocation2] sm:$0xf] %vm1272_vm6, %v1093_v27  ;;  %v238_v20 = vld [vmem:[%s5723_s23 + $0x60] sm:$0xff] }
 0x142   : > { %783 = vst.msk [vmem:[#allocation2 + $0x58] sm:$0xf] %vm549_vm3, %v662_v19  ;;  %v1095_v33 = vpop.permute.xlu0 %1094 }
 0x143   : > { %v332_v28 = vunpack.c.l.b16 %v268_v25  ;;  %1274 = vst.msk [vmem:[#allocation2 + $0x4] sm:$0xf] %vm1272_vm6, %v1095_v33  ;;  %v270_v25 = vpack.c.bf16 %v238_v20, %v238_v20 }
 0x144   : > { %5249 = vmatmul.msk.bf16.gmra.mxu2 %vm1593_vm7, %v5585_v22  ;;  %5281 = vmatmul.msk.bf16.gmra.mxu3 %vm1593_vm7, %v5585_v22  ;;  %v237_v22 = vld [vmem:[%s5723_s23 + $0x58] sm:$0xff] }
 0x145   : > { %v269_v26 = vpack.c.bf16 %v237_v22, %v237_v22  ;;  %1120 = vrot.lane.b32.xlu0 %v662_v19, %s5675_s25  ;;  %v239_v22 = vld [vmem:[%s5723_s23 + $0x68] sm:$0xff] }
 0x147   : > { %v1781_v38 = vpop.f32.mrf.mxu2  ;;  %v1927_v39 = vpop.f32.mrf.mxu3  ;;  %v333_v29 = vunpack.c.l.b16 %v269_v26  ;;  %v271_v26 = vpack.c.bf16 %v239_v22, %v239_v22 }
 0x148   : > { %v2237_v51 = vrot.slane %v1927_v39, 1  ;;  %v660_v39 = vpack.c.b16 %v600_v35, %v600_v35  ;;  %v840_v41 = vpop.permute.xlu1 %839  ;;  %v842_v61 = vpop.permute.xlu2 %841 }
 0x149   : > { %1030 = vst.msk [vmem:[#allocation2 + $0x8] sm:$0xf] %vm1027_vm5, %v840_v41 }
 0x14a   : > { %1116 = vrot.lane.b32.xlu2 %v660_v39, %s5675_s25  ;;  %781 = vst.msk [vmem:[#allocation2 + $0x50] sm:$0xf] %vm549_vm3, %v660_v39 }
 0x14b   : > { %1031 = vst.msk [vmem:[#allocation2 + $0xc] sm:$0xf] %vm1027_vm5, %v842_v61 }
 0x14d   : > { %869 = vrot.lane.b32.xlu0 %v6143_v59, %s5674_s24 }
 0x14f   : > { %v1783_v49 = vpop.f32.mrf.mxu2  ;;  %v1929_v50 = vpop.f32.mrf.mxu3 }
 0x150   : > { %v2238_v52 = vrot.slane %v1929_v50, 1  ;;  %v5085_v50 = vld [vmem:[#allocation2] sm:$0xf]  ;;  %v1099_v3 = vpop.permute.xlu1 %1098  ;;  %v844_v10 = vpop.permute.xlu2 %843 }
 0x151   : > { %2884 = vst.msk [vmem:[#allocation2] sm:$0xf] %vm549_vm3, %v5676_v1 }
 0x152   : > { %v2239_v57 = vsel %vm2191_vm8, %v2237_v51, %v2238_v52  ;;  %865 = vrot.lane.b32.xlu2 %v6167_v7, %s5674_s24  ;;  %1276 = vst.msk [vmem:[#allocation2 + $0xc] sm:$0xf] %vm1272_vm6, %v1099_v3 }
 0x153   : > { %v6141_v58 = vadd.f32 %v2239_v57, %v1781_v38  ;;  %v359_v38 = vpack.c.b16 %v333_v29, %v332_v28  ;;  %1032 = vst.msk [vmem:[#allocation2 + $0x10] sm:$0xf] %vm1027_vm5, %v844_v10  ;;  %v334_v28 = vunpack.c.l.b16 %v270_v25  ;;  %v335_v29 = vunpack.c.l.b16 %v271_v26 }
 0x154   : > { %5250 = vmatmul.msk.bf16.gmra.mxu2 %vm1593_vm7, %v5586_v54  ;;  %5282 = vmatmul.msk.bf16.gmra.mxu3 %vm1593_vm7, %v5586_v54 }
 0x155   : > { %v406_v40 = vshrl.u32 %v359_v38, 16  ;;  %v409_v42 = vshll.u32 %v359_v38, 16  ;;  %871 = vrot.lane.b32.xlu0 %v662_v19, %s5674_s24  ;;  %v360_v38 = vpack.c.b16 %v335_v29, %v334_v28 }
 0x157   : > { %v1786_v63 = vpop.f32.mrf.mxu2  ;;  %v1932_v0 = vpop.f32.mrf.mxu3  ;;  %v408_v32 = vrot.slane %v406_v40, 7  ;;  %v413_v40 = vshrl.u32 %v360_v38, 16 }
 0x158   : > { %v2240_v2 = vrot.slane %v1932_v0, 1  ;;  %v1103_v27 = vpop.permute.xlu2 %1102 }
 0x159   : > { %v411_v45 = vor.u32 %v409_v42, %v408_v32  ;;  %v5560_v14 = vld [vmem:[#allocation2 + $0x8] sm:$0xf0]  ;;  %v416_v42 = vshll.u32 %v360_v38, 16 }
 0x15a   : > { %v2241_v4 = vsel %vm2191_vm8, %v2238_v52, %v2240_v2  ;;  %v5559_v52 = vld [vmem:[#allocation2] sm:$0xf0]  ;;  %867 = vrot.lane.b32.xlu2 %v660_v39, %s5674_s24  ;;  %2887 = vst.msk [vmem:[#allocation2 + $0xc] sm:$0xf] %vm549_vm3, %v5676_v1 }
 0x15b   : > { %v6163_v5 = vadd.f32 %v2241_v4, %v1783_v49  ;;  %v5588_v49 = vld [vmem:[#allocation2 + $0xe8] sm:$0xff]  ;;  %v6210_v54 = vsel %vm5731_vm2, 0, %v411_v45  ;;  %2885 = vst.msk [vmem:[#allocation2 + $0x4] sm:$0xf] %vm549_vm3, %v5676_v1  ;;  %v6214_v55 = vor.u32 %v5559_v52, %v5085_v50  ;;  %v1097_v4 = vpop.permute.xlu0 %1096  ;;  %v5590_v50 = vld [vmem:[#allocation2 + $0xf8] sm:$0xff] }
 0x15c   : > { %v604_v56 = vunpack.c.l.b16 %v6210_v54  ;;  %1275 = vst.msk [vmem:[#allocation2 + $0x8] sm:$0xf] %vm1272_vm6, %v1097_v4  ;;  %v605_v35 = vunpack.c.h.b16 %v6210_v54 }
 0x15d   : > { %5255 = vmatmul.msk.bf16.vlgmr.msra.gmra.mxu1 %vm1593_vm7, %v6214_v55  ;;  %5223 = vmatmul.msk.bf16.vlgmr.msra.gmra.mxu0 %vm1593_vm7, %v6214_v55 }
 0x15e   : > { %v664_v60 = vpack.c.b16 %v604_v56, %v604_v56  ;;  %v665_v39 = vpack.c.b16 %v605_v35, %v605_v35 }
 0x15f   : > { %v1787_v11 = vpop.f32.mrf.mxu2  ;;  %v1934_v12 = vpop.f32.mrf.mxu3 }
 0x160   : > { %1124 = vrot.lane.b32.xlu1 %v664_v60, %s5675_s25  ;;  %785 = vst.msk [vmem:[#allocation2 + $0x60] sm:$0xf] %vm549_vm3, %v664_v60  ;;  %v6243_v12 = vsel %vm5731_vm2, %v408_v32, 0  ;;  %v1101_v33 = vpop.permute.xlu1 %1100  ;;  %v415_v32 = vrot.slane %v413_v40, 7 }
 0x161   : > { %v607_v15 = vunpack.c.h.b16 %v6243_v12  ;;  %1277 = vst.msk [vmem:[#allocation2 + $0x10] sm:$0xf] %vm1272_vm6, %v1101_v33 }
 0x162   : > { %1126 = vrot.lane.b32.xlu2 %v665_v39, %s5675_s25  ;;  %786 = vst.msk [vmem:[#allocation2 + $0x64] sm:$0xf] %vm549_vm3, %v665_v39  ;;  %v418_v45 = vor.u32 %v416_v42, %v415_v32 }
 0x163   : > { %v5089_v16 = vld [vmem:[#allocation2 + $0x8] sm:$0xf]  ;;  %v6252_v19 = vpack.c.b16 %v607_v15, %v607_v15  ;;  %v846_v23 = vpop.permute.xlu0 %845 }
 0x164   : > { %5251 = vmatmul.msk.bf16.gmra.mxu2 %vm1593_vm7, %v5587_v13  ;;  %5283 = vmatmul.msk.bf16.gmra.mxu3 %vm1593_vm7, %v5587_v13  ;;  %v5589_v13 = vld [vmem:[#allocation2 + $0xf0] sm:$0xff]  ;;  %2886 = vst.msk [vmem:[#allocation2 + $0x8] sm:$0xf] %vm549_vm3, %v5676_v1 }
 0x165   : > { %788 = vst.msk [vmem:[#allocation2 + $0x6c] sm:$0xf] %vm549_vm3, %v6252_v19  ;;  %1130 = vrot.lane.b32.xlu0 %v6252_v19, %s5675_s25 }
 0x166   : > { %1033 = vst.msk [vmem:[#allocation2 + $0x14] sm:$0xf] %vm1027_vm5, %v846_v23 }
 0x167   : > { %v1789_v30 = vpop.f32.mrf.mxu2  ;;  %v1936_v31 = vpop.f32.mrf.mxu3  ;;  %1278 = vst.msk [vmem:[#allocation2 + $0x14] sm:$0xf] %vm1272_vm6, %v1103_v27 }
 0x168   : > { %v2242_v46 = vrot.slane %v1936_v31, 1  ;;  %873 = vrot.lane.b32.xlu1 %v6185_v18, %s5674_s24  ;;  %v6250_v18 = vor.u32 %v5560_v14, %v5089_v16 }
 0x16b   : > { %v848_v41 = vpop.permute.xlu0 %847 }
 0x16c   : > { %1034 = vst.msk [vmem:[#allocation2 + $0x18] sm:$0xf] %vm1027_vm5, %v848_v41 }
 0x16d   : > { %5256 = vmatmul.msk.bf16.gmra.mxu1 %vm1593_vm7, %v6250_v18  ;;  %5224 = vmatmul.msk.bf16.gmra.mxu0 %vm1593_vm7, %v6250_v18 }
 0x16e   : > { %v6276_v52 = vld [vmem:[#allocation2 + $0x10] sm:$0xff] }
 0x16f   : > { %v1791_v47 = vpop.f32.mrf.mxu2  ;;  %v1938_v48 = vpop.f32.mrf.mxu3 }
 0x170   : > { %v2243_v51 = vrot.slane %v1938_v48, 1  ;;  %875 = vrot.lane.b32.xlu1 %v664_v60, %s5674_s24 }
 0x172   : > { %v2244_v57 = vsel %vm2191_vm8, %v2242_v46, %v2243_v51 }
 0x173   : > { %v6218_v59 = vadd.f32 %v2244_v57, %v1789_v30  ;;  %v1107_v10 = vpop.permute.xlu0 %1106 }
 0x174   : > { %5252 = vmatmul.msk.bf16.gmra.mxu2 %vm1593_vm7, %v5588_v49  ;;  %5284 = vmatmul.msk.bf16.gmra.mxu3 %vm1593_vm7, %v5588_v49 }
 0x177   : > { %v1794_v63 = vpop.f32.mrf.mxu2  ;;  %v1941_v0 = vpop.f32.mrf.mxu3 }
 0x178   : > { %v2245_v2 = vrot.slane %v1941_v0, 1  ;;  %v850_v0 = vpop.permute.xlu1 %849 }
 0x179   : > { %1035 = vst.msk [vmem:[#allocation2 + $0x1c] sm:$0xf] %vm1027_vm5, %v850_v0 }
 0x17a   : > { %v2246_v8 = vsel %vm2191_vm8, %v2243_v51, %v2245_v2  ;;  %v523_v51 = vsel %vm5731_vm2, 0, %v418_v45  ;;  %1280 = vst.msk [vmem:[#allocation2 + $0x1c] sm:$0xf] %vm1272_vm6, %v1107_v10 }
 0x17b   : > { %v6235_v9 = vadd.f32 %v2246_v8, %v1791_v47  ;;  %v609_v54 = vunpack.c.h.b16 %v523_v51  ;;  %v608_v56 = vunpack.c.l.b16 %v523_v51  ;;  %v1105_v8 = vpop.permute.xlu2 %1104  ;;  %v1109_v28 = vpop.permute.xlu0 %1108 }
 0x17c   : > { %1279 = vst.msk [vmem:[#allocation2 + $0x18] sm:$0xf] %vm1272_vm6, %v1105_v8 }
 0x17d   : > { %v669_v61 = vpack.c.b16 %v609_v54, %v609_v54  ;;  %v668_v63 = vpack.c.b16 %v608_v56, %v608_v56  ;;  %5257 = vmatmul.msk.bf16.gmra.mxu1 %vm1593_vm7, %v6276_v52  ;;  %5225 = vmatmul.msk.bf16.gmra.mxu0 %vm1593_vm7, %v6276_v52 }
 0x17f   : > { %v1795_v7 = vpop.f32.mrf.mxu2  ;;  %v1943_v11 = vpop.f32.mrf.mxu3  ;;  %1134 = vrot.lane.b32.xlu1 %v669_v61, %s5675_s25  ;;  %790 = vst.msk [vmem:[#allocation2 + $0x74] sm:$0xf] %vm549_vm3, %v669_v61  ;;  %1132 = vrot.lane.b32.xlu0 %v668_v63, %s5675_s25 }
 0x180   : > { %789 = vst.msk [vmem:[#allocation2 + $0x70] sm:$0xf] %vm549_vm3, %v668_v63  ;;  %v606_v7 = vunpack.c.l.b16 %v6243_v12  ;;  %v852_v15 = vpop.permute.xlu1 %851  ;;  %v539_v12 = vsel %vm5731_vm2, %v415_v32, 0 }
 0x181   : > { %1036 = vst.msk [vmem:[#allocation2 + $0x20] sm:$0xf] %vm1027_vm5, %v852_v15  ;;  %v610_v22 = vunpack.c.l.b16 %v539_v12 }
 0x182   : > { %v666_v14 = vpack.c.b16 %v606_v7, %v606_v7  ;;  %1281 = vst.msk [vmem:[#allocation2 + $0x20] sm:$0xf] %vm1272_vm6, %v1109_v28 }
 0x183   : > { %v6305_v23 = vld [vmem:[#allocation2 + $0x18] sm:$0xff]  ;;  %v670_v25 = vpack.c.b16 %v610_v22, %v610_v22  ;;  %v854_v26 = vpop.permute.xlu2 %853  ;;  %v858_v41 = vpop.permute.xlu0 %857 }
 0x184   : > { %5253 = vmatmul.msk.bf16.gmra.mxu2 %vm1593_vm7, %v5589_v13  ;;  %5285 = vmatmul.msk.bf16.gmra.mxu3 %vm1593_vm7, %v5589_v13  ;;  %787 = vst.msk [vmem:[#allocation2 + $0x68] sm:$0xf] %vm549_vm3, %v666_v14 }
 0x185   : > { %1128 = vrot.lane.b32.xlu2 %v666_v14, %s5675_s25  ;;  %791 = vst.msk [vmem:[#allocation2 + $0x78] sm:$0xf] %vm549_vm3, %v670_v25 }
 0x186   : > { %1037 = vst.msk [vmem:[#allocation2 + $0x24] sm:$0xf] %vm1027_vm5, %v854_v26 }
 0x187   : > { %v1797_v30 = vpop.f32.mrf.mxu2  ;;  %v1945_v31 = vpop.f32.mrf.mxu3  ;;  %881 = vrot.lane.b32.xlu0 %v6252_v19, %s5674_s24  ;;  %1136 = vrot.lane.b32.xlu1 %v670_v25, %s5675_s25  ;;  %1039 = vst.msk [vmem:[#allocation2 + $0x2c] sm:$0xf] %vm1027_vm5, %v858_v41 }
 0x188   : > { %v2247_v48 = vrot.slane %v1945_v31, 1 }
 0x18b   : > { %v856_v29 = vpop.permute.xlu2 %855  ;;  %v860_v51 = vpop.permute.xlu0 %859 }
 0x18c   : > { %1038 = vst.msk [vmem:[#allocation2 + $0x28] sm:$0xf] %vm1027_vm5, %v856_v29 }
 0x18d   : > { %5258 = vmatmul.msk.bf16.gmra.mxu1 %vm1593_vm7, %v6305_v23  ;;  %877 = vrot.lane.b32.xlu2 %v665_v39, %s5674_s24  ;;  %1040 = vst.msk [vmem:[#allocation2 + $0x30] sm:$0xf] %vm1027_vm5, %v860_v51 }
 0x18e   : > { %5226 = vmatmul.msk.bf16.gmra.mxu0 %vm1593_vm7, %v6305_v23 }
 0x18f   : > { %v1799_v46 = vpop.f32.mrf.mxu2  ;;  %v1947_v47 = vpop.f32.mrf.mxu3  ;;  %883 = vrot.lane.b32.xlu0 %v668_v63, %s5674_s24  ;;  %885 = vrot.lane.b32.xlu1 %v669_v61, %s5674_s24 }
 0x190   : > { %v2248_v49 = vrot.slane %v1947_v47, 1 }
 0x192   : > { %v2249_v57 = vsel %vm2191_vm8, %v2247_v48, %v2248_v49 }
 0x193   : > { %v6279_v60 = vadd.f32 %v2249_v57, %v1797_v30 }
 0x194   : > { %5254 = vmatmul.msk.bf16.gmra.mxu2 %vm1593_vm7, %v5590_v50  ;;  %5286 = vmatmul.msk.bf16.gmra.mxu3 %vm1593_vm7, %v5590_v50 }
 0x195   : > { %879 = vrot.lane.b32.xlu2 %v666_v14, %s5674_s24 }
 0x197   : > { %v1802_v2 = vpop.f32.mrf.mxu2  ;;  %v1950_v3 = vpop.f32.mrf.mxu3  ;;  %1142 = vrot.lane.b32.xlu0 %v5860_v62, %s5675_s25  ;;  %887 = vrot.lane.b32.xlu1 %v670_v25, %s5674_s24 }
 0x198   : > { %v2250_v4 = vrot.slane %v1950_v3, 1 }
 0x19a   : > { %v2251_v11 = vsel %vm2191_vm8, %v2248_v49, %v2250_v4 }
 0x19b   : > { %v6296_v13 = vadd.f32 %v2251_v11, %v1799_v46  ;;  %v1115_v46 = vpop.permute.xlu2 %1114  ;;  %v3738_v11 = vld [vmem:[%s7625_s3 + $0x20] sm:$0xf] }
 0x19c   : > { %1284 = vst.msk [vmem:[#allocation2 + $0x2c] sm:$0xf] %vm1272_vm6, %v1115_v46  ;;  %v3913_v15 = vunpack.c.l.b16 %v3738_v11 }
 0x19e   : > { %v3919_v22 = vpack.c.b16 %v3913_v15, %v3913_v15 }
 0x19f   : > { %v1803_v16 = vpop.f32.mrf.mxu2  ;;  %v1952_v20 = vpop.f32.mrf.mxu3  ;;  %1144 = vrot.lane.b32.xlu0 %v5892_v24, %s5675_s25  ;;  %1146 = vrot.lane.b32.xlu1 %v5906_v37, %s5675_s25 }
 0x1a4   : > { %5287 = vmatmul.msk.bf16.vlgmr.msrb.gmra.mxu2 %vm1593_vm7, %v6214_v55  ;;  %v1111_v55 = vpop.permute.xlu1 %1110 }
 0x1a5   : > { %1282 = vst.msk [vmem:[#allocation2 + $0x24] sm:$0xf] %vm1272_vm6, %v1111_v55  ;;  %v4026_v55 = vsel %vm1690_vm4, %v3919_v22, 0 }
 0x1a6   : > { %4324 = vmatpush.bf16.msrb.mxu1 %v4026_v55 }
 0x1a7   : > { %v1805_v19 = vpop.f32.mrf.mxu2  ;;  %v1954_v27 = vpop.f32.mrf.mxu3  ;;  %893 = vrot.lane.b32.xlu0 %v5860_v62, %s5674_s24  ;;  %1148 = vrot.lane.b32.xlu1 %v5743_v36, %s5675_s25 }
 0x1a8   : > { %v2252_v33 = vrot.slane %v1954_v27, 1  ;;  %v1117_v62 = vpop.permute.xlu2 %1116 }
 0x1a9   : > { %1285 = vst.msk [vmem:[#allocation2 + $0x30] sm:$0xf] %vm1272_vm6, %v1117_v62 }
 0x1ac   : > { %v6325_v38 = vld [vmem:[#allocation2 + $0x20] sm:$0xff]  ;;  %v1113_v47 = vpop.permute.xlu1 %1112 }
 0x1ad   : > { %5259 = vmatmul.msk.bf16.gmra.mxu1 %vm1593_vm7, %v6325_v38  ;;  %5227 = vmatmul.msk.bf16.gmra.mxu0 %vm1593_vm7, %v6325_v38  ;;  %1283 = vst.msk [vmem:[#allocation2 + $0x28] sm:$0xf] %vm1272_vm6, %v1113_v47 }
 0x1af   : > { %v1807_v30 = vpop.f32.mrf.mxu2  ;;  %v1956_v31 = vpop.f32.mrf.mxu3  ;;  %895 = vrot.lane.b32.xlu0 %v5892_v24, %s5674_s24  ;;  %897 = vrot.lane.b32.xlu1 %v5906_v37, %s5674_s24  ;;  %v3737_v37 = vld [vmem:[%s7625_s3 + $0x18] sm:$0xff] }
 0x1b0   : > { %v2253_v35 = vrot.slane %v1956_v31, 1  ;;  %v1119_v36 = vpop.permute.xlu0 %1118  ;;  %v3912_v14 = vunpack.c.h.b16 %v3737_v37  ;;  %v866_v16 = vpop.permute.xlu2 %865 }
 0x1b1   : > { %1043 = vst.msk [vmem:[#allocation2 + $0x3c] sm:$0xf] %vm1027_vm5, %v866_v16 }
 0x1b2   : > { %v2254_v39 = vsel %vm2191_vm8, %v2252_v33, %v2253_v35 }
 0x1b3   : > { %v6328_v40 = vadd.f32 %v2254_v39, %v1805_v19 }
 0x1b4   : > { %5288 = vmatmul.msk.bf16.gmra.mxu2 %vm1593_vm7, %v6250_v18  ;;  %v611_v18 = vunpack.c.h.b16 %v539_v12  ;;  %v6352_v57 = vld [vmem:[#allocation2 + $0x28] sm:$0xff]  ;;  %v862_v61 = vpop.permute.xlu1 %861  ;;  %v3918_v12 = vpack.c.b16 %v3912_v14, %v3912_v14 }
 0x1b5   : > { %1041 = vst.msk [vmem:[#allocation2 + $0x34] sm:$0xf] %vm1027_vm5, %v862_v61 }
 0x1b6   : > { %v671_v50 = vpack.c.b16 %v611_v18, %v611_v18  ;;  %1286 = vst.msk [vmem:[#allocation2 + $0x34] sm:$0xf] %vm1272_vm6, %v1119_v36  ;;  %v4023_v27 = vsel %vm1690_vm4, %v3918_v12, 0 }
 0x1b7   : > { %v1810_v32 = vpop.f32.mrf.mxu2  ;;  %v1959_v42 = vpop.f32.mrf.mxu3  ;;  %1154 = vrot.lane.b32.xlu0 %v5753_v43, %s5675_s25  ;;  %v3911_v43 = vunpack.c.l.b16 %v3737_v37  ;;  %4171 = vmatpush.bf16.msrb.mxu0 %v4023_v27 }
 0x1b8   : > { %v2255_v45 = vrot.slane %v1959_v42, 1  ;;  %1138 = vrot.lane.b32.xlu2 %v671_v50, %s5675_s25  ;;  %792 = vst.msk [vmem:[#allocation2 + $0x7c] sm:$0xf] %vm549_vm3, %v671_v50  ;;  %v1121_v29 = vpop.permute.xlu0 %1120  ;;  %v868_v31 = vpop.permute.xlu2 %867 }
 0x1b9   : > { %v3917_v20 = vpack.c.b16 %v3911_v43, %v3911_v43  ;;  %1044 = vst.msk [vmem:[#allocation2 + $0x40] sm:$0xf] %vm1027_vm5, %v868_v31 }
 0x1ba   : > { %v2256_v48 = vsel %vm2191_vm8, %v2253_v35, %v2255_v45 }
 0x1bb   : > { %v6343_v49 = vadd.f32 %v2256_v48, %v1807_v30  ;;  %v4020_v19 = vsel %vm1690_vm4, %v3917_v20, 0 }
 0x1bc   : > { %v864_v0 = vpop.permute.xlu1 %863  ;;  %4034 = vmatpush.bf16.msrb.mxu3 %v4020_v19 }
 0x1bd   : > { %5260 = vmatmul.msk.bf16.gmra.mxu1 %vm1593_vm7, %v6352_v57  ;;  %5228 = vmatmul.msk.bf16.gmra.mxu0 %vm1593_vm7, %v6352_v57  ;;  %1042 = vst.msk [vmem:[#allocation2 + $0x38] sm:$0xf] %vm1027_vm5, %v864_v0  ;;  %v6375_v8 = vld [vmem:[#allocation2 + $0x30] sm:$0xff] }
 0x1be   : > { %1287 = vst.msk [vmem:[#allocation2 + $0x38] sm:$0xf] %vm1272_vm6, %v1121_v29 }
 0x1bf   : > { %v1811_v54 = vpop.f32.mrf.mxu2  ;;  %v1961_v56 = vpop.f32.mrf.mxu3 }
 0x1c0   : > { %1140 = vrot.lane.b32.xlu2 %v5848_v53, %s5675_s25  ;;  %v870_v41 = vpop.permute.xlu0 %869  ;;  %v1127_v32 = vpop.permute.xlu2 %1126 }
 0x1c1   : > { %1045 = vst.msk [vmem:[#allocation2 + $0x44] sm:$0xf] %vm1027_vm5, %v870_v41 }
 0x1c2   : > { %1290 = vst.msk [vmem:[#allocation2 + $0x44] sm:$0xf] %vm1272_vm6, %v1127_v32 }
 0x1c4   : > { %5289 = vmatmul.msk.bf16.gmra.mxu2 %vm1593_vm7, %v6276_v52  ;;  %v1123_v28 = vpop.permute.xlu1 %1122 }
 0x1c5   : > { %1288 = vst.msk [vmem:[#allocation2 + $0x3c] sm:$0xf] %vm1272_vm6, %v1123_v28 }
 0x1c7   : > { %v1813_v52 = vpop.f32.mrf.mxu2  ;;  %v1963_v63 = vpop.f32.mrf.mxu3 }
 0x1c8   : > { %889 = vrot.lane.b32.xlu2 %v671_v50, %s5674_s24  ;;  %v2257_v3 = vrot.slane %v1963_v63, 1 }
 0x1cc   : > { %v6406_v39 = vld [vmem:[#allocation2 + $0x38] sm:$0xff] }
 0x1cd   : > { %5261 = vmatmul.msk.bf16.gmra.mxu1 %vm1593_vm7, %v6375_v8  ;;  %5229 = vmatmul.msk.bf16.gmra.mxu0 %vm1593_vm7, %v6375_v8 }
 0x1cf   : > { %v1815_v2 = vpop.f32.mrf.mxu2  ;;  %v1965_v24 = vpop.f32.mrf.mxu3 }
 0x1d0   : > { %v2258_v4 = vrot.slane %v1965_v24, 1  ;;  %891 = vrot.lane.b32.xlu2 %v5848_v53, %s5674_s24 }
 0x1d2   : > { %v2259_v10 = vsel %vm2191_vm8, %v2257_v3, %v2258_v4  ;;  %v1125_v45 = vpop.permute.xlu1 %1124 }
 0x1d3   : > { %v6378_v7 = vadd.f32 %v2259_v10, %v1813_v52  ;;  %1289 = vst.msk [vmem:[#allocation2 + $0x40] sm:$0xf] %vm1272_vm6, %v1125_v45 }
 0x1d4   : > { %5290 = vmatmul.msk.bf16.gmra.mxu2 %vm1593_vm7, %v6305_v23 }
 0x1d7   : > { %v1818_v25 = vpop.f32.mrf.mxu2  ;;  %v1968_v23 = vpop.f32.mrf.mxu3 }
 0x1d8   : > { %v2260_v26 = vrot.slane %v1968_v23, 1  ;;  %1150 = vrot.lane.b32.xlu2 %v5755_v44, %s5675_s25 }
 0x1da   : > { %v2261_v53 = vsel %vm2191_vm8, %v2258_v4, %v2260_v26  ;;  %v6420_v50 = vpop.f32.mrf.mxu1  ;;  %v874_v56 = vpop.permute.xlu1 %873 }
 0x1db   : > { %v6401_v30 = vadd.f32 %v2261_v53, %v1815_v2  ;;  %1047 = vst.msk [vmem:[#allocation2 + $0x4c] sm:$0xf] %vm1027_vm5, %v874_v56  ;;  %v6437_v2 = vpop.f32.mrf.mxu0 }
 0x1dd   : > { %5262 = vmatmul.msk.bf16.gmra.mxu1 %vm1593_vm7, %v6406_v39  ;;  %5230 = vmatmul.msk.bf16.gmra.mxu0 %vm1593_vm7, %v6406_v39 }
 0x1df   : > { %v1819_v33 = vpop.f32.mrf.mxu2  ;;  %v1970_v35 = vpop.f32.mrf.mxu3 }
 0x1e0   : > { %1152 = vrot.lane.b32.xlu2 %v5741_v34, %s5675_s25  ;;  %v6422_v34 = vld [vmem:[#allocation2 + $0x40] sm:$0xff]  ;;  %v1129_v63 = vpop.permute.xlu2 %1128 }
 0x1e2   : > { %v6434_v36 = vpop.f32.mrf.mxu1  ;;  %v876_v3 = vpop.permute.xlu1 %875 }
 0x1e3   : > { %1048 = vst.msk [vmem:[#allocation2 + $0x50] sm:$0xf] %vm1027_vm5, %v876_v3  ;;  %v6444_v37 = vpop.f32.mrf.mxu0  ;;  %v2192_v3 = vrot.slane %v6420_v50, 1 }
 0x1e4   : > { %5291 = vmatmul.msk.bf16.gmra.mxu2 %vm1593_vm7, %v6325_v38  ;;  %v872_v38 = vpop.permute.xlu0 %871 }
 0x1e5   : > { %1046 = vst.msk [vmem:[#allocation2 + $0x48] sm:$0xf] %vm1027_vm5, %v872_v38 }
 0x1e6   : > { %1291 = vst.msk [vmem:[#allocation2 + $0x48] sm:$0xf] %vm1272_vm6, %v1129_v63 }
 0x1e7   : > { %v1821_v44 = vpop.f32.mrf.mxu2  ;;  %v1972_v42 = vpop.f32.mrf.mxu3 }
 0x1e8   : > { %v2262_v18 = vrot.slane %v1972_v42, 1  ;;  %v878_v14 = vpop.permute.xlu2 %877 }
 0x1e9   : > { %1049 = vst.msk [vmem:[#allocation2 + $0x54] sm:$0xf] %vm1027_vm5, %v878_v14 }
 0x1ea   : > { %v6448_v43 = vpop.f32.mrf.mxu1 }
 0x1eb   : > { %v1714_v22 = vpop.f32.mrf.mxu0 }
 0x1ec   : > { %v1131_v0 = vpop.permute.xlu0 %1130 }
 0x1ed   : > { %5263 = vmatmul.msk.bf16.gmra.mxu1 %vm1593_vm7, %v6422_v34  ;;  %5231 = vmatmul.msk.bf16.gmra.mxu0 %vm1593_vm7, %v6422_v34  ;;  %1292 = vst.msk [vmem:[#allocation2 + $0x4c] sm:$0xf] %vm1272_vm6, %v1131_v0 }
 0x1ef   : > { %v1823_v46 = vpop.f32.mrf.mxu2  ;;  %v1974_v47 = vpop.f32.mrf.mxu3 }
 0x1f0   : > { %v2263_v48 = vrot.slane %v1974_v47, 1 }
 0x1f1   : > { %v1135_v20 = vpop.permute.xlu1 %1134 }
 0x1f2   : > { %v2264_v51 = vsel %vm2191_vm8, %v2262_v18, %v2263_v48  ;;  %1294 = vst.msk [vmem:[#allocation2 + $0x54] sm:$0xf] %vm1272_vm6, %v1135_v20  ;;  %v1853_v25 = vpop.f32.mrf.mxu1 }
 0x1f3   : > { %v6425_v54 = vadd.f32 %v2264_v51, %v1821_v44  ;;  %v1715_v55 = vpop.f32.mrf.mxu0 }
 0x1f4   : > { %5292 = vmatmul.msk.bf16.gmra.mxu2 %vm1593_vm7, %v6352_v57  ;;  %v6446_v11 = vld [vmem:[#allocation2 + $0x48] sm:$0xff]  ;;  %v1133_v12 = vpop.permute.xlu0 %1132 }
 0x1f5   : > { %1293 = vst.msk [vmem:[#allocation2 + $0x50] sm:$0xf] %vm1272_vm6, %v1133_v12 }
 0x1f7   : > { %v1826_v61 = vpop.f32.mrf.mxu2  ;;  %v1977_v62 = vpop.f32.mrf.mxu3 }
 0x1f8   : > { %v2265_v52 = vrot.slane %v1977_v62, 1 }
 0x1f9   : > { %v1137_v42 = vpop.permute.xlu1 %1136 }
 0x1fa   : > { %v2266_v57 = vsel %vm2191_vm8, %v2263_v48, %v2265_v52  ;;  %v6463_v53 = vpop.f32.mrf.mxu1 }
 0x1fb   : > { %v6441_v24 = vadd.f32 %v2266_v57, %v1823_v46  ;;  %v6475_v45 = vpop.f32.mrf.mxu0 }
 0x1fc   : > { %v6460_v28 = vld [vmem:[#allocation2 + $0x50] sm:$0xff]  ;;  %v882_v33 = vpop.permute.xlu0 %881 }
 0x1fd   : > { %5264 = vmatmul.msk.bf16.gmra.mxu1 %vm1593_vm7, %v6446_v11  ;;  %5232 = vmatmul.msk.bf16.gmra.mxu0 %vm1593_vm7, %v6446_v11  ;;  %1051 = vst.msk [vmem:[#allocation2 + $0x5c] sm:$0xf] %vm1027_vm5, %v882_v33 }
 0x1ff   : > { %v1827_v4 = vpop.f32.mrf.mxu2  ;;  %v1979_v10 = vpop.f32.mrf.mxu3 }
 0x201   : > { %v886_v62 = vpop.permute.xlu1 %885 }
 0x202   : > { %v6479_v38 = vpop.f32.mrf.mxu1  ;;  %1053 = vst.msk [vmem:[#allocation2 + $0x64] sm:$0xf] %vm1027_vm5, %v886_v62 }
 0x203   : > { %v6484_v51 = vpop.f32.mrf.mxu0 }
 0x204   : > { %5293 = vmatmul.msk.bf16.gmra.mxu2 %vm1593_vm7, %v6375_v8  ;;  %v880_v8 = vpop.permute.xlu2 %879  ;;  %v884_v18 = vpop.permute.xlu0 %883 }
 0x205   : > { %1050 = vst.msk [vmem:[#allocation2 + $0x58] sm:$0xf] %vm1027_vm5, %v880_v8  ;;  %v2195_v8 = vrot.slane %v6448_v43, 1 }
 0x206   : > { %1295 = vst.msk [vmem:[#allocation2 + $0x58] sm:$0xf] %vm1272_vm6, %v1137_v42 }
 0x207   : > { %v1829_v15 = vpop.f32.mrf.mxu2  ;;  %v1981_v16 = vpop.f32.mrf.mxu3  ;;  %1052 = vst.msk [vmem:[#allocation2 + $0x60] sm:$0xf] %vm1027_vm5, %v884_v18 }
 0x208   : > { %v2267_v23 = vrot.slane %v1981_v16, 1 }
 0x209   : > { %v888_v10 = vpop.permute.xlu1 %887 }
 0x20a   : > { %v6488_v61 = vpop.f32.mrf.mxu1  ;;  %1054 = vst.msk [vmem:[#allocation2 + $0x68] sm:$0xf] %vm1027_vm5, %v888_v10 }
 0x20b   : > { %v1722_v57 = vpop.f32.mrf.mxu0 }
 0x20c   : > { %v1143_v0 = vpop.permute.xlu0 %1142 }
 0x20d   : > { %5265 = vmatmul.msk.bf16.gmra.mxu1 %vm1593_vm7, %v6460_v28  ;;  %5233 = vmatmul.msk.bf16.gmra.mxu0 %vm1593_vm7, %v6460_v28  ;;  %1298 = vst.msk [vmem:[#allocation2 + $0x64] sm:$0xf] %vm1272_vm6, %v1143_v0 }
 0x20f   : > { %v1831_v26 = vpop.f32.mrf.mxu2  ;;  %v1983_v19 = vpop.f32.mrf.mxu3 }
 0x210   : > { %v2268_v27 = vrot.slane %v1983_v19, 1 }
 0x212   : > { %v2269_v29 = vsel %vm2191_vm8, %v2267_v23, %v2268_v27  ;;  %v1139_v44 = vpop.permute.xlu2 %1138  ;;  %v1862_v4 = vpop.f32.mrf.mxu1 }
 0x213   : > { %v6465_v31 = vadd.f32 %v2269_v29, %v1829_v15  ;;  %1296 = vst.msk [vmem:[#allocation2 + $0x5c] sm:$0xf] %vm1272_vm6, %v1139_v44  ;;  %v1723_v22 = vpop.f32.mrf.mxu0  ;;  %v1147_v29 = vpop.permute.xlu1 %1146 }
 0x214   : > { %5294 = vmatmul.msk.bf16.gmra.mxu2 %vm1593_vm7, %v6406_v39  ;;  %v1145_v33 = vpop.permute.xlu0 %1144 }
 0x215   : > { %1299 = vst.msk [vmem:[#allocation2 + $0x68] sm:$0xf] %vm1272_vm6, %v1145_v33 }
 0x217   : > { %v1834_v35 = vpop.f32.mrf.mxu2  ;;  %v1986_v41 = vpop.f32.mrf.mxu3 }
 0x218   : > { %v2270_v32 = vrot.slane %v1986_v41, 1 }
 0x21a   : > { %v2271_v39 = vsel %vm2191_vm8, %v2268_v27, %v2270_v32  ;;  %v6486_v56 = vld [vmem:[#allocation2 + $0x58] sm:$0xff]  ;;  %v1141_v52 = vpop.permute.xlu2 %1140 }
 0x21b   : > { %v6481_v46 = vadd.f32 %v2271_v39, %v1831_v26  ;;  %1297 = vst.msk [vmem:[#allocation2 + $0x60] sm:$0xf] %vm1272_vm6, %v1141_v52  ;;  %v6513_v26 = vld [vmem:[%s7624_s2] ss:$0 sm:$0xff]  ;;  %v1149_v4 = vpop.permute.xlu1 %1148 }
 0x21d   : > { %5266 = vmatmul.msk.bf16.gmra.mxu1 %vm1593_vm7, %v6486_v56  ;;  %5234 = vmatmul.msk.bf16.gmra.mxu0 %vm1593_vm7, %v6486_v56 }
 0x21f   : > { %v1835_v47 = vpop.f32.mrf.mxu2  ;;  %v1988_v48 = vpop.f32.mrf.mxu3 }
 0x222   : > { %v6504_v25 = vld [vmem:[#allocation2 + $0x60] sm:$0xff]  ;;  %v890_v27 = vpop.permute.xlu2 %889 }
 0x223   : > { %1055 = vst.msk [vmem:[#allocation2 + $0x6c] sm:$0xf] %vm1027_vm5, %v890_v27 }
 0x224   : > { %5295 = vmatmul.msk.bf16.gmra.mxu2 %vm1593_vm7, %v6422_v34  ;;  %v2193_v34 = vrot.slane %v6434_v36, 1  ;;  %1300 = vst.msk [vmem:[#allocation2 + $0x6c] sm:$0xf] %vm1272_vm6, %v1147_v29 }
 0x226   : > { %v2194_v14 = vsel %vm2191_vm8, %v2192_v3, %v2193_v34 }
 0x227   : > { %v1999_v63 = vpop.f32.mrf.mxu2  ;;  %v2304_v12 = vadd.f32 %v2194_v14, %v6437_v2  ;;  %v2196_v2 = vsel %vm2191_vm8, %v2193_v34, %v2195_v8  ;;  %v894_v34 = vpop.permute.xlu0 %893 }
 0x228   : > { %v2385_v16 = vrot.slane %v1999_v63, 2  ;;  %v2305_v35 = vadd.f32 %v2196_v2, %v6444_v37  ;;  %1057 = vst.msk [vmem:[#allocation2 + $0x74] sm:$0xf] %vm1027_vm5, %v894_v34 }
 0x22a   : > { %v6508_v36 = vpop.f32.mrf.mxu1  ;;  %v6530_v32 = vpop.f32.mrf.mxu0 }
 0x22b   : > { %v892_v62 = vpop.permute.xlu2 %891  ;;  %v6534_v37 = vld [vmem:[#allocation2 + $0x68] sm:$0xff] }
 0x22c   : > { %1056 = vst.msk [vmem:[#allocation2 + $0x70] sm:$0xf] %vm1027_vm5, %v892_v62  ;;  %v2200_v62 = vrot.slane %v6488_v61, 1 }
 0x22d   : > { %5267 = vmatmul.msk.bf16.gmra.mxu1 %vm1593_vm7, %v6504_v25  ;;  %5235 = vmatmul.msk.bf16.gmra.mxu0 %vm1593_vm7, %v6504_v25  ;;  %1301 = vst.msk [vmem:[#allocation2 + $0x70] sm:$0xf] %vm1272_vm6, %v1149_v4 }
 0x22f   : > { %v2001_v15 = vpop.f32.mrf.mxu2 }
 0x230   : > { %v2386_v20 = vrot.slane %v2001_v15, 2 }
 0x232   : > { %v2387_v50 = vsel %vm2384_vm9, %v2385_v16, %v2386_v20  ;;  %v6528_v41 = vpop.f32.mrf.mxu1  ;;  %v6538_v0 = vpop.f32.mrf.mxu0 }
 0x233   : > { %v2497_v23 = vadd.f32 %v2387_v50, %v2304_v12  ;;  %v1151_v16 = vpop.permute.xlu2 %1150 }
 0x234   : > { %5296 = vmatmul.msk.bf16.gmra.mxu2 %vm1593_vm7, %v6446_v11  ;;  %1302 = vst.msk [vmem:[#allocation2 + $0x74] sm:$0xf] %vm1272_vm6, %v1151_v16 }
 0x235   : > { %v2532_v43 = vadd.f32 %v6513_v26, %v2497_v23 }
 0x237   : > { %v2004_v19 = vpop.f32.mrf.mxu2  ;;  %v2564_v44 = vmax.f32 %v2532_v43, 0.0 }
 0x238   : > { %v2388_v55 = vrot.slane %v2004_v19, 2  ;;  %v896_v19 = vpop.permute.xlu0 %895 }
 0x239   : > { %v2596_v47 = vpack.c.bf16 %v2564_v44, %v2564_v44  ;;  %1058 = vst.msk [vmem:[#allocation2 + $0x78] sm:$0xf] %vm1027_vm5, %v896_v19  ;;  %v5457_v19 = vld [vmem:[%s7625_s3 + $0x8] sm:$0xf] }
 0x23a   : > { %v2389_v11 = vsel %vm2384_vm9, %v2386_v20, %v2388_v55  ;;  %v6536_v63 = vpop.f32.mrf.mxu1  ;;  %v2197_v20 = vrot.slane %v6463_v53, 1  ;;  %v1730_v50 = vpop.f32.mrf.mxu0 }
 0x23b   : > { %v2498_v42 = vadd.f32 %v2389_v11, %v2305_v35  ;;  %v2660_v57 = vunpack.c.l.b16 %v2596_v47  ;;  %v5449_v50 = vld [vmem:[%s7625_s3] sm:$0xf] }
 0x23d   : > { %v2533_v39 = vadd.f32 %v6513_v26, %v2498_v42  ;;  %5268 = vmatmul.msk.bf16.gmra.mxu1 %vm1593_vm7, %v6534_v37  ;;  %5236 = vmatmul.msk.bf16.gmra.mxu0 %vm1593_vm7, %v6534_v37 }
 0x23f   : > { %v2565_v18 = vmax.f32 %v2533_v39, 0.0  ;;  %v2006_v48 = vpop.f32.mrf.mxu2 }
 0x240   : > { %v6561_v48 = vld [vmem:[#allocation2 + $0x70] sm:$0xff]  ;;  %v1155_v16 = vpop.permute.xlu0 %1154 }
 0x241   : > { %v2597_v52 = vpack.c.bf16 %v2565_v18, %v2565_v18 }
 0x242   : > { %v1871_v8 = vpop.f32.mrf.mxu1 }
 0x243   : > { %v2661_v3 = vunpack.c.l.b16 %v2597_v52 }
 0x244   : > { %5297 = vmatmul.msk.bf16.gmra.mxu2 %vm1593_vm7, %v6460_v28  ;;  %v2198_v28 = vrot.slane %v6479_v38, 1 }
 0x245   : > { %v2692_v10 = vpack.c.b16 %v2661_v3, %v2660_v57  ;;  %v1731_v3 = vpop.f32.mrf.mxu0 }
 0x246   : > { %v2199_v55 = vsel %vm2191_vm8, %v2197_v20, %v2198_v28 }
 0x247   : > { %v2008_v14 = vpop.f32.mrf.mxu2  ;;  %v2709_v15 = vshrl.u32 %v2692_v10, 16  ;;  %v2712_v22 = vshll.u32 %v2692_v10, 16  ;;  %v2306_v18 = vadd.f32 %v2199_v55, %v6475_v45  ;;  %v2201_v45 = vsel %vm2191_vm8, %v2198_v28, %v2200_v62  ;;  %v898_v10 = vpop.permute.xlu1 %897 }
 0x248   : > { %v2390_v44 = vrot.slane %v2008_v14, 2  ;;  %1059 = vst.msk [vmem:[#allocation2 + $0x7c] sm:$0xf] %vm1027_vm5, %v898_v10  ;;  %v2307_v20 = vadd.f32 %v2201_v45, %v6484_v51  ;;  %v5627_v51 = vld [vmem:[%s7625_s3 + $0x8] sm:$0xf0]  ;;  %v2202_v45 = vrot.slane %v6508_v36, 1 }
 0x249   : > { %v2711_v12 = vrot.slane %v2709_v15, 7  ;;  %v1153_v15 = vpop.permute.xlu2 %1152  ;;  %1304 = vst.msk [vmem:[#allocation2 + $0x7c] sm:$0xf] %vm1272_vm6, %v1155_v16 }
 0x24a   : > { %v6570_v57 = vpop.f32.mrf.mxu1  ;;  %1303 = vst.msk [vmem:[#allocation2 + $0x78] sm:$0xf] %vm1272_vm6, %v1153_v15 }
 0x24b   : > { %v2714_v23 = vor.u32 %v2712_v22, %v2711_v12  ;;  %v2868_v2 = vsel %vm5731_vm2, %v2711_v12, 0 }
 0x24c   : > { %v2920_v43 = vunpack.c.l.b16 %v2868_v2  ;;  %v2921_v27 = vunpack.c.h.b16 %v2868_v2  ;;  %v5450_v2 = vor.u32 %v5627_v51, %v5449_v50 }
 0x24d   : > { %v2852_v53 = vsel %vm5731_vm2, 0, %v2714_v23  ;;  %5269 = vmatmul.msk.bf16.gmra.mxu1 %vm1593_vm7, %v6561_v48  ;;  %5237 = vmatmul.msk.bf16.gmra.mxu0 %vm1593_vm7, %v6561_v48  ;;  %v6589_v22 = vpop.f32.mrf.mxu0  ;;  %v5626_v23 = vld [vmem:[%s7625_s3 + $0x4] sm:$0xf] }
 0x24e   : > { %v2919_v38 = vunpack.c.h.b16 %v2852_v53  ;;  %v2918_v29 = vunpack.c.l.b16 %v2852_v53  ;;  %v2980_v33 = vpack.c.b16 %v2920_v43, %v2920_v43  ;;  %v6557_v35 = vpack.c.b16 %v2921_v27, %v2921_v27  ;;  %v5451_v43 = vld [vmem:[%s7625_s3 + $0xc] sm:$0xf0]  ;;  %v5628_v27 = vld [vmem:[%s7625_s3 + $0x10] sm:$0xf0]  ;;  %4035 = vmatpush.bf16.msrb.mxu3 %v5450_v2 }
 0x24f   : > { %v2010_v11 = vpop.f32.mrf.mxu2  ;;  %v5454_v53 = vor.u32 %v5626_v23, %v5451_v43 }
 0x250   : > { %v2391_v42 = vrot.slane %v2010_v11, 2  ;;  %v2979_v39 = vpack.c.b16 %v2919_v38, %v2919_v38  ;;  %v2978_v47 = vpack.c.b16 %v2918_v29, %v2918_v29  ;;  %3100 = vst.msk [vmem:[#allocation2 + $0x18] sm:$0xf] %vm549_vm3, %v2980_v33  ;;  %v5458_v38 = vor.u32 %v5628_v27, %v5457_v19 }
 0x251   : > { %3101 = vst.msk [vmem:[#allocation2 + $0x1c] sm:$0xf] %vm549_vm3, %v6557_v35  ;;  %4172 = vmatpush.bf16.msrb.mxu0 %v5454_v53  ;;  %v2205_v53 = vrot.slane %v6536_v63, 1 }
 0x252   : > { %v2392_v52 = vsel %vm2384_vm9, %v2390_v44, %v2391_v42  ;;  %3170 = vrot.lane.b32.xlu2 %v2979_v39, %s5674_s24  ;;  %3099 = vst.msk [vmem:[#allocation2 + $0x14] sm:$0xf] %vm549_vm3, %v2979_v39  ;;  %3168 = vrot.lane.b32.xlu1 %v2978_v47, %s5674_s24  ;;  %v6587_v28 = vpop.f32.mrf.mxu1 }
 0x253   : > { %v2499_v34 = vadd.f32 %v2392_v52, %v2306_v18  ;;  %3098 = vst.msk [vmem:[#allocation2 + $0x10] sm:$0xf] %vm549_vm3, %v2978_v47  ;;  %4325 = vmatpush.bf16.msrb.mxu1 %v5458_v38 }
 0x254   : > { %5298 = vmatmul.msk.bf16.gmra.mxu2 %vm1593_vm7, %v6486_v56 }
 0x255   : > { %v2534_v61 = vadd.f32 %v6513_v26, %v2499_v34  ;;  %v6614_v47 = vpop.f32.mrf.mxu0 }
 0x257   : > { %v2013_v4 = vpop.f32.mrf.mxu2  ;;  %v2566_v56 = vmax.f32 %v2534_v61, 0.0  ;;  %v2203_v61 = vrot.slane %v6528_v41, 1 }
 0x258   : > { %v2393_v14 = vrot.slane %v2013_v4, 2 }
 0x259   : > { %v2598_v29 = vpack.c.bf16 %v2566_v56, %v2566_v56 }
 0x25a   : > { %v2394_v12 = vsel %vm2384_vm9, %v2391_v42, %v2393_v14  ;;  %3172 = vrot.lane.b32.xlu2 %v2980_v33, %s5674_s24  ;;  %v6610_v42 = vld [vmem:[#allocation2 + $0x78] sm:$0xff]  ;;  %v6612_v39 = vpop.f32.mrf.mxu1 }
 0x25b   : > { %v2500_v8 = vadd.f32 %v2394_v12, %v2307_v20  ;;  %v2662_v18 = vunpack.c.l.b16 %v2598_v29  ;;  %v2204_v12 = vsel %vm2191_vm8, %v2202_v45, %v2203_v61 }
 0x25d   : > { %v2535_v55 = vadd.f32 %v6513_v26, %v2500_v8  ;;  %5270 = vmatmul.msk.bf16.gmra.mxu1 %vm1593_vm7, %v6610_v42  ;;  %5238 = vmatmul.msk.bf16.gmra.mxu0 %vm1593_vm7, %v6610_v42  ;;  %v1738_v15 = vpop.f32.mrf.mxu0 }
 0x25f   : > { %v2567_v33 = vmax.f32 %v2535_v55, 0.0  ;;  %v2015_v11 = vpop.f32.mrf.mxu2  ;;  %v2308_v55 = vadd.f32 %v2204_v12, %v6530_v32  ;;  %v2206_v32 = vsel %vm2191_vm8, %v2203_v61, %v2205_v53 }
 0x261   : > { %v2599_v44 = vpack.c.bf16 %v2567_v33, %v2567_v33 }
 0x262   : > { %v1880_v14 = vpop.f32.mrf.mxu1 }
 0x263   : > { %v2663_v62 = vunpack.c.l.b16 %v2599_v44 }
 0x264   : > { %5299 = vmatmul.msk.bf16.gmra.mxu2 %vm1593_vm7, %v6504_v25 }
 0x265   : > { %v2693_v52 = vpack.c.b16 %v2663_v62, %v2662_v18  ;;  %v1739_v33 = vpop.f32.mrf.mxu0  ;;  %v2309_v62 = vadd.f32 %v2206_v32, %v6538_v0 }
 0x267   : > { %v2017_v3 = vpop.f32.mrf.mxu2  ;;  %v2716_v34 = vshrl.u32 %v2693_v52, 16  ;;  %v2719_v10 = vshll.u32 %v2693_v52, 16 }
 0x268   : > { %v2395_v2 = vrot.slane %v2017_v3, 2 }
 0x269   : > { %v2718_v4 = vrot.slane %v2716_v34, 7 }
 0x26a   : > { %v6642_v29 = vpop.f32.mrf.mxu1 }
 0x26b   : > { %v2869_v25 = vsel %vm5731_vm2, %v2718_v4, 0  ;;  %v2721_v16 = vor.u32 %v2719_v10, %v2718_v4 }
 0x26c   : > { %v2925_v20 = vunpack.c.h.b16 %v2869_v25  ;;  %v2924_v56 = vunpack.c.l.b16 %v2869_v25 }
 0x26d   : > { %v2853_v8 = vsel %vm5731_vm2, 0, %v2721_v16  ;;  %v6656_v34 = vpop.f32.mrf.mxu0 }
 0x26e   : > { %v6629_v50 = vpack.c.b16 %v2925_v20, %v2925_v20  ;;  %v2923_v36 = vunpack.c.h.b16 %v2853_v8  ;;  %v2922_v51 = vunpack.c.l.b16 %v2853_v8  ;;  %v2984_v41 = vpack.c.b16 %v2924_v56, %v2924_v56 }
 0x26f   : > { %v2019_v23 = vpop.f32.mrf.mxu2  ;;  %v2207_v8 = vrot.slane %v6570_v57, 1 }
 0x270   : > { %v2396_v43 = vrot.slane %v2019_v23, 2  ;;  %3430 = vrot.lane.b32.xlu2 %v6629_v50, %s5675_s25  ;;  %3105 = vst.msk [vmem:[#allocation2 + $0x2c] sm:$0xf] %vm549_vm3, %v6629_v50  ;;  %v2983_v19 = vpack.c.b16 %v2923_v36, %v2923_v36  ;;  %v2982_v27 = vpack.c.b16 %v2922_v51, %v2922_v51  ;;  %v2208_v36 = vrot.slane %v6587_v28, 1 }
 0x271   : > { %3104 = vst.msk [vmem:[#allocation2 + $0x28] sm:$0xf] %vm549_vm3, %v2984_v41 }
 0x272   : > { %v2397_v38 = vsel %vm2384_vm9, %v2395_v2, %v2396_v43  ;;  %3426 = vrot.lane.b32.xlu1 %v2983_v19, %s5675_s25  ;;  %3103 = vst.msk [vmem:[#allocation2 + $0x24] sm:$0xf] %vm549_vm3, %v2983_v19  ;;  %3424 = vrot.lane.b32.xlu0 %v2982_v27, %s5675_s25  ;;  %v6654_v3 = vpop.f32.mrf.mxu1 }
 0x273   : > { %v2501_v11 = vadd.f32 %v2397_v38, %v2308_v55  ;;  %3102 = vst.msk [vmem:[#allocation2 + $0x20] sm:$0xf] %vm549_vm3, %v2982_v27 }
 0x274   : > { %5300 = vmatmul.msk.bf16.gmra.mxu2 %vm1593_vm7, %v6534_v37 }
 0x275   : > { %v2536_v63 = vadd.f32 %v6513_v26, %v2501_v11  ;;  %v6663_v25 = vpop.f32.mrf.mxu0 }
 0x277   : > { %v2022_v44 = vpop.f32.mrf.mxu2  ;;  %v2568_v37 = vmax.f32 %v2536_v63, 0.0 }
 0x278   : > { %v2398_v18 = vrot.slane %v2022_v44, 2 }
 0x279   : > { %v2600_v4 = vpack.c.bf16 %v2568_v37, %v2568_v37 }
 0x27a   : > { %v2399_v52 = vsel %vm2384_vm9, %v2396_v43, %v2398_v18  ;;  %3428 = vrot.lane.b32.xlu1 %v2984_v41, %s5675_s25  ;;  %3174 = vrot.lane.b32.xlu0 %v6557_v35, %s5674_s24  ;;  %v6661_v0 = vpop.f32.mrf.mxu1 }
 0x27b   : > { %v2502_v45 = vadd.f32 %v2399_v52, %v2309_v62  ;;  %v2664_v35 = vunpack.c.l.b16 %v2600_v4  ;;  %v2210_v52 = vrot.slane %v6612_v39, 1 }
 0x27d   : > { %v2537_v61 = vadd.f32 %v6513_v26, %v2502_v45  ;;  %v1746_v43 = vpop.f32.mrf.mxu0 }
 0x27f   : > { %v2569_v10 = vmax.f32 %v2537_v61, 0.0  ;;  %v2024_v14 = vpop.f32.mrf.mxu2 }
 0x281   : > { %v2601_v15 = vpack.c.bf16 %v2569_v10, %v2569_v10 }
 0x282   : > { %3178 = vrot.lane.b32.xlu1 %v2983_v19, %s5674_s24  ;;  %3176 = vrot.lane.b32.xlu0 %v2982_v27, %s5674_s24  ;;  %v1889_v2 = vpop.f32.mrf.mxu1 }
 0x283   : > { %v2665_v16 = vunpack.c.l.b16 %v2601_v15 }
 0x284   : > { %5301 = vmatmul.msk.bf16.gmra.mxu2 %vm1593_vm7, %v6561_v48  ;;  %v2209_v48 = vsel %vm2191_vm8, %v2207_v8, %v2208_v36 }
 0x285   : > { %v2694_v20 = vpack.c.b16 %v2665_v16, %v2664_v35  ;;  %v2310_v62 = vadd.f32 %v2209_v48, %v6589_v22  ;;  %v1747_v61 = vpop.f32.mrf.mxu0  ;;  %v2211_v22 = vsel %vm2191_vm8, %v2208_v36, %v2210_v52  ;;  %v2212_v48 = vrot.slane %v6642_v29, 1 }
 0x286   : > { %v2311_v15 = vadd.f32 %v2211_v22, %v6614_v47 }
 0x287   : > { %v2026_v56 = vpop.f32.mrf.mxu2  ;;  %v2723_v12 = vshrl.u32 %v2694_v20, 16  ;;  %v2726_v23 = vshll.u32 %v2694_v20, 16 }
 0x289   : > { %v2725_v51 = vrot.slane %v2723_v12, 7 }
 0x28a   : > { %3180 = vrot.lane.b32.xlu1 %v2984_v41, %s5674_s24  ;;  %v2400_v41 = vrot.slane %v2026_v56, 2  ;;  %v6687_v45 = vpop.f32.mrf.mxu1 }
 0x28b   : > { %v2870_v19 = vsel %vm5731_vm2, %v2725_v51, 0  ;;  %v2728_v27 = vor.u32 %v2726_v23, %v2725_v51 }
 0x28c   : > { %v2929_v55 = vunpack.c.h.b16 %v2870_v19  ;;  %v2928_v53 = vunpack.c.l.b16 %v2870_v19 }
 0x28d   : > { %v2854_v38 = vsel %vm5731_vm2, 0, %v2728_v27  ;;  %v6700_v20 = vpop.f32.mrf.mxu0  ;;  %v5646_v27 = vld [vmem:[#allocation2 + $0x80] sm:$0xff] }
 0x28e   : > { %v6675_v57 = vpack.c.b16 %v2929_v55, %v2929_v55  ;;  %v2927_v28 = vunpack.c.h.b16 %v2854_v38  ;;  %v2926_v33 = vunpack.c.l.b16 %v2854_v38  ;;  %v2988_v11 = vpack.c.b16 %v2928_v53, %v2928_v53 }
 0x28f   : > { %v2028_v32 = vpop.f32.mrf.mxu2  ;;  %v2213_v38 = vrot.slane %v6654_v3, 1 }
 0x290   : > { %v2401_v63 = vrot.slane %v2028_v32, 2  ;;  %3109 = vst.msk [vmem:[#allocation2 + $0x3c] sm:$0xf] %vm549_vm3, %v6675_v57  ;;  %v2987_v44 = vpack.c.b16 %v2927_v28, %v2927_v28  ;;  %v2986_v18 = vpack.c.b16 %v2926_v33, %v2926_v33 }
 0x291   : > { %3108 = vst.msk [vmem:[#allocation2 + $0x38] sm:$0xf] %vm549_vm3, %v2988_v11 }
 0x292   : > { %v2402_v37 = vsel %vm2384_vm9, %v2400_v41, %v2401_v63  ;;  %3438 = vrot.lane.b32.xlu1 %v6675_v57, %s5675_s25  ;;  %3434 = vrot.lane.b32.xlu0 %v2987_v44, %s5675_s25  ;;  %3107 = vst.msk [vmem:[#allocation2 + $0x34] sm:$0xf] %vm549_vm3, %v2987_v44  ;;  %v6698_v16 = vpop.f32.mrf.mxu1 }
 0x293   : > { %v2503_v4 = vadd.f32 %v2402_v37, %v2310_v62  ;;  %3432 = vrot.lane.b32.xlu2 %v2986_v18, %s5675_s25  ;;  %3106 = vst.msk [vmem:[#allocation2 + $0x30] sm:$0xf] %vm549_vm3, %v2986_v18  ;;  %v2214_v37 = vsel %vm2191_vm8, %v2212_v48, %v2213_v38 }
 0x294   : > { %5302 = vmatmul.msk.bf16.gmra.mxu2 %vm1593_vm7, %v6610_v42 }
 0x295   : > { %v2538_v39 = vadd.f32 %v6513_v26, %v2503_v4  ;;  %v6708_v2 = vpop.f32.mrf.mxu0 }
 0x297   : > { %v2031_v10 = vpop.f32.mrf.mxu2  ;;  %v2570_v56 = vmax.f32 %v2538_v39, 0.0 }
 0x298   : > { %v2403_v14 = vrot.slane %v2031_v10, 2 }
 0x299   : > { %v2602_v8 = vpack.c.bf16 %v2570_v56, %v2570_v56  ;;  %v2215_v56 = vrot.slane %v6661_v0, 1 }
 0x29a   : > { %v2404_v35 = vsel %vm2384_vm9, %v2401_v63, %v2403_v14  ;;  %3436 = vrot.lane.b32.xlu0 %v2988_v11, %s5675_s25  ;;  %v6706_v47 = vpop.f32.mrf.mxu1 }
 0x29b   : > { %v2504_v12 = vadd.f32 %v2404_v35, %v2311_v15  ;;  %3182 = vrot.lane.b32.xlu2 %v6629_v50, %s5674_s24  ;;  %v2666_v43 = vunpack.c.l.b16 %v2602_v8  ;;  %v2312_v35 = vadd.f32 %v2214_v37, %v6656_v34  ;;  %v2216_v0 = vsel %vm2191_vm8, %v2213_v38, %v2215_v56  ;;  %v5648_v37 = vld [vmem:[#allocation2 + $0x90] sm:$0xff] }
 0x29d   : > { %v2539_v42 = vadd.f32 %v6513_v26, %v2504_v12  ;;  %v1754_v41 = vpop.f32.mrf.mxu0 }
 0x29f   : > { %v2571_v36 = vmax.f32 %v2539_v42, 0.0  ;;  %v2033_v51 = vpop.f32.mrf.mxu2 }
 0x2a0   : > { %v5647_v51 = vld [vmem:[#allocation2 + $0x88] sm:$0xff] }
 0x2a1   : > { %v2603_v23 = vpack.c.bf16 %v2571_v36, %v2571_v36 }
 0x2a2   : > { %3186 = vrot.lane.b32.xlu0 %v2987_v44, %s5674_s24  ;;  %v1898_v32 = vpop.f32.mrf.mxu1 }
 0x2a3   : > { %v2667_v19 = vunpack.c.l.b16 %v2603_v23  ;;  %3184 = vrot.lane.b32.xlu2 %v2986_v18, %s5674_s24 }
 0x2a4   : > { %5303 = vmatmul.msk.bf16.gmra.mxu2 %vm1593_vm7, %v5646_v27  ;;  %v2313_v27 = vadd.f32 %v2216_v0, %v6663_v25 }
 0x2a5   : > { %v2695_v50 = vpack.c.b16 %v2667_v19, %v2666_v43  ;;  %v1755_v8 = vpop.f32.mrf.mxu0 }
 0x2a7   : > { %v2035_v55 = vpop.f32.mrf.mxu2  ;;  %v2730_v53 = vshrl.u32 %v2695_v50, 16  ;;  %v2733_v33 = vshll.u32 %v2695_v50, 16 }
 0x2a8   : > { %v2405_v39 = vrot.slane %v2035_v55, 2 }
 0x2a9   : > { %v2732_v28 = vrot.slane %v2730_v53, 7 }
 0x2aa   : > { %3188 = vrot.lane.b32.xlu0 %v2988_v11, %s5674_s24  ;;  %v6733_v42 = vpop.f32.mrf.mxu1 }
 0x2ab   : > { %v2871_v63 = vsel %vm5731_vm2, %v2732_v28, 0  ;;  %v2735_v44 = vor.u32 %v2733_v33, %v2732_v28 }
 0x2ac   : > { %v3171_v18 = vpop.permute.xlu2 %3170  ;;  %v2933_v62 = vunpack.c.h.b16 %v2871_v63  ;;  %v2932_v52 = vunpack.c.l.b16 %v2871_v63 }
 0x2ad   : > { %3361 = vst.msk [vmem:[#allocation2 + $0x4] sm:$0xf] %vm1027_vm5, %v3171_v18  ;;  %v2855_v29 = vsel %vm5731_vm2, 0, %v2735_v44  ;;  %v6746_v53 = vpop.f32.mrf.mxu0 }
 0x2ae   : > { %v6721_v3 = vpack.c.b16 %v2933_v62, %v2933_v62  ;;  %v2931_v61 = vunpack.c.h.b16 %v2855_v29  ;;  %v2930_v11 = vunpack.c.l.b16 %v2855_v29  ;;  %v2992_v4 = vpack.c.b16 %v2932_v52, %v2932_v52 }
 0x2af   : > { %v2037_v22 = vpop.f32.mrf.mxu2 }
 0x2b0   : > { %v2406_v10 = vrot.slane %v2037_v22, 2  ;;  %3113 = vst.msk [vmem:[#allocation2 + $0x4c] sm:$0xf] %vm549_vm3, %v6721_v3  ;;  %v2991_v14 = vpack.c.b16 %v2931_v61, %v2931_v61  ;;  %v2990_v15 = vpack.c.b16 %v2930_v11, %v2930_v11  ;;  %v2217_v11 = vrot.slane %v6687_v45, 1 }
 0x2b1   : > { %3112 = vst.msk [vmem:[#allocation2 + $0x48] sm:$0xf] %vm549_vm3, %v2992_v4  ;;  %v2218_v22 = vrot.slane %v6698_v16, 1 }
 0x2b2   : > { %v2407_v12 = vsel %vm2384_vm9, %v2405_v39, %v2406_v10  ;;  %3446 = vrot.lane.b32.xlu0 %v6721_v3, %s5675_s25  ;;  %3442 = vrot.lane.b32.xlu2 %v2991_v14, %s5675_s25  ;;  %3111 = vst.msk [vmem:[#allocation2 + $0x44] sm:$0xf] %vm549_vm3, %v2991_v14  ;;  %v6744_v55 = vpop.f32.mrf.mxu1 }
 0x2b3   : > { %v2505_v36 = vadd.f32 %v2407_v12, %v2312_v35  ;;  %3440 = vrot.lane.b32.xlu1 %v2990_v15, %s5675_s25  ;;  %3110 = vst.msk [vmem:[#allocation2 + $0x40] sm:$0xf] %vm549_vm3, %v2990_v15 }
 0x2b4   : > { %v3173_v34 = vpop.permute.xlu2 %3172  ;;  %5304 = vmatmul.msk.bf16.gmra.mxu2 %vm1593_vm7, %v5647_v51 }
 0x2b5   : > { %3362 = vst.msk [vmem:[#allocation2 + $0x8] sm:$0xf] %vm1027_vm5, %v3173_v34  ;;  %v2540_v23 = vadd.f32 %v6513_v26, %v2505_v36  ;;  %v6754_v44 = vpop.f32.mrf.mxu0  ;;  %v2219_v36 = vsel %vm2191_vm8, %v2217_v11, %v2218_v22 }
 0x2b7   : > { %v2040_v43 = vpop.f32.mrf.mxu2  ;;  %v2572_v48 = vmax.f32 %v2540_v23, 0.0 }
 0x2b8   : > { %v2408_v19 = vrot.slane %v2040_v43, 2 }
 0x2b9   : > { %v2604_v33 = vpack.c.bf16 %v2572_v48, %v2572_v48  ;;  %v2220_v48 = vrot.slane %v6706_v47, 1 }
 0x2ba   : > { %v2409_v50 = vsel %vm2384_vm9, %v2406_v10, %v2408_v19  ;;  %3444 = vrot.lane.b32.xlu2 %v2992_v4, %s5675_s25  ;;  %v6752_v25 = vpop.f32.mrf.mxu1 }
 0x2bb   : > { %v2506_v28 = vadd.f32 %v2409_v50, %v2313_v27  ;;  %3190 = vrot.lane.b32.xlu1 %v6675_v57, %s5674_s24  ;;  %v2668_v18 = vunpack.c.l.b16 %v2604_v33  ;;  %v2314_v50 = vadd.f32 %v2219_v36, %v6700_v20  ;;  %v2221_v47 = vsel %vm2191_vm8, %v2218_v22, %v2220_v48 }
 0x2bd   : > { %v2541_v38 = vadd.f32 %v6513_v26, %v2506_v28  ;;  %v1762_v56 = vpop.f32.mrf.mxu0 }
 0x2be   : > { %v5650_v56 = vld [vmem:[#allocation2 + $0xa0] sm:$0xff] }
 0x2bf   : > { %v2573_v32 = vmax.f32 %v2541_v38, 0.0  ;;  %v2042_v41 = vpop.f32.mrf.mxu2 }
 0x2c1   : > { %v2605_v63 = vpack.c.bf16 %v2573_v32, %v2573_v32  ;;  %v5649_v32 = vld [vmem:[#allocation2 + $0x98] sm:$0xff] }
 0x2c2   : > { %3194 = vrot.lane.b32.xlu2 %v2991_v14, %s5674_s24  ;;  %v1907_v14 = vpop.f32.mrf.mxu1 }
 0x2c3   : > { %v2669_v62 = vunpack.c.l.b16 %v2605_v63  ;;  %3192 = vrot.lane.b32.xlu1 %v2990_v15, %s5674_s24 }
 0x2c4   : > { %v3169_v52 = vpop.permute.xlu1 %3168  ;;  %5305 = vmatmul.msk.bf16.gmra.mxu2 %vm1593_vm7, %v5648_v37 }
 0x2c5   : > { %v2696_v57 = vpack.c.b16 %v2669_v62, %v2668_v18  ;;  %3360 = vst.msk [vmem:[#allocation2] sm:$0xf] %vm1027_vm5, %v3169_v52  ;;  %v1763_v20 = vpop.f32.mrf.mxu0  ;;  %v2315_v62 = vadd.f32 %v2221_v47, %v6708_v2 }
 0x2c7   : > { %v2044_v29 = vpop.f32.mrf.mxu2  ;;  %v2737_v61 = vshrl.u32 %v2696_v57, 16  ;;  %v2740_v10 = vshll.u32 %v2696_v57, 16 }
 0x2c9   : > { %v2739_v39 = vrot.slane %v2737_v61, 7 }
 0x2ca   : > { %3196 = vrot.lane.b32.xlu2 %v2992_v4, %s5674_s24  ;;  %v2410_v4 = vrot.slane %v2044_v29, 2  ;;  %v6779_v38 = vpop.f32.mrf.mxu1 }
 0x2cb   : > { %v2872_v15 = vsel %vm5731_vm2, %v2739_v39, 0  ;;  %v2742_v35 = vor.u32 %v2740_v10, %v2739_v39 }
 0x2cc   : > { %v2937_v12 = vunpack.c.h.b16 %v2872_v15  ;;  %v2936_v8 = vunpack.c.l.b16 %v2872_v15 }
 0x2cd   : > { %v2856_v34 = vsel %vm5731_vm2, 0, %v2742_v35  ;;  %v6793_v61 = vpop.f32.mrf.mxu0 }
 0x2ce   : > { %v6767_v45 = vpack.c.b16 %v2937_v12, %v2937_v12  ;;  %v2935_v16 = vunpack.c.h.b16 %v2856_v34  ;;  %v2934_v51 = vunpack.c.l.b16 %v2856_v34  ;;  %v2996_v0 = vpack.c.b16 %v2936_v8, %v2936_v8  ;;  %v3431_v8 = vpop.permute.xlu2 %3430 }
 0x2cf   : > { %v2046_v23 = vpop.f32.mrf.mxu2 }
 0x2d0   : > { %v2411_v43 = vrot.slane %v2046_v23, 2  ;;  %3117 = vst.msk [vmem:[#allocation2 + $0x5c] sm:$0xf] %vm549_vm3, %v6767_v45  ;;  %v2995_v19 = vpack.c.b16 %v2935_v16, %v2935_v16  ;;  %v2994_v27 = vpack.c.b16 %v2934_v51, %v2934_v51  ;;  %v2222_v23 = vrot.slane %v6733_v42, 1 }
 0x2d1   : > { %3116 = vst.msk [vmem:[#allocation2 + $0x58] sm:$0xf] %vm549_vm3, %v2996_v0 }
 0x2d2   : > { %v2412_v28 = vsel %vm2384_vm9, %v2410_v4, %v2411_v43  ;;  %3454 = vrot.lane.b32.xlu2 %v6767_v45, %s5675_s25  ;;  %3450 = vrot.lane.b32.xlu1 %v2995_v19, %s5675_s25  ;;  %3115 = vst.msk [vmem:[#allocation2 + $0x54] sm:$0xf] %vm549_vm3, %v2995_v19  ;;  %v6789_v37 = vpop.f32.mrf.mxu1  ;;  %v2223_v4 = vrot.slane %v6744_v55, 1 }
 0x2d3   : > { %v2507_v33 = vadd.f32 %v2412_v28, %v2314_v50  ;;  %3448 = vrot.lane.b32.xlu0 %v2994_v27, %s5675_s25  ;;  %3114 = vst.msk [vmem:[#allocation2 + $0x50] sm:$0xf] %vm549_vm3, %v2994_v27 }
 0x2d4   : > { %5306 = vmatmul.msk.bf16.gmra.mxu2 %vm1593_vm7, %v5649_v32  ;;  %v2224_v47 = vsel %vm2191_vm8, %v2222_v23, %v2223_v4 }
 0x2d5   : > { %v2542_v41 = vadd.f32 %v6513_v26, %v2507_v33  ;;  %v6802_v34 = vpop.f32.mrf.mxu0 }
 0x2d7   : > { %v2049_v63 = vpop.f32.mrf.mxu2  ;;  %v2574_v57 = vmax.f32 %v2542_v41, 0.0 }
 0x2d8   : > { %v2413_v18 = vrot.slane %v2049_v63, 2 }
 0x2d9   : > { %v2606_v22 = vpack.c.bf16 %v2574_v57, %v2574_v57 }
 0x2da   : > { %v2414_v52 = vsel %vm2384_vm9, %v2411_v43, %v2413_v18  ;;  %3452 = vrot.lane.b32.xlu1 %v2996_v0, %s5675_s25  ;;  %v6797_v2 = vpop.f32.mrf.mxu1 }
 0x2db   : > { %v2508_v29 = vadd.f32 %v2414_v52, %v2315_v62  ;;  %3198 = vrot.lane.b32.xlu0 %v6721_v3, %s5674_s24  ;;  %v2670_v15 = vunpack.c.l.b16 %v2606_v22 }
 0x2dd   : > { %v2543_v11 = vadd.f32 %v6513_v26, %v2508_v29  ;;  %v1770_v63 = vpop.f32.mrf.mxu0 }
 0x2df   : > { %v2575_v39 = vmax.f32 %v2543_v11, 0.0  ;;  %v2051_v10 = vpop.f32.mrf.mxu2 }
 0x2e0   : > { %v2316_v10 = vadd.f32 %v2224_v47, %v6746_v53  ;;  %v5651_v53 = vld [vmem:[#allocation2 + $0xa8] sm:$0xff]  ;;  %v5652_v47 = vld [vmem:[#allocation2 + $0xb0] sm:$0xff] }
 0x2e1   : > { %v2607_v14 = vpack.c.bf16 %v2575_v39, %v2575_v39 }
 0x2e2   : > { %3202 = vrot.lane.b32.xlu1 %v2995_v19, %s5674_s24 }
 0x2e3   : > { %v2671_v35 = vunpack.c.l.b16 %v2607_v14  ;;  %3200 = vrot.lane.b32.xlu0 %v2994_v27, %s5674_s24  ;;  %v1916_v27 = vpop.f32.mrf.mxu1  ;;  %v2225_v14 = vrot.slane %v6752_v25, 1 }
 0x2e4   : > { %5307 = vmatmul.msk.bf16.gmra.mxu2 %vm1593_vm7, %v5650_v56  ;;  %v3427_v3 = vpop.permute.xlu1 %3426  ;;  %v3425_v12 = vpop.permute.xlu0 %3424 }
 0x2e5   : > { %v2697_v36 = vpack.c.b16 %v2671_v35, %v2670_v15  ;;  %3605 = vst.msk [vmem:[#allocation2 + $0x4] sm:$0xf] %vm1272_vm6, %v3427_v3 }
 0x2e6   : > { %3604 = vst.msk [vmem:[#allocation2] sm:$0xf] %vm1272_vm6, %v3425_v12  ;;  %v1771_v12 = vpop.f32.mrf.mxu0 }
 0x2e7   : > { %v2053_v16 = vpop.f32.mrf.mxu2  ;;  %v2744_v51 = vshrl.u32 %v2697_v36, 16  ;;  %v2747_v19 = vshll.u32 %v2697_v36, 16 }
 0x2e8   : > { %v2415_v29 = vrot.slane %v2053_v16, 2 }
 0x2e9   : > { %v2746_v43 = vrot.slane %v2744_v51, 7 }
 0x2ea   : > { %3204 = vrot.lane.b32.xlu1 %v2996_v0, %s5674_s24 }
 0x2eb   : > { %v2873_v50 = vsel %vm5731_vm2, %v2746_v43, 0  ;;  %v2749_v48 = vor.u32 %v2747_v19, %v2746_v43 }
 0x2ec   : > { %v3429_v28 = vpop.permute.xlu1 %3428  ;;  %v3175_v33 = vpop.permute.xlu0 %3174  ;;  %v2941_v20 = vunpack.c.h.b16 %v2873_v50  ;;  %v2940_v32 = vunpack.c.l.b16 %v2873_v50 }
 0x2ed   : > { %3606 = vst.msk [vmem:[#allocation2 + $0x8] sm:$0xf] %vm1272_vm6, %v3429_v28  ;;  %v3433_v42 = vpop.permute.xlu2 %3432  ;;  %v5594_v41 = vld [vmem:[#allocation2] sm:$0xff]  ;;  %v2857_v55 = vsel %vm5731_vm2, 0, %v2749_v48 }
 0x2ee   : > { %3363 = vst.msk [vmem:[#allocation2 + $0xc] sm:$0xf] %vm1027_vm5, %v3175_v33  ;;  %v6815_v0 = vpack.c.b16 %v2941_v20, %v2941_v20  ;;  %v2939_v18 = vunpack.c.h.b16 %v2857_v55  ;;  %v2938_v62 = vunpack.c.l.b16 %v2857_v55  ;;  %v6817_v52 = vpack.c.b16 %v2940_v32, %v2940_v32  ;;  %5459 = vmatmul.msk.bf16.vlgmr.msrb.gmra.mxu3 %vm1593_vm7, %v5594_v41  ;;  %5491 = vmatmul.msk.bf16.vlgmr.msrb.gmra.mxu0 %vm1593_vm7, %v5594_v41 }
 0x2ef   : > { %3607 = vst.msk [vmem:[#allocation2 + $0xc] sm:$0xf] %vm1272_vm6, %v3431_v8  ;;  %v2055_v57 = vpop.f32.mrf.mxu2  ;;  %5523 = vmatmul.msk.bf16.vlgmr.msrb.gmra.mxu1 %vm1593_vm7, %v5594_v41  ;;  %v2226_v8 = vsel %vm2191_vm8, %v2223_v4, %v2225_v14 }
 0x2f0   : > { %v2416_v11 = vrot.slane %v2055_v57, 2  ;;  %3121 = vst.msk [vmem:[#allocation2 + $0x6c] sm:$0xf] %vm549_vm3, %v6815_v0  ;;  %v2999_v22 = vpack.c.b16 %v2939_v18, %v2939_v18  ;;  %v2998_v39 = vpack.c.b16 %v2938_v62, %v2938_v62  ;;  %v2317_v23 = vadd.f32 %v2226_v8, %v6754_v44 }
 0x2f1   : > { %3120 = vst.msk [vmem:[#allocation2 + $0x68] sm:$0xf] %vm549_vm3, %v6817_v52  ;;  %v2227_v62 = vrot.slane %v6779_v38, 1  ;;  %v2228_v57 = vrot.slane %v6789_v37, 1 }
 0x2f2   : > { %v2417_v15 = vsel %vm2384_vm9, %v2415_v29, %v2416_v11  ;;  %3462 = vrot.lane.b32.xlu1 %v6815_v0, %s5675_s25  ;;  %3458 = vrot.lane.b32.xlu0 %v2999_v22, %s5675_s25  ;;  %3119 = vst.msk [vmem:[#allocation2 + $0x64] sm:$0xf] %vm549_vm3, %v2999_v22 }
 0x2f3   : > { %v2509_v35 = vadd.f32 %v2417_v15, %v2316_v10  ;;  %3456 = vrot.lane.b32.xlu2 %v2998_v39, %s5675_s25  ;;  %3118 = vst.msk [vmem:[#allocation2 + $0x60] sm:$0xf] %vm549_vm3, %v2998_v39 }
 0x2f4   : > { %5308 = vmatmul.msk.bf16.gmra.mxu2 %vm1593_vm7, %v5651_v53  ;;  %v3179_v56 = vpop.permute.xlu1 %3178  ;;  %v3177_v3 = vpop.permute.xlu0 %3176  ;;  %v2229_v53 = vsel %vm2191_vm8, %v2227_v62, %v2228_v57 }
 0x2f5   : > { %3365 = vst.msk [vmem:[#allocation2 + $0x14] sm:$0xf] %vm1027_vm5, %v3179_v56  ;;  %v3183_v25 = vpop.permute.xlu2 %3182  ;;  %v2544_v36 = vadd.f32 %v6513_v26, %v2509_v35 }
 0x2f6   : > { %3364 = vst.msk [vmem:[#allocation2 + $0x10] sm:$0xf] %vm1027_vm5, %v3177_v3  ;;  %v5595_v28 = vld [vmem:[#allocation2 + $0x8] sm:$0xff] }
 0x2f7   : > { %3608 = vst.msk [vmem:[#allocation2 + $0x10] sm:$0xf] %vm1272_vm6, %v3433_v42  ;;  %v2058_v16 = vpop.f32.mrf.mxu2  ;;  %v2576_v19 = vmax.f32 %v2544_v36, 0.0 }
 0x2f8   : > { %3367 = vst.msk [vmem:[#allocation2 + $0x1c] sm:$0xf] %vm1027_vm5, %v3183_v25  ;;  %v2418_v51 = vrot.slane %v2058_v16, 2 }
 0x2f9   : > { %v2608_v44 = vpack.c.bf16 %v2576_v19, %v2576_v19 }
 0x2fa   : > { %v2419_v43 = vsel %vm2384_vm9, %v2416_v11, %v2418_v51  ;;  %3460 = vrot.lane.b32.xlu0 %v6817_v52, %s5675_s25 }
 0x2fb   : > { %v2510_v27 = vadd.f32 %v2419_v43, %v2317_v23  ;;  %3206 = vrot.lane.b32.xlu2 %v6767_v45, %s5674_s24  ;;  %v2672_v45 = vunpack.c.l.b16 %v2608_v44  ;;  %v2318_v23 = vadd.f32 %v2229_v53, %v6793_v61  ;;  %v2230_v43 = vrot.slane %v6797_v2, 1  ;;  %v5653_v61 = vld [vmem:[#allocation2 + $0xb8] sm:$0xff] }
 0x2fc   : > { %v3181_v4 = vpop.permute.xlu1 %3180 }
 0x2fd   : > { %v2545_v50 = vadd.f32 %v6513_v26, %v2510_v27  ;;  %3366 = vst.msk [vmem:[#allocation2 + $0x18] sm:$0xf] %vm1027_vm5, %v3181_v4  ;;  %v3185_v48 = vpop.permute.xlu2 %3184  ;;  %v2231_v2 = vsel %vm2191_vm8, %v2228_v57, %v2230_v43 }
 0x2fe   : > { %3368 = vst.msk [vmem:[#allocation2 + $0x20] sm:$0xf] %vm1027_vm5, %v3185_v48  ;;  %5460 = vmatmul.msk.bf16.gmra.mxu3 %vm1593_vm7, %v5595_v28  ;;  %5492 = vmatmul.msk.bf16.gmra.mxu0 %vm1593_vm7, %v5595_v28  ;;  %v6897_v48 = vld [vmem:[%s7624_s2] ss:$0 sm:$0xff] }
 0x2ff   : > { %v2577_v33 = vmax.f32 %v2545_v50, 0.0  ;;  %v2060_v20 = vpop.f32.mrf.mxu2  ;;  %5524 = vmatmul.msk.bf16.gmra.mxu1 %vm1593_vm7, %v5595_v28 }
 0x300   : > { %v2319_v20 = vadd.f32 %v2231_v2, %v6802_v34 }
 0x301   : > { %v2609_v32 = vpack.c.bf16 %v2577_v33, %v2577_v33 }
 0x302   : > { %3210 = vrot.lane.b32.xlu0 %v2999_v22, %s5674_s24 }
 0x303   : > { %v2673_v26 = vunpack.c.l.b16 %v2609_v32  ;;  %3208 = vrot.lane.b32.xlu2 %v2998_v39, %s5674_s24 }
 0x304   : > { %5309 = vmatmul.msk.bf16.gmra.mxu2 %vm1593_vm7, %v5652_v47  ;;  %v3439_v42 = vpop.permute.xlu1 %3438  ;;  %v3435_v41 = vpop.permute.xlu0 %3434 }
 0x305   : > { %v2698_v55 = vpack.c.b16 %v2673_v26, %v2672_v45  ;;  %3611 = vst.msk [vmem:[#allocation2 + $0x1c] sm:$0xf] %vm1272_vm6, %v3439_v42 }
 0x306   : > { %3609 = vst.msk [vmem:[#allocation2 + $0x14] sm:$0xf] %vm1272_vm6, %v3435_v41 }
 0x307   : > { %v2062_v63 = vpop.f32.mrf.mxu2  ;;  %v2751_v18 = vshrl.u32 %v2698_v55, 16  ;;  %v2754_v11 = vshll.u32 %v2698_v55, 16 }
 0x308   : > { %v2420_v8 = vrot.slane %v2062_v63, 2 }
 0x309   : > { %v2753_v29 = vrot.slane %v2751_v18, 7 }
 0x30a   : > { %3212 = vrot.lane.b32.xlu0 %v6817_v52, %s5674_s24 }
 0x30b   : > { %v2874_v22 = vsel %vm5731_vm2, %v2753_v29, 0  ;;  %v2756_v39 = vor.u32 %v2754_v11, %v2753_v29  ;;  %v5655_v29 = vld [vmem:[#allocation2 + $0xc0] sm:$0xff] }
 0x30c   : > { %v3437_v10 = vpop.permute.xlu0 %3436  ;;  %v3443_v14 = vpop.permute.xlu2 %3442  ;;  %v2945_v15 = vunpack.c.h.b16 %v2874_v22  ;;  %v2944_v35 = vunpack.c.l.b16 %v2874_v22 }
 0x30d   : > { %3610 = vst.msk [vmem:[#allocation2 + $0x18] sm:$0xf] %vm1272_vm6, %v3437_v10  ;;  %v5596_v38 = vld [vmem:[#allocation2 + $0x10] sm:$0xff]  ;;  %v2858_v37 = vsel %vm5731_vm2, 0, %v2756_v39 }
 0x30e   : > { %v6870_v56 = vpack.c.b16 %v2945_v15, %v2945_v15  ;;  %v2943_v3 = vunpack.c.h.b16 %v2858_v37  ;;  %v2942_v52 = vunpack.c.l.b16 %v2858_v37  ;;  %v6872_v25 = vpack.c.b16 %v2944_v35, %v2944_v35  ;;  %5461 = vmatmul.msk.bf16.gmra.mxu3 %vm1593_vm7, %v5596_v38  ;;  %5493 = vmatmul.msk.bf16.gmra.mxu0 %vm1593_vm7, %v5596_v38 }
 0x30f   : > { %v2064_v12 = vpop.f32.mrf.mxu2  ;;  %5525 = vmatmul.msk.bf16.gmra.mxu1 %vm1593_vm7, %v5596_v38 }
 0x310   : > { %v2421_v36 = vrot.slane %v2064_v12, 2  ;;  %3125 = vst.msk [vmem:[#allocation2 + $0x7c] sm:$0xf] %vm549_vm3, %v6870_v56  ;;  %v3003_v16 = vpack.c.b16 %v2943_v3, %v2943_v3  ;;  %v3002_v51 = vpack.c.b16 %v2942_v52, %v2942_v52 }
 0x311   : > { %3124 = vst.msk [vmem:[#allocation2 + $0x78] sm:$0xf] %vm549_vm3, %v6872_v25 }
 0x312   : > { %v2422_v19 = vsel %vm2384_vm9, %v2420_v8, %v2421_v36  ;;  %3470 = vrot.lane.b32.xlu0 %v6870_v56, %s5675_s25  ;;  %3466 = vrot.lane.b32.xlu2 %v3003_v16, %s5675_s25  ;;  %3123 = vst.msk [vmem:[#allocation2 + $0x74] sm:$0xf] %vm549_vm3, %v3003_v16 }
 0x313   : > { %v2511_v27 = vadd.f32 %v2422_v19, %v2318_v23  ;;  %3464 = vrot.lane.b32.xlu1 %v3002_v51, %s5675_s25  ;;  %3122 = vst.msk [vmem:[#allocation2 + $0x70] sm:$0xf] %vm549_vm3, %v3002_v51 }
 0x314   : > { %5310 = vmatmul.msk.bf16.gmra.mxu2 %vm1593_vm7, %v5653_v61  ;;  %v3187_v4 = vpop.permute.xlu0 %3186  ;;  %v3445_v50 = vpop.permute.xlu2 %3444  ;;  %v5597_v55 = vld [vmem:[#allocation2 + $0x18] sm:$0xff] }
 0x315   : > { %3369 = vst.msk [vmem:[#allocation2 + $0x24] sm:$0xf] %vm1027_vm5, %v3187_v4  ;;  %v2546_v28 = vadd.f32 %v6897_v48, %v2511_v27 }
 0x316   : > { %3613 = vst.msk [vmem:[#allocation2 + $0x24] sm:$0xf] %vm1272_vm6, %v3443_v14 }
 0x317   : > { %v2067_v44 = vpop.f32.mrf.mxu2  ;;  %v2578_v45 = vmax.f32 %v2546_v28, 0.0  ;;  %v5656_v28 = vld [vmem:[#allocation2 + $0xc8] sm:$0xff] }
 0x318   : > { %v2423_v33 = vrot.slane %v2067_v44, 2 }
 0x319   : > { %v2610_v34 = vpack.c.bf16 %v2578_v45, %v2578_v45 }
 0x31a   : > { %v2424_v32 = vsel %vm2384_vm9, %v2421_v36, %v2423_v33  ;;  %3468 = vrot.lane.b32.xlu2 %v6872_v25, %s5675_s25 }
 0x31b   : > { %v2512_v26 = vadd.f32 %v2424_v32, %v2319_v20  ;;  %3214 = vrot.lane.b32.xlu1 %v6815_v0, %s5674_s24  ;;  %v2674_v62 = vunpack.c.l.b16 %v2610_v34 }
 0x31c   : > { %v3189_v47 = vpop.permute.xlu0 %3188  ;;  %v3195_v42 = vpop.permute.xlu2 %3194 }
 0x31d   : > { %v2547_v41 = vadd.f32 %v6897_v48, %v2512_v26  ;;  %3370 = vst.msk [vmem:[#allocation2 + $0x28] sm:$0xf] %vm1027_vm5, %v3189_v47 }
 0x31e   : > { %3614 = vst.msk [vmem:[#allocation2 + $0x28] sm:$0xf] %vm1272_vm6, %v3445_v50  ;;  %5462 = vmatmul.msk.bf16.gmra.mxu3 %vm1593_vm7, %v5597_v55  ;;  %5494 = vmatmul.msk.bf16.gmra.mxu0 %vm1593_vm7, %v5597_v55 }
 0x31f   : > { %v2579_v63 = vmax.f32 %v2547_v41, 0.0  ;;  %3373 = vst.msk [vmem:[#allocation2 + $0x34] sm:$0xf] %vm1027_vm5, %v3195_v42  ;;  %v2069_v18 = vpop.f32.mrf.mxu2  ;;  %5526 = vmatmul.msk.bf16.gmra.mxu1 %vm1593_vm7, %v5597_v55 }
 0x321   : > { %v2611_v0 = vpack.c.bf16 %v2579_v63, %v2579_v63 }
 0x322   : > { %3218 = vrot.lane.b32.xlu2 %v3003_v16, %s5674_s24 }
 0x323   : > { %v2675_v57 = vunpack.c.l.b16 %v2611_v0  ;;  %3216 = vrot.lane.b32.xlu1 %v3002_v51, %s5674_s24 }
 0x324   : > { %5311 = vmatmul.msk.bf16.gmra.mxu2 %vm1593_vm7, %v5655_v29  ;;  %v3197_v11 = vpop.permute.xlu2 %3196  ;;  %v3447_v36 = vpop.permute.xlu0 %3446 }
 0x325   : > { %v2699_v22 = vpack.c.b16 %v2675_v57, %v2674_v62  ;;  %3374 = vst.msk [vmem:[#allocation2 + $0x38] sm:$0xf] %vm1027_vm5, %v3197_v11  ;;  %v3441_v39 = vpop.permute.xlu1 %3440 }
 0x326   : > { %3612 = vst.msk [vmem:[#allocation2 + $0x20] sm:$0xf] %vm1272_vm6, %v3441_v39 }
 0x327   : > { %v2071_v10 = vpop.f32.mrf.mxu2  ;;  %v2758_v14 = vshrl.u32 %v2699_v22, 16  ;;  %v2761_v35 = vshll.u32 %v2699_v22, 16 }
 0x328   : > { %v2425_v19 = vrot.slane %v2071_v10, 2 }
 0x329   : > { %v2760_v15 = vrot.slane %v2758_v14, 7 }
 0x32a   : > { %3220 = vrot.lane.b32.xlu2 %v6872_v25, %s5674_s24 }
 0x32b   : > { %v2875_v53 = vsel %vm5731_vm2, %v2760_v15, 0  ;;  %v2763_v38 = vor.u32 %v2761_v35, %v2760_v15 }
 0x32c   : > { %v2949_v37 = vunpack.c.h.b16 %v2875_v53  ;;  %v2948_v3 = vunpack.c.l.b16 %v2875_v53  ;;  %v3455_v62 = vpop.permute.xlu2 %3454 }
 0x32d   : > { %v3191_v52 = vpop.permute.xlu1 %3190  ;;  %v5598_v12 = vld [vmem:[#allocation2 + $0x20] sm:$0xff]  ;;  %v2859_v8 = vsel %vm5731_vm2, 0, %v2763_v38 }
 0x32e   : > { %3371 = vst.msk [vmem:[#allocation2 + $0x2c] sm:$0xf] %vm1027_vm5, %v3191_v52  ;;  %v6925_v16 = vpack.c.b16 %v2949_v37, %v2949_v37  ;;  %v2947_v51 = vunpack.c.h.b16 %v2859_v8  ;;  %v2946_v23 = vunpack.c.l.b16 %v2859_v8  ;;  %v3008_v43 = vpack.c.b16 %v2948_v3, %v2948_v3  ;;  %5463 = vmatmul.msk.bf16.gmra.mxu3 %vm1593_vm7, %v5598_v12  ;;  %5495 = vmatmul.msk.bf16.gmra.mxu0 %vm1593_vm7, %v5598_v12 }
 0x32f   : > { %3615 = vst.msk [vmem:[#allocation2 + $0x2c] sm:$0xf] %vm1272_vm6, %v3447_v36  ;;  %v2073_v25 = vpop.f32.mrf.mxu2  ;;  %5527 = vmatmul.msk.bf16.gmra.mxu1 %vm1593_vm7, %v5598_v12 }
 0x330   : > { %v2426_v27 = vrot.slane %v2073_v25, 2  ;;  %3129 = vst.msk [vmem:[#allocation2 + $0x8c] sm:$0xf] %vm549_vm3, %v6925_v16  ;;  %v3007_v61 = vpack.c.b16 %v2947_v51, %v2947_v51  ;;  %v3006_v4 = vpack.c.b16 %v2946_v23, %v2946_v23 }
 0x331   : > { %3128 = vst.msk [vmem:[#allocation2 + $0x88] sm:$0xf] %vm549_vm3, %v3008_v43 }
 0x332   : > { %v2427_v50 = vsel %vm2384_vm9, %v2425_v19, %v2426_v27  ;;  %3478 = vrot.lane.b32.xlu2 %v6925_v16, %s5675_s25  ;;  %3474 = vrot.lane.b32.xlu1 %v3007_v61, %s5675_s25  ;;  %3127 = vst.msk [vmem:[#allocation2 + $0x84] sm:$0xf] %vm549_vm3, %v3007_v61 }
 0x333   : > { %v2513_v2 = vadd.f32 %v2427_v50, %v6096_v6  ;;  %3472 = vrot.lane.b32.xlu0 %v3006_v4, %s5675_s25  ;;  %3126 = vst.msk [vmem:[#allocation2 + $0x80] sm:$0xf] %vm549_vm3, %v3006_v4 }
 0x334   : > { %5312 = vmatmul.msk.bf16.gmra.mxu2 %vm1593_vm7, %v5656_v28 }
 0x335   : > { %v3193_v44 = vpop.permute.xlu1 %3192  ;;  %v2548_v33 = vadd.f32 %v6897_v48, %v2513_v2  ;;  %v5658_v2 = vld [vmem:[#allocation2 + $0xd8] sm:$0xff] }
 0x336   : > { %3372 = vst.msk [vmem:[#allocation2 + $0x30] sm:$0xf] %vm1027_vm5, %v3193_v44  ;;  %v5599_v42 = vld [vmem:[#allocation2 + $0x28] sm:$0xff] }
 0x337   : > { %v2076_v20 = vpop.f32.mrf.mxu2  ;;  %v2580_v26 = vmax.f32 %v2548_v33, 0.0 }
 0x338   : > { %v2428_v32 = vrot.slane %v2076_v20, 2 }
 0x339   : > { %v2612_v41 = vpack.c.bf16 %v2580_v26, %v2580_v26 }
 0x33a   : > { %v2429_v45 = vsel %vm2384_vm9, %v2426_v27, %v2428_v32  ;;  %3476 = vrot.lane.b32.xlu1 %v3008_v43, %s5675_s25 }
 0x33b   : > { %v2514_v6 = vadd.f32 %v2429_v45, %v6108_v17  ;;  %3222 = vrot.lane.b32.xlu0 %v6870_v56, %s5674_s24  ;;  %v2676_v18 = vunpack.c.l.b16 %v2612_v41  ;;  %v5657_v56 = vld [vmem:[#allocation2 + $0xd0] sm:$0xff] }
 0x33d   : > { %v2549_v47 = vadd.f32 %v6897_v48, %v2514_v6 }
 0x33e   : > { %5464 = vmatmul.msk.bf16.gmra.mxu3 %vm1593_vm7, %v5599_v42  ;;  %5496 = vmatmul.msk.bf16.gmra.mxu0 %vm1593_vm7, %v5599_v42 }
 0x33f   : > { %v2581_v55 = vmax.f32 %v2549_v47, 0.0  ;;  %v2078_v34 = vpop.f32.mrf.mxu2  ;;  %5528 = vmatmul.msk.bf16.gmra.mxu1 %vm1593_vm7, %v5599_v42 }
 0x341   : > { %v2613_v63 = vpack.c.bf16 %v2581_v55, %v2581_v55 }
 0x342   : > { %3226 = vrot.lane.b32.xlu1 %v3007_v61, %s5674_s24 }
 0x343   : > { %v2677_v17 = vunpack.c.l.b16 %v2613_v63  ;;  %3224 = vrot.lane.b32.xlu0 %v3006_v4, %s5674_s24 }
 0x344   : > { %5313 = vmatmul.msk.bf16.gmra.mxu2 %vm1593_vm7, %v5657_v56  ;;  %v3451_v0 = vpop.permute.xlu1 %3450  ;;  %v5659_v56 = vld [vmem:[#allocation2 + $0xe0] sm:$0xff] }
 0x345   : > { %v2700_v57 = vpack.c.b16 %v2677_v17, %v2676_v18  ;;  %3617 = vst.msk [vmem:[#allocation2 + $0x34] sm:$0xf] %vm1272_vm6, %v3451_v0  ;;  %v3449_v29 = vpop.permute.xlu0 %3448 }
 0x346   : > { %3616 = vst.msk [vmem:[#allocation2 + $0x30] sm:$0xf] %vm1272_vm6, %v3449_v29 }
 0x347   : > { %v2080_v11 = vpop.f32.mrf.mxu2  ;;  %v2765_v22 = vshrl.u32 %v2700_v57, 16  ;;  %v2768_v10 = vshll.u32 %v2700_v57, 16 }
 0x348   : > { %v2430_v25 = vrot.slane %v2080_v11, 2 }
 0x349   : > { %v2767_v39 = vrot.slane %v2765_v22, 7 }
 0x34a   : > { %3228 = vrot.lane.b32.xlu1 %v3008_v43, %s5674_s24 }
 0x34b   : > { %v2770_v14 = vor.u32 %v2768_v10, %v2767_v39  ;;  %v2876_v15 = vsel %vm5731_vm2, %v2767_v39, 0 }
 0x34c   : > { %v3453_v35 = vpop.permute.xlu1 %3452  ;;  %v2953_v53 = vunpack.c.h.b16 %v2876_v15  ;;  %v2952_v38 = vunpack.c.l.b16 %v2876_v15 }
 0x34d   : > { %3618 = vst.msk [vmem:[#allocation2 + $0x38] sm:$0xf] %vm1272_vm6, %v3453_v35  ;;  %v3199_v37 = vpop.permute.xlu0 %3198  ;;  %v3457_v3 = vpop.permute.xlu2 %3456  ;;  %v5600_v52 = vld [vmem:[#allocation2 + $0x30] sm:$0xff]  ;;  %v2860_v12 = vsel %vm5731_vm2, 0, %v2770_v14 }
 0x34e   : > { %3375 = vst.msk [vmem:[#allocation2 + $0x3c] sm:$0xf] %vm1027_vm5, %v3199_v37  ;;  %v2950_v8 = vunpack.c.l.b16 %v2860_v12  ;;  %v6966_v36 = vpack.c.b16 %v2953_v53, %v2953_v53  ;;  %v2951_v51 = vunpack.c.h.b16 %v2860_v12  ;;  %v6968_v23 = vpack.c.b16 %v2952_v38, %v2952_v38  ;;  %5465 = vmatmul.msk.bf16.gmra.mxu3 %vm1593_vm7, %v5600_v52  ;;  %5497 = vmatmul.msk.bf16.gmra.mxu0 %vm1593_vm7, %v5600_v52 }
 0x34f   : > { %3619 = vst.msk [vmem:[#allocation2 + $0x3c] sm:$0xf] %vm1272_vm6, %v3455_v62  ;;  %v2082_v43 = vpop.f32.mrf.mxu2  ;;  %5529 = vmatmul.msk.bf16.gmra.mxu1 %vm1593_vm7, %v5600_v52 }
 0x350   : > { %v2431_v19 = vrot.slane %v2082_v43, 2  ;;  %v3010_v27 = vpack.c.b16 %v2950_v8, %v2950_v8  ;;  %3133 = vst.msk [vmem:[#allocation2 + $0x9c] sm:$0xf] %vm549_vm3, %v6966_v36  ;;  %v3011_v61 = vpack.c.b16 %v2951_v51, %v2951_v51 }
 0x351   : > { %3132 = vst.msk [vmem:[#allocation2 + $0x98] sm:$0xf] %vm549_vm3, %v6968_v23 }
 0x352   : > { %v2432_v4 = vsel %vm2384_vm9, %v2430_v25, %v2431_v19  ;;  %3480 = vrot.lane.b32.xlu2 %v3010_v27, %s5675_s25  ;;  %3130 = vst.msk [vmem:[#allocation2 + $0x90] sm:$0xf] %vm549_vm3, %v3010_v27  ;;  %3486 = vrot.lane.b32.xlu1 %v6966_v36, %s5675_s25 }
 0x353   : > { %v2515_v50 = vadd.f32 %v2432_v4, %v6141_v58  ;;  %3482 = vrot.lane.b32.xlu0 %v3011_v61, %s5675_s25  ;;  %3131 = vst.msk [vmem:[#allocation2 + $0x94] sm:$0xf] %vm549_vm3, %v3011_v61 }
 0x354   : > { %5314 = vmatmul.msk.bf16.gmra.mxu2 %vm1593_vm7, %v5658_v2  ;;  %v3203_v28 = vpop.permute.xlu1 %3202 }
 0x355   : > { %3377 = vst.msk [vmem:[#allocation2 + $0x44] sm:$0xf] %vm1027_vm5, %v3203_v28  ;;  %v3201_v44 = vpop.permute.xlu0 %3200  ;;  %v3207_v33 = vpop.permute.xlu2 %3206  ;;  %v2550_v20 = vadd.f32 %v6897_v48, %v2515_v50 }
 0x356   : > { %3376 = vst.msk [vmem:[#allocation2 + $0x40] sm:$0xf] %vm1027_vm5, %v3201_v44  ;;  %v5601_v55 = vld [vmem:[#allocation2 + $0x38] sm:$0xff]  ;;  %v5660_v44 = vld [vmem:[#allocation2 + $0xe8] sm:$0xff] }
 0x357   : > { %3620 = vst.msk [vmem:[#allocation2 + $0x40] sm:$0xf] %vm1272_vm6, %v3457_v3  ;;  %v2085_v32 = vpop.f32.mrf.mxu2  ;;  %v2582_v26 = vmax.f32 %v2550_v20, 0.0 }
 0x358   : > { %3379 = vst.msk [vmem:[#allocation2 + $0x4c] sm:$0xf] %vm1027_vm5, %v3207_v33  ;;  %v2433_v58 = vrot.slane %v2085_v32, 2 }
 0x359   : > { %v2614_v34 = vpack.c.bf16 %v2582_v26, %v2582_v26 }
 0x35a   : > { %v2434_v45 = vsel %vm2384_vm9, %v2431_v19, %v2433_v58  ;;  %3230 = vrot.lane.b32.xlu2 %v6925_v16, %s5674_s24 }
 0x35b   : > { %v2516_v6 = vadd.f32 %v2434_v45, %v6163_v5  ;;  %3484 = vrot.lane.b32.xlu0 %v6968_v23, %s5675_s25  ;;  %v2678_v16 = vunpack.c.l.b16 %v2614_v34 }
 0x35c   : > { %v3205_v47 = vpop.permute.xlu1 %3204 }
 0x35d   : > { %v2551_v42 = vadd.f32 %v6897_v48, %v2516_v6  ;;  %3378 = vst.msk [vmem:[#allocation2 + $0x48] sm:$0xf] %vm1027_vm5, %v3205_v47  ;;  %v3209_v41 = vpop.permute.xlu2 %3208 }
 0x35e   : > { %3380 = vst.msk [vmem:[#allocation2 + $0x50] sm:$0xf] %vm1027_vm5, %v3209_v41  ;;  %5466 = vmatmul.msk.bf16.gmra.mxu3 %vm1593_vm7, %v5601_v55  ;;  %5498 = vmatmul.msk.bf16.gmra.mxu0 %vm1593_vm7, %v5601_v55 }
 0x35f   : > { %v2583_v63 = vmax.f32 %v2551_v42, 0.0  ;;  %v2087_v18 = vpop.f32.mrf.mxu2  ;;  %5530 = vmatmul.msk.bf16.gmra.mxu1 %vm1593_vm7, %v5601_v55 }
 0x361   : > { %v2615_v5 = vpack.c.bf16 %v2583_v63, %v2583_v63  ;;  %v7051_v63 = vld [vmem:[%s7626_s4] ss:$0 sm:$0xff] }
 0x362   : > { %3232 = vrot.lane.b32.xlu2 %v3010_v27, %s5674_s24 }
 0x363   : > { %v2679_v17 = vunpack.c.l.b16 %v2615_v5  ;;  %3234 = vrot.lane.b32.xlu0 %v3011_v61, %s5674_s24 }
 0x364   : > { %5315 = vmatmul.msk.bf16.gmra.mxu2 %vm1593_vm7, %v5659_v56  ;;  %v3463_v0 = vpop.permute.xlu1 %3462  ;;  %v3459_v62 = vpop.permute.xlu0 %3458 }
 0x365   : > { %v2701_v57 = vpack.c.b16 %v2679_v17, %v2678_v16  ;;  %3623 = vst.msk [vmem:[#allocation2 + $0x4c] sm:$0xf] %vm1272_vm6, %v3463_v0 }
 0x366   : > { %3621 = vst.msk [vmem:[#allocation2 + $0x44] sm:$0xf] %vm1272_vm6, %v3459_v62  ;;  %v4890_v62 = vld [vmem:[%s5723_s23] sm:$0xff] }
 0x367   : > { %v2089_v29 = vpop.f32.mrf.mxu2  ;;  %v2772_v11 = vshrl.u32 %v2701_v57, 16  ;;  %v2775_v39 = vshll.u32 %v2701_v57, 16 }
 0x368   : > { %v2435_v43 = vrot.slane %v2089_v29, 2 }
 0x369   : > { %v2774_v22 = vrot.slane %v2772_v11, 7 }
 0x36b   : > { %3236 = vrot.lane.b32.xlu0 %v6968_v23, %s5674_s24  ;;  %v2777_v10 = vor.u32 %v2775_v39, %v2774_v22  ;;  %v2877_v14 = vsel %vm5731_vm2, %v2774_v22, 0  ;;  %v4174_v3 = vpop.f32.mrf.mxu0 }
 0x36c   : > { %v3461_v15 = vpop.permute.xlu0 %3460  ;;  %v3467_v35 = vpop.permute.xlu2 %3466  ;;  %v2957_v53 = vunpack.c.h.b16 %v2877_v14  ;;  %v2956_v38 = vunpack.c.l.b16 %v2877_v14  ;;  %v4519_v45 = vrot.slane %v4174_v3, 1 }
 0x36d   : > { %v4327_v37 = vpop.f32.mrf.mxu1  ;;  %3622 = vst.msk [vmem:[#allocation2 + $0x48] sm:$0xf] %vm1272_vm6, %v3461_v15  ;;  %v5602_v52 = vld [vmem:[#allocation2 + $0x40] sm:$0xff]  ;;  %v2861_v12 = vsel %vm5731_vm2, 0, %v2777_v10 }
 0x36e   : > { %v2955_v8 = vunpack.c.h.b16 %v2861_v12  ;;  %v2954_v51 = vunpack.c.l.b16 %v2861_v12  ;;  %5467 = vmatmul.msk.bf16.gmra.mxu3 %vm1593_vm7, %v5602_v52  ;;  %5499 = vmatmul.msk.bf16.gmra.mxu0 %vm1593_vm7, %v5602_v52  ;;  %v7018_v25 = vpack.c.b16 %v2957_v53, %v2957_v53  ;;  %v7025_v4 = vpack.c.b16 %v2956_v38, %v2956_v38 }
 0x36f   : > { %v2091_v23 = vpop.f32.mrf.mxu2  ;;  %5531 = vmatmul.msk.bf16.gmra.mxu1 %vm1593_vm7, %v5602_v52  ;;  %v4711_v42 = vrot.slane %v4327_v37, 2 }
 0x370   : > { %v2436_v19 = vrot.slane %v2091_v23, 2  ;;  %v7021_v27 = vpack.c.b16 %v2955_v8, %v2955_v8  ;;  %v7023_v61 = vpack.c.b16 %v2954_v51, %v2954_v51  ;;  %3137 = vst.msk [vmem:[#allocation2 + $0xac] sm:$0xf] %vm549_vm3, %v7018_v25 }
 0x371   : > { %v4037_v2 = vpop.f32.mrf.mxu3  ;;  %3136 = vst.msk [vmem:[#allocation2 + $0xa8] sm:$0xf] %vm549_vm3, %v7025_v4 }
 0x372   : > { %v2437_v50 = vsel %vm2384_vm9, %v2435_v43, %v2436_v19  ;;  %3490 = vrot.lane.b32.xlu2 %v7021_v27, %s5675_s25  ;;  %3135 = vst.msk [vmem:[#allocation2 + $0xa4] sm:$0xf] %vm549_vm3, %v7021_v27  ;;  %3488 = vrot.lane.b32.xlu1 %v7023_v61, %s5675_s25 }
 0x373   : > { %v2517_v28 = vadd.f32 %v2437_v50, %v6218_v59  ;;  %3134 = vst.msk [vmem:[#allocation2 + $0xa0] sm:$0xf] %vm549_vm3, %v7023_v61  ;;  %3494 = vrot.lane.b32.xlu0 %v7018_v25, %s5675_s25  ;;  %v4176_v58 = vpop.f32.mrf.mxu0  ;;  %v4891_v50 = vld [vmem:[%s5723_s23 + $0x8] sm:$0xff] }
 0x374   : > { %5316 = vmatmul.msk.bf16.gmra.mxu2 %vm1593_vm7, %v5660_v44  ;;  %v3211_v33 = vpop.permute.xlu0 %3210  ;;  %v3469_v20 = vpop.permute.xlu2 %3468  ;;  %v4520_v26 = vrot.slane %v4176_v58, 1  ;;  %v5603_v14 = vld [vmem:[#allocation2 + $0x48] sm:$0xff] }
 0x375   : > { %v4329_v32 = vpop.f32.mrf.mxu1  ;;  %3381 = vst.msk [vmem:[#allocation2 + $0x54] sm:$0xf] %vm1027_vm5, %v3211_v33  ;;  %v2552_v6 = vadd.f32 %v6897_v48, %v2517_v28 }
 0x376   : > { %v4712_v59 = vrot.slane %v4329_v32, 2  ;;  %3625 = vst.msk [vmem:[#allocation2 + $0x54] sm:$0xf] %vm1272_vm6, %v3467_v35  ;;  %v4521_v41 = vsel %vm2191_vm8, %v4519_v45, %v4520_v26 }
 0x377   : > { %v2094_v47 = vpop.f32.mrf.mxu2  ;;  %v4631_v34 = vadd.f32 %v4521_v41, %v4037_v2  ;;  %v2584_v17 = vmax.f32 %v2552_v6, 0.0  ;;  %v5661_v2 = vld [vmem:[#allocation2 + $0xf0] sm:$0xff] }
 0x378   : > { %v2438_v55 = vrot.slane %v2094_v47, 2  ;;  %v4713_v18 = vsel %vm2384_vm9, %v4711_v42, %v4712_v59 }
 0x379   : > { %v4039_v16 = vpop.f32.mrf.mxu3  ;;  %v4823_v56 = vadd.f32 %v4713_v18, %v4631_v34  ;;  %v2616_v35 = vpack.c.bf16 %v2584_v17, %v2584_v17 }
 0x37a   : > { %v2439_v5 = vsel %vm2384_vm9, %v2436_v19, %v2438_v55  ;;  %3492 = vrot.lane.b32.xlu2 %v7025_v4, %s5675_s25  ;;  %3238 = vrot.lane.b32.xlu1 %v6966_v36, %s5674_s24 }
 0x37b   : > { %v2518_v0 = vadd.f32 %v2439_v5, %v6235_v9  ;;  %v4858_v11 = vadd.f32 %v7051_v63, %v4823_v56  ;;  %v4179_v10 = vpop.f32.mrf.mxu0  ;;  %v2680_v43 = vunpack.c.l.b16 %v2616_v35 }
 0x37c   : > { %v3213_v57 = vpop.permute.xlu0 %3212  ;;  %v3219_v29 = vpop.permute.xlu2 %3218  ;;  %v4522_v36 = vrot.slane %v4179_v10, 1 }
 0x37d   : > { %v2553_v22 = vadd.f32 %v6897_v48, %v2518_v0  ;;  %v4332_v39 = vpop.f32.mrf.mxu1  ;;  %3382 = vst.msk [vmem:[#allocation2 + $0x58] sm:$0xf] %vm1027_vm5, %v3213_v57  ;;  %v4922_v53 = vadd.f32 %v4890_v62, %v4858_v11 }
 0x37e   : > { %v4714_v15 = vrot.slane %v4332_v39, 2  ;;  %3626 = vst.msk [vmem:[#allocation2 + $0x58] sm:$0xf] %vm1272_vm6, %v3469_v20  ;;  %5468 = vmatmul.msk.bf16.gmra.mxu3 %vm1593_vm7, %v5603_v14  ;;  %5500 = vmatmul.msk.bf16.gmra.mxu0 %vm1593_vm7, %v5603_v14  ;;  %v4523_v37 = vsel %vm2191_vm8, %v4520_v26, %v4522_v36 }
 0x37f   : > { %v2585_v9 = vmax.f32 %v2553_v22, 0.0  ;;  %3385 = vst.msk [vmem:[#allocation2 + $0x64] sm:$0xf] %vm1027_vm5, %v3219_v29  ;;  %v2096_v38 = vpop.f32.mrf.mxu2  ;;  %5532 = vmatmul.msk.bf16.gmra.mxu1 %vm1593_vm7, %v5603_v14  ;;  %v4954_v3 = vmax.f32 %v4922_v53, 0.0  ;;  %v4632_v12 = vadd.f32 %v4523_v37, %v4039_v16  ;;  %v5662_v53 = vld [vmem:[#allocation2 + $0xf8] sm:$0xff] }
 0x380   : > { %v4715_v8 = vsel %vm2384_vm9, %v4712_v59, %v4714_v15 }
 0x381   : > { %v2617_v52 = vpack.c.bf16 %v2585_v9, %v2585_v9  ;;  %v4042_v51 = vpop.f32.mrf.mxu3  ;;  %4987 = vst.msk [vmem:[%s7073_s28] sm:$0xff] %vm4986_vm10, %v4954_v3  ;;  %v4824_v19 = vadd.f32 %v4715_v8, %v4632_v12 }
 0x382   : > { %3242 = vrot.lane.b32.xlu2 %v7021_v27, %s5674_s24  ;;  %3240 = vrot.lane.b32.xlu1 %v7023_v61, %s5674_s24 }
 0x383   : > { %v2681_v23 = vunpack.c.l.b16 %v2617_v52  ;;  %v4859_v33 = vadd.f32 %v7051_v63, %v4824_v19  ;;  %v4181_v61 = vpop.f32.mrf.mxu0 }
 0x384   : > { %5317 = vmatmul.msk.bf16.gmra.mxu2 %vm1593_vm7, %v5661_v2  ;;  %v3221_v28 = vpop.permute.xlu2 %3220  ;;  %v3471_v56 = vpop.permute.xlu0 %3470 }
 0x385   : > { %v2702_v44 = vpack.c.b16 %v2681_v23, %v2680_v43  ;;  %v4334_v20 = vpop.f32.mrf.mxu1  ;;  %3386 = vst.msk [vmem:[#allocation2 + $0x68] sm:$0xf] %vm1027_vm5, %v3221_v28  ;;  %v3465_v27 = vpop.permute.xlu1 %3464  ;;  %v4923_v32 = vadd.f32 %v4891_v50, %v4859_v33 }
 0x386   : > { %3624 = vst.msk [vmem:[#allocation2 + $0x50] sm:$0xf] %vm1272_vm6, %v3465_v27  ;;  %v4892_v27 = vld [vmem:[%s5723_s23 + $0x10] sm:$0xff] }
 0x387   : > { %v2098_v58 = vpop.f32.mrf.mxu2  ;;  %v2779_v45 = vshrl.u32 %v2702_v44, 16  ;;  %v4955_v59 = vmax.f32 %v4923_v32, 0.0  ;;  %v2782_v6 = vshll.u32 %v2702_v44, 16 }
 0x388   : > { %v2440_v22 = vrot.slane %v2098_v58, 2 }
 0x389   : > { %v2781_v26 = vrot.slane %v2779_v45, 7  ;;  %v4043_v47 = vpop.f32.mrf.mxu3  ;;  %4988 = vst.msk [vmem:[%s7073_s28 + $0x8] sm:$0xff] %vm4986_vm10, %v4955_v59 }
 0x38a   : > { %3244 = vrot.lane.b32.xlu2 %v7025_v4, %s5674_s24 }
 0x38b   : > { %v2878_v42 = vsel %vm5731_vm2, %v2781_v26, 0  ;;  %v2784_v41 = vor.u32 %v2782_v6, %v2781_v26  ;;  %v4183_v0 = vpop.f32.mrf.mxu0 }
 0x38c   : > { %v2961_v55 = vunpack.c.h.b16 %v2878_v42  ;;  %v2960_v34 = vunpack.c.l.b16 %v2878_v42  ;;  %v4524_v3 = vrot.slane %v4183_v0, 1  ;;  %v3479_v0 = vpop.permute.xlu2 %3478 }
 0x38d   : > { %v4336_v18 = vpop.f32.mrf.mxu1  ;;  %v3215_v5 = vpop.permute.xlu1 %3214  ;;  %v5604_v16 = vld [vmem:[#allocation2 + $0x50] sm:$0xff]  ;;  %v2862_v17 = vsel %vm5731_vm2, 0, %v2784_v41 }
 0x38e   : > { %3383 = vst.msk [vmem:[#allocation2 + $0x5c] sm:$0xf] %vm1027_vm5, %v3215_v5  ;;  %v7098_v62 = vpack.c.b16 %v2961_v55, %v2961_v55  ;;  %v2959_v4 = vunpack.c.h.b16 %v2862_v17  ;;  %v2958_v57 = vunpack.c.l.b16 %v2862_v17  ;;  %5469 = vmatmul.msk.bf16.gmra.mxu3 %vm1593_vm7, %v5604_v16  ;;  %5501 = vmatmul.msk.bf16.gmra.mxu0 %vm1593_vm7, %v5604_v16  ;;  %v7103_v11 = vpack.c.b16 %v2960_v34, %v2960_v34 }
 0x38f   : > { %3627 = vst.msk [vmem:[#allocation2 + $0x5c] sm:$0xf] %vm1272_vm6, %v3471_v56  ;;  %v2100_v29 = vpop.f32.mrf.mxu2  ;;  %5533 = vmatmul.msk.bf16.gmra.mxu1 %vm1593_vm7, %v5604_v16  ;;  %v4716_v43 = vrot.slane %v4336_v18, 2 }
 0x390   : > { %v2441_v39 = vrot.slane %v2100_v29, 2  ;;  %3141 = vst.msk [vmem:[#allocation2 + $0xbc] sm:$0xf] %vm549_vm3, %v7098_v62  ;;  %v3019_v10 = vpack.c.b16 %v2959_v4, %v2959_v4  ;;  %v3018_v14 = vpack.c.b16 %v2958_v57, %v2958_v57 }
 0x391   : > { %3140 = vst.msk [vmem:[#allocation2 + $0xb8] sm:$0xf] %vm549_vm3, %v7103_v11  ;;  %v4045_v36 = vpop.f32.mrf.mxu3 }
 0x392   : > { %v2442_v15 = vsel %vm2384_vm9, %v2440_v22, %v2441_v39  ;;  %3502 = vrot.lane.b32.xlu2 %v7098_v62, %s5675_s25  ;;  %3498 = vrot.lane.b32.xlu1 %v3019_v10, %s5675_s25  ;;  %3139 = vst.msk [vmem:[#allocation2 + $0xb4] sm:$0xf] %vm549_vm3, %v3019_v10  ;;  %v4893_v22 = vld [vmem:[%s5723_s23 + $0x18] sm:$0xff] }
 0x393   : > { %v2519_v35 = vadd.f32 %v2442_v15, %v6279_v60  ;;  %3496 = vrot.lane.b32.xlu0 %v3018_v14, %s5675_s25  ;;  %3138 = vst.msk [vmem:[#allocation2 + $0xb0] sm:$0xf] %vm549_vm3, %v3018_v14  ;;  %v4185_v37 = vpop.f32.mrf.mxu0 }
 0x394   : > { %5318 = vmatmul.msk.bf16.gmra.mxu2 %vm1593_vm7, %v5662_v53  ;;  %v4525_v8 = vrot.slane %v4185_v37, 1 }
 0x395   : > { %v4338_v9 = vpop.f32.mrf.mxu1  ;;  %v3217_v38 = vpop.permute.xlu1 %3216  ;;  %v2554_v52 = vadd.f32 %v6897_v48, %v2519_v35 }
 0x396   : > { %3384 = vst.msk [vmem:[#allocation2 + $0x60] sm:$0xf] %vm1027_vm5, %v3217_v38  ;;  %v4717_v12 = vrot.slane %v4338_v9, 2  ;;  %v4526_v23 = vsel %vm2191_vm8, %v4524_v3, %v4525_v8  ;;  %v5605_v58 = vld [vmem:[#allocation2 + $0x58] sm:$0xff] }
 0x397   : > { %v2103_v51 = vpop.f32.mrf.mxu2  ;;  %v4633_v19 = vadd.f32 %v4526_v23, %v4045_v36  ;;  %v2586_v28 = vmax.f32 %v2554_v52, 0.0 }
 0x398   : > { %v2443_v60 = vrot.slane %v2103_v51, 2  ;;  %v4718_v44 = vsel %vm2384_vm9, %v4716_v43, %v4717_v12 }
 0x399   : > { %v4047_v2 = vpop.f32.mrf.mxu3  ;;  %v4825_v20 = vadd.f32 %v4718_v44, %v4633_v19  ;;  %v2618_v26 = vpack.c.bf16 %v2586_v28, %v2586_v28 }
 0x39a   : > { %v2444_v50 = vsel %vm2384_vm9, %v2441_v39, %v2443_v60  ;;  %3500 = vrot.lane.b32.xlu1 %v7103_v11, %s5675_s25 }
 0x39b   : > { %v2520_v33 = vadd.f32 %v2444_v50, %v6296_v13  ;;  %3246 = vrot.lane.b32.xlu0 %v7018_v25, %s5674_s24  ;;  %v4860_v45 = vadd.f32 %v7051_v63, %v4825_v20  ;;  %v4188_v59 = vpop.f32.mrf.mxu0  ;;  %v2682_v16 = vunpack.c.l.b16 %v2618_v26 }
 0x39c   : > { %v4527_v47 = vrot.slane %v4188_v59, 1 }
 0x39d   : > { %v2555_v61 = vadd.f32 %v6897_v48, %v2520_v33  ;;  %v4341_v32 = vpop.f32.mrf.mxu1  ;;  %v4924_v13 = vadd.f32 %v4892_v27, %v4860_v45 }
 0x39e   : > { %v4719_v42 = vrot.slane %v4341_v32, 2  ;;  %5470 = vmatmul.msk.bf16.gmra.mxu3 %vm1593_vm7, %v5605_v58  ;;  %5502 = vmatmul.msk.bf16.gmra.mxu0 %vm1593_vm7, %v5605_v58  ;;  %v4528_v55 = vsel %vm2191_vm8, %v4525_v8, %v4527_v47 }
 0x39f   : > { %v2587_v6 = vmax.f32 %v2555_v61, 0.0  ;;  %v2105_v41 = vpop.f32.mrf.mxu2  ;;  %5534 = vmatmul.msk.bf16.gmra.mxu1 %vm1593_vm7, %v5605_v58  ;;  %v4956_v34 = vmax.f32 %v4924_v13, 0.0  ;;  %v4634_v18 = vadd.f32 %v4528_v55, %v4047_v2 }
 0x3a0   : > { %v4720_v56 = vsel %vm2384_vm9, %v4717_v12, %v4719_v42 }
 0x3a1   : > { %v2619_v25 = vpack.c.bf16 %v2587_v6, %v2587_v6  ;;  %v4050_v5 = vpop.f32.mrf.mxu3  ;;  %4989 = vst.msk [vmem:[%s7073_s28 + $0x10] sm:$0xff] %vm4986_vm10, %v4956_v34  ;;  %v4826_v4 = vadd.f32 %v4720_v56, %v4634_v18 }
 0x3a2   : > { %3250 = vrot.lane.b32.xlu1 %v3019_v10, %s5674_s24 }
 0x3a3   : > { %v2683_v17 = vunpack.c.l.b16 %v2619_v25  ;;  %3248 = vrot.lane.b32.xlu0 %v3018_v14, %s5674_s24  ;;  %v4861_v10 = vadd.f32 %v7051_v63, %v4826_v4  ;;  %v4190_v36 = vpop.f32.mrf.mxu0 }
 0x3a4   : > { %v3475_v57 = vpop.permute.xlu1 %3474 }
 0x3a5   : > { %v2703_v29 = vpack.c.b16 %v2683_v17, %v2682_v16  ;;  %v4343_v39 = vpop.f32.mrf.mxu1  ;;  %3629 = vst.msk [vmem:[#allocation2 + $0x64] sm:$0xf] %vm1272_vm6, %v3475_v57  ;;  %v3473_v15 = vpop.permute.xlu0 %3472  ;;  %v4925_v14 = vadd.f32 %v4893_v22, %v4861_v10 }
 0x3a6   : > { %3628 = vst.msk [vmem:[#allocation2 + $0x60] sm:$0xf] %vm1272_vm6, %v3473_v15 }
 0x3a7   : > { %v2107_v35 = vpop.f32.mrf.mxu2  ;;  %v2786_v53 = vshrl.u32 %v2703_v29, 16  ;;  %v2789_v38 = vshll.u32 %v2703_v29, 16  ;;  %v4957_v37 = vmax.f32 %v4925_v14, 0.0 }
 0x3a8   : > { %v2445_v61 = vrot.slane %v2107_v35, 2  ;;  %v4894_v35 = vld [vmem:[%s5723_s23 + $0x20] sm:$0xff] }
 0x3a9   : > { %v2788_v9 = vrot.slane %v2786_v53, 7  ;;  %v4051_v3 = vpop.f32.mrf.mxu3  ;;  %4990 = vst.msk [vmem:[%s7073_s28 + $0x18] sm:$0xff] %vm4986_vm10, %v4957_v37 }
 0x3aa   : > { %3252 = vrot.lane.b32.xlu1 %v7103_v11, %s5674_s24 }
 0x3ab   : > { %v2791_v52 = vor.u32 %v2789_v38, %v2788_v9  ;;  %v2879_v12 = vsel %vm5731_vm2, %v2788_v9, 0  ;;  %v4192_v11 = vpop.f32.mrf.mxu0 }
 0x3ac   : > { %v3481_v8 = vpop.permute.xlu2 %3480  ;;  %v3477_v51 = vpop.permute.xlu1 %3476  ;;  %v2965_v60 = vunpack.c.h.b16 %v2879_v12  ;;  %v2964_v43 = vunpack.c.l.b16 %v2879_v12  ;;  %v4529_v55 = vrot.slane %v4192_v11, 1 }
 0x3ad   : > { %v4345_v23 = vpop.f32.mrf.mxu1  ;;  %3630 = vst.msk [vmem:[#allocation2 + $0x68] sm:$0xf] %vm1272_vm6, %v3477_v51  ;;  %v3223_v19 = vpop.permute.xlu0 %3222  ;;  %v5606_v50 = vld [vmem:[#allocation2 + $0x60] sm:$0xff]  ;;  %v2863_v2 = vsel %vm5731_vm2, 0, %v2791_v52 }
 0x3ae   : > { %3387 = vst.msk [vmem:[#allocation2 + $0x6c] sm:$0xf] %vm1027_vm5, %v3223_v19  ;;  %v2962_v28 = vunpack.c.l.b16 %v2863_v2  ;;  %v7155_v44 = vpack.c.b16 %v2965_v60, %v2965_v60  ;;  %v2963_v33 = vunpack.c.h.b16 %v2863_v2  ;;  %5471 = vmatmul.msk.bf16.gmra.mxu3 %vm1593_vm7, %v5606_v50  ;;  %5503 = vmatmul.msk.bf16.gmra.mxu0 %vm1593_vm7, %v5606_v50  ;;  %v7160_v27 = vpack.c.b16 %v2964_v43, %v2964_v43 }
 0x3af   : > { %3631 = vst.msk [vmem:[#allocation2 + $0x6c] sm:$0xf] %vm1272_vm6, %v3479_v0  ;;  %v2109_v20 = vpop.f32.mrf.mxu2  ;;  %5535 = vmatmul.msk.bf16.gmra.mxu1 %vm1593_vm7, %v5606_v50  ;;  %v4721_v17 = vrot.slane %v4345_v23, 2 }
 0x3b0   : > { %v2446_v32 = vrot.slane %v2109_v20, 2  ;;  %v3022_v58 = vpack.c.b16 %v2962_v28, %v2962_v28  ;;  %3145 = vst.msk [vmem:[#allocation2 + $0xcc] sm:$0xf] %vm549_vm3, %v7155_v44  ;;  %v7165_v45 = vpack.c.b16 %v2963_v33, %v2963_v33  ;;  %v4895_v20 = vld [vmem:[%s5723_s23 + $0x28] sm:$0xff] }
 0x3b1   : > { %3144 = vst.msk [vmem:[#allocation2 + $0xc8] sm:$0xf] %vm549_vm3, %v7160_v27  ;;  %v4053_v26 = vpop.f32.mrf.mxu3 }
 0x3b2   : > { %v2447_v59 = vsel %vm2384_vm9, %v2445_v61, %v2446_v32  ;;  %3504 = vrot.lane.b32.xlu2 %v3022_v58, %s5675_s25  ;;  %3142 = vst.msk [vmem:[#allocation2 + $0xc0] sm:$0xf] %vm549_vm3, %v3022_v58  ;;  %3510 = vrot.lane.b32.xlu1 %v7155_v44, %s5675_s25 }
 0x3b3   : > { %v2521_v6 = vadd.f32 %v2447_v59, %v6328_v40  ;;  %3506 = vrot.lane.b32.xlu0 %v7165_v45, %s5675_s25  ;;  %3143 = vst.msk [vmem:[#allocation2 + $0xc4] sm:$0xf] %vm549_vm3, %v7165_v45  ;;  %v4194_v25 = vpop.f32.mrf.mxu0 }
 0x3b4   : > { %v3231_v47 = vpop.permute.xlu2 %3230  ;;  %v3227_v42 = vpop.permute.xlu1 %3226  ;;  %v4530_v40 = vrot.slane %v4194_v25, 1 }
 0x3b5   : > { %v4347_v41 = vpop.f32.mrf.mxu1  ;;  %3391 = vst.msk [vmem:[#allocation2 + $0x7c] sm:$0xf] %vm1027_vm5, %v3231_v47  ;;  %v3225_v13 = vpop.permute.xlu0 %3224  ;;  %v2556_v34 = vadd.f32 %v6897_v48, %v2521_v6 }
 0x3b6   : > { %3389 = vst.msk [vmem:[#allocation2 + $0x74] sm:$0xf] %vm1027_vm5, %v3227_v42  ;;  %v4722_v18 = vrot.slane %v4347_v41, 2  ;;  %v4531_v56 = vsel %vm2191_vm8, %v4529_v55, %v4530_v40  ;;  %v5607_v9 = vld [vmem:[#allocation2 + $0x68] sm:$0xff] }
 0x3b7   : > { %3388 = vst.msk [vmem:[#allocation2 + $0x70] sm:$0xf] %vm1027_vm5, %v3225_v13  ;;  %v2112_v5 = vpop.f32.mrf.mxu2  ;;  %v4635_v0 = vadd.f32 %v4531_v56, %v4053_v26  ;;  %v2588_v29 = vmax.f32 %v2556_v34, 0.0 }
 0x3b8   : > { %3632 = vst.msk [vmem:[#allocation2 + $0x70] sm:$0xf] %vm1272_vm6, %v3481_v8  ;;  %v2448_v16 = vrot.slane %v2112_v5, 2  ;;  %v4723_v22 = vsel %vm2384_vm9, %v4721_v17, %v4722_v18 }
 0x3b9   : > { %v4055_v57 = vpop.f32.mrf.mxu3  ;;  %v4827_v15 = vadd.f32 %v4723_v22, %v4635_v0  ;;  %v2620_v37 = vpack.c.bf16 %v2588_v29, %v2588_v29 }
 0x3ba   : > { %v2449_v4 = vsel %vm2384_vm9, %v2446_v32, %v2448_v16  ;;  %3254 = vrot.lane.b32.xlu2 %v7098_v62, %s5674_s24 }
 0x3bb   : > { %v2522_v39 = vadd.f32 %v2449_v4, %v6343_v49  ;;  %3508 = vrot.lane.b32.xlu0 %v7160_v27, %s5675_s25  ;;  %v4862_v62 = vadd.f32 %v7051_v63, %v4827_v15  ;;  %v4197_v38 = vpop.f32.mrf.mxu0  ;;  %v2684_v19 = vunpack.c.l.b16 %v2620_v37 }
 0x3bc   : > { %v3233_v10 = vpop.permute.xlu2 %3232  ;;  %v3229_v36 = vpop.permute.xlu1 %3228  ;;  %v4532_v52 = vrot.slane %v4197_v38, 1 }
 0x3bd   : > { %v2557_v53 = vadd.f32 %v6897_v48, %v2522_v39  ;;  %v4350_v14 = vpop.f32.mrf.mxu1  ;;  %3392 = vst.msk [vmem:[#allocation2 + $0x80] sm:$0xf] %vm1027_vm5, %v3233_v10  ;;  %v4926_v48 = vadd.f32 %v4894_v35, %v4862_v62 }
 0x3be   : > { %3390 = vst.msk [vmem:[#allocation2 + $0x78] sm:$0xf] %vm1027_vm5, %v3229_v36  ;;  %v4724_v3 = vrot.slane %v4350_v14, 2  ;;  %5472 = vmatmul.msk.bf16.gmra.mxu3 %vm1593_vm7, %v5607_v9  ;;  %5504 = vmatmul.msk.bf16.gmra.mxu0 %vm1593_vm7, %v5607_v9  ;;  %v4533_v51 = vsel %vm2191_vm8, %v4530_v40, %v4532_v52 }
 0x3bf   : > { %v2589_v49 = vmax.f32 %v2557_v53, 0.0  ;;  %v2114_v12 = vpop.f32.mrf.mxu2  ;;  %5536 = vmatmul.msk.bf16.gmra.mxu1 %vm1593_vm7, %v5607_v9  ;;  %v4958_v60 = vmax.f32 %v4926_v48, 0.0  ;;  %v4636_v43 = vadd.f32 %v4533_v51, %v4055_v57 }
 0x3c0   : > { %v4725_v2 = vsel %vm2384_vm9, %v4722_v18, %v4724_v3  ;;  %v7243_v3 = vld [vmem:[%s7624_s2] ss:$0 sm:$0xff] }
 0x3c1   : > { %v2621_v8 = vpack.c.bf16 %v2589_v49, %v2589_v49  ;;  %v4058_v23 = vpop.f32.mrf.mxu3  ;;  %4991 = vst.msk [vmem:[%s7073_s28 + $0x20] sm:$0xff] %vm4986_vm10, %v4958_v60  ;;  %v4828_v11 = vadd.f32 %v4725_v2, %v4636_v43 }
 0x3c2   : > { %3256 = vrot.lane.b32.xlu2 %v3022_v58, %s5674_s24 }
 0x3c3   : > { %v2685_v50 = vunpack.c.l.b16 %v2621_v8  ;;  %3258 = vrot.lane.b32.xlu0 %v7165_v45, %s5674_s24  ;;  %v4863_v58 = vadd.f32 %v7051_v63, %v4828_v11  ;;  %v4199_v59 = vpop.f32.mrf.mxu0 }
 0x3c4   : > { %v3487_v28 = vpop.permute.xlu1 %3486 }
 0x3c5   : > { %v2704_v33 = vpack.c.b16 %v2685_v50, %v2684_v19  ;;  %v4352_v61 = vpop.f32.mrf.mxu1  ;;  %3635 = vst.msk [vmem:[#allocation2 + $0x7c] sm:$0xf] %vm1272_vm6, %v3487_v28  ;;  %v3483_v32 = vpop.permute.xlu0 %3482  ;;  %v4927_v47 = vadd.f32 %v4895_v20, %v4863_v58  ;;  %v4896_v20 = vld [vmem:[%s5723_s23 + $0x30] sm:$0xff] }
 0x3c6   : > { %3633 = vst.msk [vmem:[#allocation2 + $0x74] sm:$0xf] %vm1272_vm6, %v3483_v32 }
 0x3c7   : > { %v2116_v26 = vpop.f32.mrf.mxu2  ;;  %v2793_v6 = vshrl.u32 %v2704_v33, 16  ;;  %v2796_v42 = vshll.u32 %v2704_v33, 16  ;;  %v4959_v41 = vmax.f32 %v4927_v47, 0.0 }
 0x3c8   : > { %v2450_v39 = vrot.slane %v2116_v26, 2 }
 0x3c9   : > { %v2795_v45 = vrot.slane %v2793_v6, 7  ;;  %v4059_v13 = vpop.f32.mrf.mxu3  ;;  %4992 = vst.msk [vmem:[%s7073_s28 + $0x28] sm:$0xff] %vm4986_vm10, %v4959_v41 }
 0x3cb   : > { %3260 = vrot.lane.b32.xlu0 %v7160_v27, %s5674_s24  ;;  %v2798_v25 = vor.u32 %v2796_v42, %v2795_v45  ;;  %v2880_v55 = vsel %vm5731_vm2, %v2795_v45, 0  ;;  %v4201_v0 = vpop.f32.mrf.mxu0 }
 0x3cc   : > { %v3491_v34 = vpop.permute.xlu2 %3490  ;;  %v2969_v18 = vunpack.c.h.b16 %v2880_v55  ;;  %v2968_v40 = vunpack.c.l.b16 %v2880_v55  ;;  %v4534_v49 = vrot.slane %v4201_v0, 1 }
 0x3cd   : > { %v4354_v5 = vpop.f32.mrf.mxu1  ;;  %v3485_v16 = vpop.permute.xlu0 %3484  ;;  %v5608_v17 = vld [vmem:[#allocation2 + $0x70] sm:$0xff]  ;;  %v2864_v56 = vsel %vm5731_vm2, 0, %v2798_v25 }
 0x3ce   : > { %3634 = vst.msk [vmem:[#allocation2 + $0x78] sm:$0xf] %vm1272_vm6, %v3485_v16  ;;  %v2967_v4 = vunpack.c.h.b16 %v2864_v56  ;;  %v2966_v27 = vunpack.c.l.b16 %v2864_v56  ;;  %v7220_v57 = vpack.c.b16 %v2969_v18, %v2969_v18  ;;  %5473 = vmatmul.msk.bf16.gmra.mxu3 %vm1593_vm7, %v5608_v17  ;;  %5505 = vmatmul.msk.bf16.gmra.mxu0 %vm1593_vm7, %v5608_v17  ;;  %v7224_v22 = vpack.c.b16 %v2968_v40, %v2968_v40 }
 0x3cf   : > { %v2118_v29 = vpop.f32.mrf.mxu2  ;;  %5537 = vmatmul.msk.bf16.gmra.mxu1 %vm1593_vm7, %v5608_v17  ;;  %v4726_v51 = vrot.slane %v4354_v5, 2 }
 0x3d0   : > { %v2451_v15 = vrot.slane %v2118_v29, 2  ;;  %v3027_v10 = vpack.c.b16 %v2967_v4, %v2967_v4  ;;  %v3026_v36 = vpack.c.b16 %v2966_v27, %v2966_v27  ;;  %3149 = vst.msk [vmem:[#allocation2 + $0xdc] sm:$0xf] %vm549_vm3, %v7220_v57  ;;  %v4897_v27 = vld [vmem:[%s5723_s23 + $0x38] sm:$0xff] }
 0x3d1   : > { %3148 = vst.msk [vmem:[#allocation2 + $0xd8] sm:$0xf] %vm549_vm3, %v7224_v22  ;;  %v4061_v53 = vpop.f32.mrf.mxu3 }
 0x3d2   : > { %v2452_v35 = vsel %vm2384_vm9, %v2450_v39, %v2451_v15  ;;  %3514 = vrot.lane.b32.xlu2 %v3027_v10, %s5675_s25  ;;  %3147 = vst.msk [vmem:[#allocation2 + $0xd4] sm:$0xf] %vm549_vm3, %v3027_v10  ;;  %3512 = vrot.lane.b32.xlu1 %v3026_v36, %s5675_s25 }
 0x3d3   : > { %v2523_v14 = vadd.f32 %v2452_v35, %v6378_v7  ;;  %3146 = vst.msk [vmem:[#allocation2 + $0xd0] sm:$0xf] %vm549_vm3, %v3026_v36  ;;  %3518 = vrot.lane.b32.xlu0 %v7220_v57, %s5675_s25  ;;  %v4203_v37 = vpop.f32.mrf.mxu0 }
 0x3d4   : > { %v3493_v9 = vpop.permute.xlu2 %3492  ;;  %v4535_v12 = vrot.slane %v4203_v37, 1 }
 0x3d5   : > { %v4356_v62 = vpop.f32.mrf.mxu1  ;;  %v3235_v38 = vpop.permute.xlu0 %3234  ;;  %v2558_v52 = vadd.f32 %v7243_v3, %v2523_v14  ;;  %v5609_v59 = vld [vmem:[#allocation2 + $0x78] sm:$0xff] }
 0x3d6   : > { %3393 = vst.msk [vmem:[#allocation2 + $0x84] sm:$0xf] %vm1027_vm5, %v3235_v38  ;;  %v4727_v7 = vrot.slane %v4356_v62, 2  ;;  %v4536_v60 = vsel %vm2191_vm8, %v4534_v49, %v4535_v12 }
 0x3d7   : > { %3637 = vst.msk [vmem:[#allocation2 + $0x84] sm:$0xf] %vm1272_vm6, %v3491_v34  ;;  %v2121_v48 = vpop.f32.mrf.mxu2  ;;  %v4637_v43 = vadd.f32 %v4536_v60, %v4061_v53  ;;  %v2590_v50 = vmax.f32 %v2558_v52, 0.0 }
 0x3d8   : > { %v2453_v8 = vrot.slane %v2121_v48, 2  ;;  %v4728_v2 = vsel %vm2384_vm9, %v4726_v51, %v4727_v7 }
 0x3d9   : > { %v4063_v19 = vpop.f32.mrf.mxu3  ;;  %v4829_v28 = vadd.f32 %v4728_v2, %v4637_v43  ;;  %v2622_v6 = vpack.c.bf16 %v2590_v50, %v2590_v50 }
 0x3da   : > { %v2454_v23 = vsel %vm2384_vm9, %v2451_v15, %v2453_v8  ;;  %3516 = vrot.lane.b32.xlu2 %v7224_v22, %s5675_s25  ;;  %3262 = vrot.lane.b32.xlu1 %v7155_v44, %s5674_s24 }
 0x3db   : > { %v2524_v11 = vadd.f32 %v2454_v23, %v6401_v30  ;;  %v4864_v26 = vadd.f32 %v7051_v63, %v4829_v28  ;;  %v4206_v44 = vpop.f32.mrf.mxu0  ;;  %v2686_v40 = vunpack.c.l.b16 %v2622_v6 }
 0x3dc   : > { %v3243_v33 = vpop.permute.xlu2 %3242  ;;  %v4537_v30 = vrot.slane %v4206_v44, 1 }
 0x3dd   : > { %v2559_v61 = vadd.f32 %v7243_v3, %v2524_v11  ;;  %v4359_v32 = vpop.f32.mrf.mxu1  ;;  %3397 = vst.msk [vmem:[#allocation2 + $0x94] sm:$0xf] %vm1027_vm5, %v3243_v33  ;;  %v3237_v58 = vpop.permute.xlu0 %3236  ;;  %v4928_v41 = vadd.f32 %v4896_v20, %v4864_v26 }
 0x3de   : > { %3394 = vst.msk [vmem:[#allocation2 + $0x88] sm:$0xf] %vm1027_vm5, %v3237_v58  ;;  %v4729_v45 = vrot.slane %v4359_v32, 2  ;;  %5474 = vmatmul.msk.bf16.gmra.mxu3 %vm1593_vm7, %v5609_v59  ;;  %5506 = vmatmul.msk.bf16.gmra.mxu0 %vm1593_vm7, %v5609_v59  ;;  %v4538_v25 = vsel %vm2191_vm8, %v4535_v12, %v4537_v30 }
 0x3df   : > { %v2591_v47 = vmax.f32 %v2559_v61, 0.0  ;;  %3638 = vst.msk [vmem:[#allocation2 + $0x88] sm:$0xf] %vm1272_vm6, %v3493_v9  ;;  %v2123_v42 = vpop.f32.mrf.mxu2  ;;  %5538 = vmatmul.msk.bf16.gmra.mxu1 %vm1593_vm7, %v5609_v59  ;;  %v4960_v55 = vmax.f32 %v4928_v41, 0.0  ;;  %v4638_v34 = vadd.f32 %v4538_v25, %v4063_v19 }
 0x3e0   : > { %v4730_v16 = vsel %vm2384_vm9, %v4727_v7, %v4729_v45 }
 0x3e1   : > { %v2623_v13 = vpack.c.bf16 %v2591_v47, %v2591_v47  ;;  %v4066_v18 = vpop.f32.mrf.mxu3  ;;  %4993 = vst.msk [vmem:[%s7073_s28 + $0x30] sm:$0xff] %vm4986_vm10, %v4960_v55  ;;  %v4830_v17 = vadd.f32 %v4730_v16, %v4638_v34  ;;  %v4898_v16 = vld [vmem:[%s5723_s23 + $0x40] sm:$0xff] }
 0x3e2   : > { %3266 = vrot.lane.b32.xlu2 %v3027_v10, %s5674_s24  ;;  %3264 = vrot.lane.b32.xlu1 %v3026_v36, %s5674_s24 }
 0x3e3   : > { %v2687_v5 = vunpack.c.l.b16 %v2623_v13  ;;  %v4865_v39 = vadd.f32 %v7051_v63, %v4830_v17  ;;  %v4208_v15 = vpop.f32.mrf.mxu0 }
 0x3e4   : > { %v3245_v56 = vpop.permute.xlu2 %3244  ;;  %v3489_v0 = vpop.permute.xlu1 %3488 }
 0x3e5   : > { %v2705_v4 = vpack.c.b16 %v2687_v5, %v2686_v40  ;;  %v4361_v29 = vpop.f32.mrf.mxu1  ;;  %3398 = vst.msk [vmem:[#allocation2 + $0x98] sm:$0xf] %vm1027_vm5, %v3245_v56  ;;  %v4929_v35 = vadd.f32 %v4897_v27, %v4865_v39  ;;  %v3495_v12 = vpop.permute.xlu0 %3494 }
 0x3e6   : > { %3636 = vst.msk [vmem:[#allocation2 + $0x80] sm:$0xf] %vm1272_vm6, %v3489_v0 }
 0x3e7   : > { %v2125_v10 = vpop.f32.mrf.mxu2  ;;  %v2800_v36 = vshrl.u32 %v2705_v4, 16  ;;  %v2803_v14 = vshll.u32 %v2705_v4, 16  ;;  %v4961_v9 = vmax.f32 %v4929_v35, 0.0 }
 0x3e8   : > { %v2455_v2 = vrot.slane %v2125_v10, 2 }
 0x3e9   : > { %v2802_v53 = vrot.slane %v2800_v36, 7  ;;  %v4067_v62 = vpop.f32.mrf.mxu3  ;;  %4994 = vst.msk [vmem:[%s7073_s28 + $0x38] sm:$0xff] %vm4986_vm10, %v4961_v9 }
 0x3ea   : > { %3268 = vrot.lane.b32.xlu2 %v7224_v22, %s5674_s24 }
 0x3eb   : > { %v2881_v38 = vsel %vm5731_vm2, %v2802_v53, 0  ;;  %v2805_v37 = vor.u32 %v2803_v14, %v2802_v53  ;;  %v4210_v22 = vpop.f32.mrf.mxu0 }
 0x3ec   : > { %v3239_v49 = vpop.permute.xlu1 %3238  ;;  %v2973_v52 = vunpack.c.h.b16 %v2881_v38  ;;  %v2972_v7 = vunpack.c.l.b16 %v2881_v38  ;;  %v4539_v44 = vrot.slane %v4210_v22, 1 }
 0x3ed   : > { %v4363_v48 = vpop.f32.mrf.mxu1  ;;  %3395 = vst.msk [vmem:[#allocation2 + $0x8c] sm:$0xf] %vm1027_vm5, %v3239_v49  ;;  %v5610_v8 = vld [vmem:[#allocation2 + $0x80] sm:$0xff]  ;;  %v2865_v51 = vsel %vm5731_vm2, 0, %v2805_v37  ;;  %v3503_v49 = vpop.permute.xlu2 %3502 }
 0x3ee   : > { %3639 = vst.msk [vmem:[#allocation2 + $0x8c] sm:$0xf] %vm1272_vm6, %v3495_v12  ;;  %v7284_v60 = vpack.c.b16 %v2973_v52, %v2973_v52  ;;  %v2971_v43 = vunpack.c.h.b16 %v2865_v51  ;;  %v2970_v23 = vunpack.c.l.b16 %v2865_v51  ;;  %5475 = vmatmul.msk.bf16.gmra.mxu3 %vm1593_vm7, %v5610_v8  ;;  %5507 = vmatmul.msk.bf16.gmra.mxu0 %vm1593_vm7, %v5610_v8  ;;  %v7288_v50 = vpack.c.b16 %v2972_v7, %v2972_v7 }
 0x3ef   : > { %v2127_v19 = vpop.f32.mrf.mxu2  ;;  %5539 = vmatmul.msk.bf16.gmra.mxu1 %vm1593_vm7, %v5610_v8  ;;  %v4731_v41 = vrot.slane %v4363_v48, 2  ;;  %v4899_v48 = vld [vmem:[%s5723_s23 + $0x48] sm:$0xff] }
 0x3f0   : > { %v2456_v11 = vrot.slane %v2127_v19, 2  ;;  %3153 = vst.msk [vmem:[#allocation2 + $0xec] sm:$0xf] %vm549_vm3, %v7284_v60  ;;  %v3031_v28 = vpack.c.b16 %v2971_v43, %v2971_v43  ;;  %v3030_v33 = vpack.c.b16 %v2970_v23, %v2970_v23 }
 0x3f1   : > { %3152 = vst.msk [vmem:[#allocation2 + $0xe8] sm:$0xf] %vm549_vm3, %v7288_v50  ;;  %v4069_v61 = vpop.f32.mrf.mxu3 }
 0x3f2   : > { %v2457_v20 = vsel %vm2384_vm9, %v2455_v2, %v2456_v11  ;;  %3526 = vrot.lane.b32.xlu2 %v7284_v60, %s5675_s25  ;;  %3522 = vrot.lane.b32.xlu1 %v3031_v28, %s5675_s25  ;;  %3151 = vst.msk [vmem:[#allocation2 + $0xe4] sm:$0xf] %vm549_vm3, %v3031_v28 }
 0x3f3   : > { %v2525_v32 = vadd.f32 %v2457_v20, %v6425_v54  ;;  %3520 = vrot.lane.b32.xlu0 %v3030_v33, %s5675_s25  ;;  %3150 = vst.msk [vmem:[#allocation2 + $0xe0] sm:$0xf] %vm549_vm3, %v3030_v33  ;;  %v4212_v26 = vpop.f32.mrf.mxu0 }
 0x3f4   : > { %v3241_v58 = vpop.permute.xlu1 %3240  ;;  %v4540_v45 = vrot.slane %v4212_v26, 1 }
 0x3f5   : > { %v4365_v59 = vpop.f32.mrf.mxu1  ;;  %3396 = vst.msk [vmem:[#allocation2 + $0x90] sm:$0xf] %vm1027_vm5, %v3241_v58  ;;  %v2560_v6 = vadd.f32 %v7243_v3, %v2525_v32  ;;  %v5611_v0 = vld [vmem:[#allocation2 + $0x88] sm:$0xff] }
 0x3f6   : > { %v4732_v47 = vrot.slane %v4365_v59, 2  ;;  %v4541_v54 = vsel %vm2191_vm8, %v4539_v44, %v4540_v45 }
 0x3f7   : > { %v2130_v30 = vpop.f32.mrf.mxu2  ;;  %v4639_v13 = vadd.f32 %v4541_v54, %v4069_v61  ;;  %v2592_v34 = vmax.f32 %v2560_v6, 0.0 }
 0x3f8   : > { %v2458_v42 = vrot.slane %v2130_v30, 2  ;;  %v4733_v18 = vsel %vm2384_vm9, %v4731_v41, %v4732_v47 }
 0x3f9   : > { %v4071_v55 = vpop.f32.mrf.mxu3  ;;  %v4831_v5 = vadd.f32 %v4733_v18, %v4639_v13  ;;  %v2624_v29 = vpack.c.bf16 %v2592_v34, %v2592_v34 }
 0x3fa   : > { %v2459_v25 = vsel %vm2384_vm9, %v2456_v11, %v2458_v42  ;;  %3524 = vrot.lane.b32.xlu1 %v7288_v50, %s5675_s25 }
 0x3fb   : > { %v2526_v40 = vadd.f32 %v2459_v25, %v6441_v24  ;;  %3270 = vrot.lane.b32.xlu0 %v7220_v57, %s5674_s24  ;;  %v4866_v4 = vadd.f32 %v7051_v63, %v4831_v5  ;;  %v4215_v27 = vpop.f32.mrf.mxu0  ;;  %v2688_v62 = vunpack.c.l.b16 %v2624_v29 }
 0x3fc   : > { %v4542_v15 = vrot.slane %v4215_v27, 1 }
 0x3fd   : > { %v2561_v17 = vadd.f32 %v7243_v3, %v2526_v40  ;;  %v4368_v56 = vpop.f32.mrf.mxu1  ;;  %v4930_v24 = vadd.f32 %v4898_v16, %v4866_v4 }
 0x3fe   : > { %v4734_v10 = vrot.slane %v4368_v56, 2  ;;  %5476 = vmatmul.msk.bf16.gmra.mxu3 %vm1593_vm7, %v5611_v0  ;;  %5508 = vmatmul.msk.bf16.gmra.mxu0 %vm1593_vm7, %v5611_v0  ;;  %v4543_v35 = vsel %vm2191_vm8, %v4540_v45, %v4542_v15 }
 0x3ff   : > { %v2593_v39 = vmax.f32 %v2561_v17, 0.0  ;;  %v2132_v36 = vpop.f32.mrf.mxu2  ;;  %5540 = vmatmul.msk.bf16.gmra.mxu1 %vm1593_vm7, %v5611_v0  ;;  %v4962_v53 = vmax.f32 %v4930_v24, 0.0  ;;  %v4640_v14 = vadd.f32 %v4543_v35, %v4071_v55 }
 0x400   : > { %v4735_v37 = vsel %vm2384_vm9, %v4732_v47, %v4734_v10 }
 0x401   : > { %v2625_v57 = vpack.c.bf16 %v2593_v39, %v2593_v39  ;;  %v4074_v9 = vpop.f32.mrf.mxu3  ;;  %4995 = vst.msk [vmem:[%s7073_s28 + $0x40] sm:$0xff] %vm4986_vm10, %v4962_v53  ;;  %v4832_v52 = vadd.f32 %v4735_v37, %v4640_v14 }
 0x402   : > { %3274 = vrot.lane.b32.xlu1 %v3031_v28, %s5674_s24 }
 0x403   : > { %v2689_v38 = vunpack.c.l.b16 %v2625_v57  ;;  %3272 = vrot.lane.b32.xlu0 %v3030_v33, %s5674_s24  ;;  %v4867_v22 = vadd.f32 %v7051_v63, %v4832_v52  ;;  %v4217_v43 = vpop.f32.mrf.mxu0 }
 0x404   : > { %v3499_v7 = vpop.permute.xlu1 %3498 }
 0x405   : > { %v2706_v12 = vpack.c.b16 %v2689_v38, %v2688_v62  ;;  %v4370_v8 = vpop.f32.mrf.mxu1  ;;  %3641 = vst.msk [vmem:[#allocation2 + $0x94] sm:$0xf] %vm1272_vm6, %v3499_v7  ;;  %v3497_v51 = vpop.permute.xlu0 %3496  ;;  %v4931_v2 = vadd.f32 %v4899_v48, %v4867_v22  ;;  %v4900_v7 = vld [vmem:[%s5723_s23 + $0x50] sm:$0xff] }
 0x406   : > { %3640 = vst.msk [vmem:[#allocation2 + $0x90] sm:$0xf] %vm1272_vm6, %v3497_v51 }
 0x407   : > { %v2134_v23 = vpop.f32.mrf.mxu2  ;;  %v2807_v19 = vshrl.u32 %v2706_v12, 16  ;;  %v2810_v28 = vshll.u32 %v2706_v12, 16  ;;  %v4963_v33 = vmax.f32 %v4931_v2, 0.0 }
 0x408   : > { %v2460_v25 = vrot.slane %v2134_v23, 2 }
 0x409   : > { %v2809_v11 = vrot.slane %v2807_v19, 7  ;;  %v4075_v20 = vpop.f32.mrf.mxu3  ;;  %4996 = vst.msk [vmem:[%s7073_s28 + $0x48] sm:$0xff] %vm4986_vm10, %v4963_v33 }
 0x40a   : > { %3276 = vrot.lane.b32.xlu1 %v7288_v50, %s5674_s24 }
 0x40b   : > { %v2812_v61 = vor.u32 %v2810_v28, %v2809_v11  ;;  %v2882_v32 = vsel %vm5731_vm2, %v2809_v11, 0  ;;  %v4219_v50 = vpop.f32.mrf.mxu0 }
 0x40c   : > { %v3505_v63 = vpop.permute.xlu2 %3504  ;;  %v3501_v58 = vpop.permute.xlu1 %3500  ;;  %v2977_v59 = vunpack.c.h.b16 %v2882_v32  ;;  %v2976_v26 = vunpack.c.l.b16 %v2882_v32  ;;  %v4544_v29 = vrot.slane %v4219_v50, 1 }
 0x40d   : > { %v4372_v44 = vpop.f32.mrf.mxu1  ;;  %3642 = vst.msk [vmem:[#allocation2 + $0x98] sm:$0xf] %vm1272_vm6, %v3501_v58  ;;  %v3247_v6 = vpop.permute.xlu0 %3246  ;;  %v5612_v47 = vld [vmem:[#allocation2 + $0x90] sm:$0xff]  ;;  %v2866_v45 = vsel %vm5731_vm2, 0, %v2812_v61 }
 0x40e   : > { %3399 = vst.msk [vmem:[#allocation2 + $0x9c] sm:$0xf] %vm1027_vm5, %v3247_v6  ;;  %v2974_v30 = vunpack.c.l.b16 %v2866_v45  ;;  %v7339_v42 = vpack.c.b16 %v2977_v59, %v2977_v59  ;;  %v2975_v41 = vunpack.c.h.b16 %v2866_v45  ;;  %5477 = vmatmul.msk.bf16.gmra.mxu3 %vm1593_vm7, %v5612_v47  ;;  %5509 = vmatmul.msk.bf16.gmra.mxu0 %vm1593_vm7, %v5612_v47  ;;  %v7344_v13 = vpack.c.b16 %v2976_v26, %v2976_v26  ;;  %v4901_v6 = vld [vmem:[%s5723_s23 + $0x58] sm:$0xff] }
 0x40f   : > { %3643 = vst.msk [vmem:[#allocation2 + $0x9c] sm:$0xf] %vm1272_vm6, %v3503_v49  ;;  %v2136_v54 = vpop.f32.mrf.mxu2  ;;  %5541 = vmatmul.msk.bf16.gmra.mxu1 %vm1593_vm7, %v5612_v47  ;;  %v4736_v24 = vrot.slane %v4372_v44, 2 }
 0x410   : > { %v2461_v55 = vrot.slane %v2136_v54, 2  ;;  %v3034_v34 = vpack.c.b16 %v2974_v30, %v2974_v30  ;;  %3157 = vst.msk [vmem:[#allocation2 + $0xfc] sm:$0xf] %vm549_vm3, %v7339_v42  ;;  %v7349_v18 = vpack.c.b16 %v2975_v41, %v2975_v41 }
 0x411   : > { %3156 = vst.msk [vmem:[#allocation2 + $0xf8] sm:$0xf] %vm549_vm3, %v7344_v13  ;;  %v4077_v5 = vpop.f32.mrf.mxu3 }
 0x412   : > { %v2462_v40 = vsel %vm2384_vm9, %v2460_v25, %v2461_v55  ;;  %3528 = vrot.lane.b32.xlu2 %v3034_v34, %s5675_s25  ;;  %3154 = vst.msk [vmem:[#allocation2 + $0xf0] sm:$0xf] %vm549_vm3, %v3034_v34  ;;  %3534 = vrot.lane.b32.xlu1 %v7339_v42, %s5675_s25 }
 0x413   : > { %v2527_v16 = vadd.f32 %v2462_v40, %v6465_v31  ;;  %3530 = vrot.lane.b32.xlu0 %v7349_v18, %s5675_s25  ;;  %3155 = vst.msk [vmem:[#allocation2 + $0xf4] sm:$0xf] %vm549_vm3, %v7349_v18  ;;  %v4221_v27 = vpop.f32.mrf.mxu0 }
 0x414   : > { %v3255_v17 = vpop.permute.xlu2 %3254  ;;  %v3251_v56 = vpop.permute.xlu1 %3250  ;;  %v4545_v31 = vrot.slane %v4221_v27, 1 }
 0x415   : > { %v4374_v0 = vpop.f32.mrf.mxu1  ;;  %3403 = vst.msk [vmem:[#allocation2 + $0xac] sm:$0xf] %vm1027_vm5, %v3255_v17  ;;  %v3249_v4 = vpop.permute.xlu0 %3248  ;;  %v2562_v39 = vadd.f32 %v7243_v3, %v2527_v16 }
 0x416   : > { %3401 = vst.msk [vmem:[#allocation2 + $0xa4] sm:$0xf] %vm1027_vm5, %v3251_v56  ;;  %v4737_v15 = vrot.slane %v4374_v0, 2  ;;  %v4546_v57 = vsel %vm2191_vm8, %v4544_v29, %v4545_v31  ;;  %v5613_v8 = vld [vmem:[#allocation2 + $0x98] sm:$0xff] }
 0x417   : > { %3400 = vst.msk [vmem:[#allocation2 + $0xa0] sm:$0xf] %vm1027_vm5, %v3249_v4  ;;  %v2139_v10 = vpop.f32.mrf.mxu2  ;;  %v4641_v35 = vadd.f32 %v4546_v57, %v4077_v5  ;;  %v2594_v9 = vmax.f32 %v2562_v39, 0.0 }
 0x418   : > { %3644 = vst.msk [vmem:[#allocation2 + $0xa0] sm:$0xf] %vm1272_vm6, %v3505_v63  ;;  %v2463_v36 = vrot.slane %v2139_v10, 2  ;;  %v4738_v62 = vsel %vm2384_vm9, %v4736_v24, %v4737_v15 }
 0x419   : > { %v4079_v14 = vpop.f32.mrf.mxu3  ;;  %v4833_v37 = vadd.f32 %v4738_v62, %v4641_v35  ;;  %v2626_v22 = vpack.c.bf16 %v2594_v9, %v2594_v9 }
 0x41a   : > { %v2464_v53 = vsel %vm2384_vm9, %v2461_v55, %v2463_v36  ;;  %3278 = vrot.lane.b32.xlu2 %v7284_v60, %s5674_s24  ;;  %v7382_v60 = vld [vmem:[%s7626_s4] ss:$0 sm:$0xff] }
 0x41b   : > { %v2528_v38 = vadd.f32 %v2464_v53, %v6481_v46  ;;  %3532 = vrot.lane.b32.xlu0 %v7344_v13, %s5675_s25  ;;  %v4868_v46 = vadd.f32 %v7382_v60, %v4833_v37  ;;  %v4224_v51 = vpop.f32.mrf.mxu0  ;;  %v2690_v32 = vunpack.c.l.b16 %v2626_v22 }
 0x41c   : > { %v3257_v49 = vpop.permute.xlu2 %3256  ;;  %v3253_v52 = vpop.permute.xlu1 %3252  ;;  %v4547_v19 = vrot.slane %v4224_v51, 1 }
 0x41d   : > { %v2563_v12 = vadd.f32 %v7243_v3, %v2528_v38  ;;  %v4377_v48 = vpop.f32.mrf.mxu1  ;;  %3404 = vst.msk [vmem:[#allocation2 + $0xb0] sm:$0xf] %vm1027_vm5, %v3257_v49  ;;  %v4932_v2 = vadd.f32 %v4900_v7, %v4868_v46  ;;  %v4902_v46 = vld [vmem:[%s5723_s23 + $0x60] sm:$0xff] }
 0x41e   : > { %3402 = vst.msk [vmem:[#allocation2 + $0xa8] sm:$0xf] %vm1027_vm5, %v3253_v52  ;;  %v4739_v23 = vrot.slane %v4377_v48, 2  ;;  %5478 = vmatmul.msk.bf16.gmra.mxu3 %vm1593_vm7, %v5613_v8  ;;  %5510 = vmatmul.msk.bf16.gmra.mxu0 %vm1593_vm7, %v5613_v8  ;;  %v4548_v28 = vsel %vm2191_vm8, %v4545_v31, %v4547_v19 }
 0x41f   : > { %v2595_v43 = vmax.f32 %v2563_v12, 0.0  ;;  %v2141_v3 = vpop.f32.mrf.mxu2  ;;  %5542 = vmatmul.msk.bf16.gmra.mxu1 %vm1593_vm7, %v5613_v8  ;;  %v4964_v33 = vmax.f32 %v4932_v2, 0.0  ;;  %v4642_v20 = vadd.f32 %v4548_v28, %v4079_v14 }
 0x420   : > { %v4740_v58 = vsel %vm2384_vm9, %v4737_v15, %v4739_v23 }
 0x421   : > { %v2627_v11 = vpack.c.bf16 %v2595_v43, %v2595_v43  ;;  %v4082_v61 = vpop.f32.mrf.mxu3  ;;  %4997 = vst.msk [vmem:[%s7073_s28 + $0x50] sm:$0xff] %vm4986_vm10, %v4964_v33  ;;  %v4834_v59 = vadd.f32 %v4740_v58, %v4642_v20 }
 0x422   : > { %3280 = vrot.lane.b32.xlu2 %v3034_v34, %s5674_s24 }
 0x423   : > { %v2691_v63 = vunpack.c.l.b16 %v2627_v11  ;;  %3282 = vrot.lane.b32.xlu0 %v7349_v18, %s5674_s24  ;;  %v4869_v50 = vadd.f32 %v7382_v60, %v4834_v59  ;;  %v4226_v30 = vpop.f32.mrf.mxu0  ;;  %v4903_v59 = vld [vmem:[%s5723_s23 + $0x68] sm:$0xff] }
 0x424   : > { %v3511_v26 = vpop.permute.xlu1 %3510 }
 0x425   : > { %v2707_v44 = vpack.c.b16 %v2691_v63, %v2690_v32  ;;  %v4379_v47 = vpop.f32.mrf.mxu1  ;;  %3647 = vst.msk [vmem:[#allocation2 + $0xac] sm:$0xf] %vm1272_vm6, %v3511_v26  ;;  %v3507_v45 = vpop.permute.xlu0 %3506  ;;  %v4933_v54 = vadd.f32 %v4901_v6, %v4869_v50 }
 0x426   : > { %3645 = vst.msk [vmem:[#allocation2 + $0xa4] sm:$0xf] %vm1272_vm6, %v3507_v45 }
 0x427   : > { %v2814_v41 = vshrl.u32 %v2707_v44, 16  ;;  %v2817_v55 = vshll.u32 %v2707_v44, 16  ;;  %v4965_v34 = vmax.f32 %v4933_v54, 0.0 }
 0x429   : > { %v2816_v25 = vrot.slane %v2814_v41, 7  ;;  %v4083_v18 = vpop.f32.mrf.mxu3  ;;  %4998 = vst.msk [vmem:[%s7073_s28 + $0x58] sm:$0xff] %vm4986_vm10, %v4965_v34 }
 0x42b   : > { %3284 = vrot.lane.b32.xlu0 %v7344_v13, %s5674_s24  ;;  %v2819_v40 = vor.u32 %v2817_v55, %v2816_v25  ;;  %v2883_v5 = vsel %vm5731_vm2, %v2816_v25, 0  ;;  %v4228_v29 = vpop.f32.mrf.mxu0 }
 0x42c   : > { %v3515_v16 = vpop.permute.xlu2 %3514  ;;  %v3163_v27 = vunpack.c.h.b16 %v2883_v5  ;;  %v3162_v24 = vunpack.c.l.b16 %v2883_v5  ;;  %v4549_v14 = vrot.slane %v4228_v29, 1 }
 0x42d   : > { %v4381_v17 = vpop.f32.mrf.mxu1  ;;  %v3509_v56 = vpop.permute.xlu0 %3508  ;;  %v5614_v0 = vld [vmem:[#allocation2 + $0xa0] sm:$0xff]  ;;  %v2867_v4 = vsel %vm5731_vm2, 0, %v2819_v40 }
 0x42e   : > { %3646 = vst.msk [vmem:[#allocation2 + $0xa8] sm:$0xf] %vm1272_vm6, %v3509_v56  ;;  %v3161_v39 = vunpack.c.h.b16 %v2867_v4  ;;  %v3160_v15 = vunpack.c.l.b16 %v2867_v4  ;;  %5479 = vmatmul.msk.bf16.gmra.mxu3 %vm1593_vm7, %v5614_v0  ;;  %5511 = vmatmul.msk.bf16.gmra.mxu0 %vm1593_vm7, %v5614_v0  ;;  %v3167_v10 = vpack.c.b16 %v3163_v27, %v3163_v27  ;;  %v3166_v38 = vpack.c.b16 %v3162_v24, %v3162_v24 }
 0x42f   : > { %5543 = vmatmul.msk.bf16.gmra.mxu1 %vm1593_vm7, %v5614_v0  ;;  %v4741_v37 = vrot.slane %v4381_v17, 2 }
 0x430   : > { %v3165_v13 = vpack.c.b16 %v3161_v39, %v3161_v39  ;;  %v3164_v31 = vpack.c.b16 %v3160_v15, %v3160_v15 }
 0x431   : > { %v4085_v21 = vpop.f32.mrf.mxu3 }
 0x432   : > { %3538 = vrot.lane.b32.xlu2 %v3165_v13, %s5675_s25  ;;  %3536 = vrot.lane.b32.xlu1 %v3164_v31, %s5675_s25 }
 0x433   : > { %3542 = vrot.lane.b32.xlu0 %v3167_v10, %s5675_s25  ;;  %v4230_v53 = vpop.f32.mrf.mxu0 }
 0x434   : > { %v3517_v36 = vpop.permute.xlu2 %3516  ;;  %v4550_v62 = vrot.slane %v4230_v53, 1 }
 0x435   : > { %v4383_v57 = vpop.f32.mrf.mxu1  ;;  %v3259_v35 = vpop.permute.xlu0 %3258  ;;  %v5615_v43 = vld [vmem:[#allocation2 + $0xa8] sm:$0xff] }
 0x436   : > { %3405 = vst.msk [vmem:[#allocation2 + $0xb4] sm:$0xf] %vm1027_vm5, %v3259_v35  ;;  %v4742_v9 = vrot.slane %v4383_v57, 2  ;;  %v4551_v49 = vsel %vm2191_vm8, %v4549_v14, %v4550_v62 }
 0x437   : > { %3649 = vst.msk [vmem:[#allocation2 + $0xb4] sm:$0xf] %vm1272_vm6, %v3515_v16  ;;  %v4643_v52 = vadd.f32 %v4551_v49, %v4085_v21 }
 0x438   : > { %v4743_v12 = vsel %vm2384_vm9, %v4741_v37, %v4742_v9 }
 0x439   : > { %v4087_v7 = vpop.f32.mrf.mxu3  ;;  %v4835_v48 = vadd.f32 %v4743_v12, %v4643_v52 }
 0x43a   : > { %3540 = vrot.lane.b32.xlu2 %v3166_v38, %s5675_s25  ;;  %3286 = vrot.lane.b32.xlu1 %v7339_v42, %s5674_s24 }
 0x43b   : > { %3292 = vrot.lane.b32.xlu0 %v3166_v38, %s5674_s24  ;;  %v4870_v23 = vadd.f32 %v7382_v60, %v4835_v48  ;;  %v4233_v19 = vpop.f32.mrf.mxu0 }
 0x43c   : > { %v3267_v8 = vpop.permute.xlu2 %3266  ;;  %v4552_v3 = vrot.slane %v4233_v19, 1 }
 0x43d   : > { %3409 = vst.msk [vmem:[#allocation2 + $0xc4] sm:$0xf] %vm1027_vm5, %v3267_v8  ;;  %v4386_v51 = vpop.f32.mrf.mxu1  ;;  %v3261_v22 = vpop.permute.xlu0 %3260  ;;  %v4934_v2 = vadd.f32 %v4902_v46, %v4870_v23 }
 0x43e   : > { %3406 = vst.msk [vmem:[#allocation2 + $0xb8] sm:$0xf] %vm1027_vm5, %v3261_v22  ;;  %v4744_v42 = vrot.slane %v4386_v51, 2  ;;  %5480 = vmatmul.msk.bf16.gmra.mxu3 %vm1593_vm7, %v5615_v43  ;;  %5512 = vmatmul.msk.bf16.gmra.mxu0 %vm1593_vm7, %v5615_v43  ;;  %v4553_v11 = vsel %vm2191_vm8, %v4550_v62, %v4552_v3 }
 0x43f   : > { %3650 = vst.msk [vmem:[#allocation2 + $0xb8] sm:$0xf] %vm1272_vm6, %v3517_v36  ;;  %5544 = vmatmul.msk.bf16.gmra.mxu1 %vm1593_vm7, %v5615_v43  ;;  %v4966_v28 = vmax.f32 %v4934_v2, 0.0  ;;  %v4644_v33 = vadd.f32 %v4553_v11, %v4087_v7  ;;  %v4905_v7 = vld [vmem:[%s5723_s23 + $0x78] sm:$0xff] }
 0x440   : > { %v4745_v61 = vsel %vm2384_vm9, %v4742_v9, %v4744_v42 }
 0x441   : > { %v4090_v20 = vpop.f32.mrf.mxu3  ;;  %4999 = vst.msk [vmem:[%s7073_s28 + $0x60] sm:$0xff] %vm4986_vm10, %v4966_v28  ;;  %v4836_v32 = vadd.f32 %v4745_v61, %v4644_v33 }
 0x442   : > { %3290 = vrot.lane.b32.xlu2 %v3165_v13, %s5674_s24  ;;  %3288 = vrot.lane.b32.xlu1 %v3164_v31, %s5674_s24  ;;  %v4904_v13 = vld [vmem:[%s5723_s23 + $0x70] sm:$0xff] }
 0x443   : > { %v4871_v44 = vadd.f32 %v7382_v60, %v4836_v32  ;;  %v4235_v6 = vpop.f32.mrf.mxu0 }
 0x444   : > { %v3269_v63 = vpop.permute.xlu2 %3268  ;;  %v3513_v58 = vpop.permute.xlu1 %3512 }
 0x445   : > { %3410 = vst.msk [vmem:[#allocation2 + $0xc8] sm:$0xf] %vm1027_vm5, %v3269_v63  ;;  %v4388_v26 = vpop.f32.mrf.mxu1  ;;  %v4935_v47 = vadd.f32 %v4903_v59, %v4871_v44  ;;  %v3519_v41 = vpop.permute.xlu0 %3518 }
 0x446   : > { %3648 = vst.msk [vmem:[#allocation2 + $0xb0] sm:$0xf] %vm1272_vm6, %v3513_v58 }
 0x447   : > { %v4967_v45 = vmax.f32 %v4935_v47, 0.0 }
 0x449   : > { %v4091_v50 = vpop.f32.mrf.mxu3  ;;  %5000 = vst.msk [vmem:[%s7073_s28 + $0x68] sm:$0xff] %vm4986_vm10, %v4967_v45 }
 0x44a   : > { %3294 = vrot.lane.b32.xlu1 %v3167_v10, %s5674_s24 }
 0x44b   : > { %v4237_v55 = vpop.f32.mrf.mxu0 }
 0x44c   : > { %v3263_v30 = vpop.permute.xlu1 %3262  ;;  %v4554_v16 = vrot.slane %v4237_v55, 1  ;;  %v3527_v37 = vpop.permute.xlu2 %3526 }
 0x44d   : > { %3407 = vst.msk [vmem:[#allocation2 + $0xbc] sm:$0xf] %vm1027_vm5, %v3263_v30  ;;  %v4390_v54 = vpop.f32.mrf.mxu1  ;;  %v5616_v25 = vld [vmem:[#allocation2 + $0xb0] sm:$0xff] }
 0x44e   : > { %3651 = vst.msk [vmem:[#allocation2 + $0xbc] sm:$0xf] %vm1272_vm6, %v3519_v41  ;;  %5481 = vmatmul.msk.bf16.gmra.mxu3 %vm1593_vm7, %v5616_v25  ;;  %5513 = vmatmul.msk.bf16.gmra.mxu0 %vm1593_vm7, %v5616_v25  ;;  %v4746_v0 = vrot.slane %v4390_v54, 2 }
 0x44f   : > { %5545 = vmatmul.msk.bf16.gmra.mxu1 %vm1593_vm7, %v5616_v25  ;;  %v4906_v25 = vld [vmem:[%s5723_s23 + $0x80] sm:$0xff] }
 0x451   : > { %v4093_v34 = vpop.f32.mrf.mxu3 }
 0x453   : > { %v4239_v5 = vpop.f32.mrf.mxu0 }
 0x454   : > { %v3265_v18 = vpop.permute.xlu1 %3264  ;;  %v4555_v17 = vrot.slane %v4239_v5, 1 }
 0x455   : > { %3408 = vst.msk [vmem:[#allocation2 + $0xc0] sm:$0xf] %vm1027_vm5, %v3265_v18  ;;  %v4392_v40 = vpop.f32.mrf.mxu1  ;;  %v5617_v10 = vld [vmem:[#allocation2 + $0xb8] sm:$0xff] }
 0x456   : > { %v4747_v56 = vrot.slane %v4392_v40, 2  ;;  %v4556_v4 = vsel %vm2191_vm8, %v4554_v16, %v4555_v17 }
 0x457   : > { %v4645_v27 = vadd.f32 %v4556_v4, %v4093_v34 }
 0x458   : > { %v4748_v39 = vsel %vm2384_vm9, %v4746_v0, %v4747_v56 }
 0x459   : > { %v4095_v29 = vpop.f32.mrf.mxu3  ;;  %v4837_v15 = vadd.f32 %v4748_v39, %v4645_v27 }
 0x45b   : > { %v4872_v21 = vadd.f32 %v7382_v60, %v4837_v15  ;;  %v4242_v36 = vpop.f32.mrf.mxu0 }
 0x45c   : > { %v4557_v24 = vrot.slane %v4242_v36, 1 }
 0x45d   : > { %v4395_v31 = vpop.f32.mrf.mxu1  ;;  %v4936_v35 = vadd.f32 %v4904_v13, %v4872_v21  ;;  %v4907_v13 = vld [vmem:[%s5723_s23 + $0x88] sm:$0xff] }
 0x45e   : > { %v4749_v57 = vrot.slane %v4395_v31, 2  ;;  %5482 = vmatmul.msk.bf16.gmra.mxu3 %vm1593_vm7, %v5617_v10  ;;  %5514 = vmatmul.msk.bf16.gmra.mxu0 %vm1593_vm7, %v5617_v10  ;;  %v4558_v53 = vsel %vm2191_vm8, %v4555_v17, %v4557_v24 }
 0x45f   : > { %5546 = vmatmul.msk.bf16.gmra.mxu1 %vm1593_vm7, %v5617_v10  ;;  %v4968_v14 = vmax.f32 %v4936_v35, 0.0  ;;  %v4646_v9 = vadd.f32 %v4558_v53, %v4095_v29 }
 0x460   : > { %v4750_v38 = vsel %vm2384_vm9, %v4747_v56, %v4749_v57 }
 0x461   : > { %v4098_v62 = vpop.f32.mrf.mxu3  ;;  %5001 = vst.msk [vmem:[%s7073_s28 + $0x70] sm:$0xff] %vm4986_vm10, %v4968_v14  ;;  %v4838_v49 = vadd.f32 %v4750_v38, %v4646_v9 }
 0x463   : > { %v4873_v8 = vadd.f32 %v7382_v60, %v4838_v49  ;;  %v4244_v46 = vpop.f32.mrf.mxu0 }
 0x464   : > { %v3523_v52 = vpop.permute.xlu1 %3522 }
 0x465   : > { %3653 = vst.msk [vmem:[#allocation2 + $0xc4] sm:$0xf] %vm1272_vm6, %v3523_v52  ;;  %v4397_v12 = vpop.f32.mrf.mxu1  ;;  %v3521_v48 = vpop.permute.xlu0 %3520  ;;  %v4937_v51 = vadd.f32 %v4905_v7, %v4873_v8 }
 0x466   : > { %3652 = vst.msk [vmem:[#allocation2 + $0xc0] sm:$0xf] %vm1272_vm6, %v3521_v48 }
 0x467   : > { %v4969_v22 = vmax.f32 %v4937_v51, 0.0 }
 0x469   : > { %v4099_v43 = vpop.f32.mrf.mxu3  ;;  %5002 = vst.msk [vmem:[%s7073_s28 + $0x78] sm:$0xff] %vm4986_vm10, %v4969_v22 }
 0x46b   : > { %v4246_v11 = vpop.f32.mrf.mxu0 }
 0x46c   : > { %v3529_v23 = vpop.permute.xlu2 %3528  ;;  %v3525_v19 = vpop.permute.xlu1 %3524  ;;  %v4559_v58 = vrot.slane %v4246_v11, 1 }
 0x46d   : > { %3654 = vst.msk [vmem:[#allocation2 + $0xc8] sm:$0xf] %vm1272_vm6, %v3525_v19  ;;  %v3271_v42 = vpop.permute.xlu0 %3270  ;;  %v4399_v3 = vpop.f32.mrf.mxu1  ;;  %v5618_v2 = vld [vmem:[#allocation2 + $0xc0] sm:$0xff] }
 0x46e   : > { %3411 = vst.msk [vmem:[#allocation2 + $0xcc] sm:$0xf] %vm1027_vm5, %v3271_v42  ;;  %5483 = vmatmul.msk.bf16.gmra.mxu3 %vm1593_vm7, %v5618_v2  ;;  %5515 = vmatmul.msk.bf16.gmra.mxu0 %vm1593_vm7, %v5618_v2  ;;  %v4751_v44 = vrot.slane %v4399_v3, 2 }
 0x46f   : > { %3655 = vst.msk [vmem:[#allocation2 + $0xcc] sm:$0xf] %vm1272_vm6, %v3527_v37  ;;  %5547 = vmatmul.msk.bf16.gmra.mxu1 %vm1593_vm7, %v5618_v2  ;;  %v4908_v2 = vld [vmem:[%s5723_s23 + $0x90] sm:$0xff] }
 0x471   : > { %v4101_v28 = vpop.f32.mrf.mxu3 }
 0x473   : > { %v4248_v63 = vpop.f32.mrf.mxu0 }
 0x474   : > { %v3279_v33 = vpop.permute.xlu2 %3278  ;;  %v3275_v20 = vpop.permute.xlu1 %3274  ;;  %v4560_v59 = vrot.slane %v4248_v63, 1 }
 0x475   : > { %3415 = vst.msk [vmem:[#allocation2 + $0xdc] sm:$0xf] %vm1027_vm5, %v3279_v33  ;;  %v3273_v61 = vpop.permute.xlu0 %3272  ;;  %v4401_v32 = vpop.f32.mrf.mxu1 }
 0x476   : > { %3413 = vst.msk [vmem:[#allocation2 + $0xd4] sm:$0xf] %vm1027_vm5, %v3275_v20  ;;  %v4752_v26 = vrot.slane %v4401_v32, 2  ;;  %v4561_v6 = vsel %vm2191_vm8, %v4559_v58, %v4560_v59  ;;  %v5619_v34 = vld [vmem:[#allocation2 + $0xc8] sm:$0xff] }
 0x477   : > { %3412 = vst.msk [vmem:[#allocation2 + $0xd0] sm:$0xf] %vm1027_vm5, %v3273_v61  ;;  %v4647_v47 = vadd.f32 %v4561_v6, %v4101_v28 }
 0x478   : > { %3656 = vst.msk [vmem:[#allocation2 + $0xd0] sm:$0xf] %vm1272_vm6, %v3529_v23  ;;  %v4753_v50 = vsel %vm2384_vm9, %v4751_v44, %v4752_v26 }
 0x479   : > { %v4103_v45 = vpop.f32.mrf.mxu3  ;;  %v4839_v30 = vadd.f32 %v4753_v50, %v4647_v47 }
 0x47b   : > { %v4874_v18 = vadd.f32 %v7382_v60, %v4839_v30  ;;  %v4251_v40 = vpop.f32.mrf.mxu0  ;;  %v4909_v30 = vld [vmem:[%s5723_s23 + $0x98] sm:$0xff] }
 0x47c   : > { %v3281_v41 = vpop.permute.xlu2 %3280  ;;  %v3277_v54 = vpop.permute.xlu1 %3276  ;;  %v4562_v5 = vrot.slane %v4251_v40, 1 }
 0x47d   : > { %3416 = vst.msk [vmem:[#allocation2 + $0xe0] sm:$0xf] %vm1027_vm5, %v3281_v41  ;;  %v4404_v55 = vpop.f32.mrf.mxu1  ;;  %v4938_v17 = vadd.f32 %v4906_v25, %v4874_v18 }
 0x47e   : > { %3414 = vst.msk [vmem:[#allocation2 + $0xd8] sm:$0xf] %vm1027_vm5, %v3277_v54  ;;  %v4754_v16 = vrot.slane %v4404_v55, 2  ;;  %5484 = vmatmul.msk.bf16.gmra.mxu3 %vm1593_vm7, %v5619_v34  ;;  %5516 = vmatmul.msk.bf16.gmra.mxu0 %vm1593_vm7, %v5619_v34  ;;  %v4563_v56 = vsel %vm2191_vm8, %v4560_v59, %v4562_v5 }
 0x47f   : > { %5548 = vmatmul.msk.bf16.gmra.mxu1 %vm1593_vm7, %v5619_v34  ;;  %v4970_v0 = vmax.f32 %v4938_v17, 0.0  ;;  %v4648_v4 = vadd.f32 %v4563_v56, %v4103_v45 }
 0x480   : > { %v4755_v29 = vsel %vm2384_vm9, %v4752_v26, %v4754_v16 }
 0x481   : > { %v4106_v27 = vpop.f32.mrf.mxu3  ;;  %5003 = vst.msk [vmem:[%s7073_s28 + $0x80] sm:$0xff] %vm4986_vm10, %v4970_v0  ;;  %v4840_v39 = vadd.f32 %v4755_v29, %v4648_v4 }
 0x483   : > { %v4875_v21 = vadd.f32 %v7382_v60, %v4840_v39  ;;  %v4253_v36 = vpop.f32.mrf.mxu0 }
 0x484   : > { %v3535_v15 = vpop.permute.xlu1 %3534 }
 0x485   : > { %3659 = vst.msk [vmem:[#allocation2 + $0xdc] sm:$0xf] %vm1272_vm6, %v3535_v15  ;;  %v3531_v31 = vpop.permute.xlu0 %3530  ;;  %v4406_v10 = vpop.f32.mrf.mxu1  ;;  %v4939_v24 = vadd.f32 %v4907_v13, %v4875_v21 }
 0x486   : > { %3657 = vst.msk [vmem:[#allocation2 + $0xd4] sm:$0xf] %vm1272_vm6, %v3531_v31 }
 0x487   : > { %v4971_v57 = vmax.f32 %v4939_v24, 0.0 }
 0x489   : > { %v4107_v35 = vpop.f32.mrf.mxu3  ;;  %5004 = vst.msk [vmem:[%s7073_s28 + $0x88] sm:$0xff] %vm4986_vm10, %v4971_v57 }
 0x48b   : > { %v4255_v38 = vpop.f32.mrf.mxu0 }
 0x48c   : > { %v3539_v53 = vpop.permute.xlu2 %3538  ;;  %v4564_v48 = vrot.slane %v4255_v38, 1 }
 0x48d   : > { %v3533_v14 = vpop.permute.xlu0 %3532  ;;  %v4408_v9 = vpop.f32.mrf.mxu1  ;;  %v5620_v62 = vld [vmem:[#allocation2 + $0xd0] sm:$0xff] }
 0x48e   : > { %3658 = vst.msk [vmem:[#allocation2 + $0xd8] sm:$0xf] %vm1272_vm6, %v3533_v14  ;;  %5485 = vmatmul.msk.bf16.gmra.mxu3 %vm1593_vm7, %v5620_v62  ;;  %5517 = vmatmul.msk.bf16.gmra.mxu0 %vm1593_vm7, %v5620_v62  ;;  %v4756_v51 = vrot.slane %v4408_v9, 2  ;;  %v4910_v14 = vld [vmem:[%s5723_s23 + $0xa0] sm:$0xff] }
 0x48f   : > { %5549 = vmatmul.msk.bf16.gmra.mxu1 %vm1593_vm7, %v5620_v62 }
 0x491   : > { %v4109_v37 = vpop.f32.mrf.mxu3 }
 0x493   : > { %v4257_v12 = vpop.f32.mrf.mxu0 }
 0x494   : > { %v3541_v49 = vpop.permute.xlu2 %3540  ;;  %v4565_v8 = vrot.slane %v4257_v12, 1 }
 0x495   : > { %v3283_v52 = vpop.permute.xlu0 %3282  ;;  %v4410_v7 = vpop.f32.mrf.mxu1  ;;  %v5621_v33 = vld [vmem:[#allocation2 + $0xd8] sm:$0xff] }
 0x496   : > { %3417 = vst.msk [vmem:[#allocation2 + $0xe4] sm:$0xf] %vm1027_vm5, %v3283_v52  ;;  %v4757_v46 = vrot.slane %v4410_v7, 2  ;;  %v4566_v22 = vsel %vm2191_vm8, %v4564_v48, %v4565_v8 }
 0x497   : > { %3661 = vst.msk [vmem:[#allocation2 + $0xe4] sm:$0xf] %vm1272_vm6, %v3539_v53  ;;  %v4649_v43 = vadd.f32 %v4566_v22, %v4109_v37  ;;  %v4911_v22 = vld [vmem:[%s5723_s23 + $0xa8] sm:$0xff] }
 0x498   : > { %v4758_v19 = vsel %vm2384_vm9, %v4756_v51, %v4757_v46 }
 0x499   : > { %v4111_v23 = vpop.f32.mrf.mxu3  ;;  %v4841_v42 = vadd.f32 %v4758_v19, %v4649_v43 }
 0x49b   : > { %v4876_v20 = vadd.f32 %v7382_v60, %v4841_v42  ;;  %v4260_v61 = vpop.f32.mrf.mxu0 }
 0x49c   : > { %v3291_v3 = vpop.permute.xlu2 %3290  ;;  %v4567_v32 = vrot.slane %v4260_v61, 1 }
 0x49d   : > { %3421 = vst.msk [vmem:[#allocation2 + $0xf4] sm:$0xf] %vm1027_vm5, %v3291_v3  ;;  %v3285_v11 = vpop.permute.xlu0 %3284  ;;  %v4413_v28 = vpop.f32.mrf.mxu1  ;;  %v4940_v58 = vadd.f32 %v4908_v2, %v4876_v20 }
 0x49e   : > { %3665 = vst.msk [vmem:[#allocation2 + $0xf4] sm:$0xf] %vm1272_vm6, %v5676_v1  ;;  %v4759_v63 = vrot.slane %v4413_v28, 2  ;;  %5486 = vmatmul.msk.bf16.gmra.mxu3 %vm1593_vm7, %v5621_v33  ;;  %5518 = vmatmul.msk.bf16.gmra.mxu0 %vm1593_vm7, %v5621_v33  ;;  %v4568_v59 = vsel %vm2191_vm8, %v4565_v8, %v4567_v32 }
 0x49f   : > { %3418 = vst.msk [vmem:[#allocation2 + $0xe8] sm:$0xf] %vm1027_vm5, %v3285_v11  ;;  %5550 = vmatmul.msk.bf16.gmra.mxu1 %vm1593_vm7, %v5621_v33  ;;  %v4972_v26 = vmax.f32 %v4940_v58, 0.0  ;;  %v4650_v44 = vadd.f32 %v4568_v59, %v4111_v23 }
 0x4a0   : > { %3662 = vst.msk [vmem:[#allocation2 + $0xe8] sm:$0xf] %vm1272_vm6, %v3541_v49  ;;  %v4760_v47 = vsel %vm2384_vm9, %v4757_v46, %v4759_v63 }
 0x4a1   : > { %v4114_v6 = vpop.f32.mrf.mxu3  ;;  %5005 = vst.msk [vmem:[%s7073_s28 + $0x90] sm:$0xff] %vm4986_vm10, %v4972_v26  ;;  %v4842_v45 = vadd.f32 %v4760_v47, %v4650_v44 }
 0x4a3   : > { %v4877_v25 = vadd.f32 %v7382_v60, %v4842_v45  ;;  %v4262_v55 = vpop.f32.mrf.mxu0 }
 0x4a4   : > { %v3537_v50 = vpop.permute.xlu1 %3536 }
 0x4a5   : > { %3660 = vst.msk [vmem:[#allocation2 + $0xe0] sm:$0xf] %vm1272_vm6, %v3537_v50  ;;  %v3543_v41 = vpop.permute.xlu0 %3542  ;;  %v4415_v54 = vpop.f32.mrf.mxu1  ;;  %v4941_v34 = vadd.f32 %v4909_v30, %v4877_v25 }
 0x4a7   : > { %v4973_v18 = vmax.f32 %v4941_v34, 0.0 }
 0x4a9   : > { %v4115_v40 = vpop.f32.mrf.mxu3  ;;  %5006 = vst.msk [vmem:[%s7073_s28 + $0x98] sm:$0xff] %vm4986_vm10, %v4973_v18 }
 0x4ab   : > { %v4264_v0 = vpop.f32.mrf.mxu0 }
 0x4ac   : > { %v3287_v5 = vpop.permute.xlu1 %3286  ;;  %v5622_v16 = vld [vmem:[#allocation2 + $0xe0] sm:$0xff]  ;;  %v4569_v15 = vrot.slane %v4264_v0, 1 }
 0x4ad   : > { %3419 = vst.msk [vmem:[#allocation2 + $0xec] sm:$0xf] %vm1027_vm5, %v3287_v5  ;;  %v3293_v17 = vpop.permute.xlu0 %3292  ;;  %v4417_v56 = vpop.f32.mrf.mxu1 }
 0x4ae   : > { %3663 = vst.msk [vmem:[#allocation2 + $0xec] sm:$0xf] %vm1272_vm6, %v3543_v41  ;;  %5487 = vmatmul.msk.bf16.gmra.mxu3 %vm1593_vm7, %v5622_v16  ;;  %5519 = vmatmul.msk.bf16.gmra.mxu0 %vm1593_vm7, %v5622_v16  ;;  %v4761_v10 = vrot.slane %v4417_v56, 2  ;;  %v4912_v41 = vld [vmem:[%s5723_s23 + $0xb0] sm:$0xff] }
 0x4af   : > { %3422 = vst.msk [vmem:[#allocation2 + $0xf8] sm:$0xf] %vm1027_vm5, %v3293_v17  ;;  %5551 = vmatmul.msk.bf16.gmra.mxu1 %vm1593_vm7, %v5622_v16 }
 0x4b0   : > { %3666 = vst.msk [vmem:[#allocation2 + $0xf8] sm:$0xf] %vm1272_vm6, %v5676_v1 }
 0x4b1   : > { %v4117_v4 = vpop.f32.mrf.mxu3 }
 0x4b3   : > { %v4266_v39 = vpop.f32.mrf.mxu0 }
 0x4b4   : > { %v3289_v27 = vpop.permute.xlu1 %3288  ;;  %v4570_v13 = vrot.slane %v4266_v39, 1 }
 0x4b5   : > { %3420 = vst.msk [vmem:[#allocation2 + $0xf0] sm:$0xf] %vm1027_vm5, %v3289_v27  ;;  %v4419_v29 = vpop.f32.mrf.mxu1  ;;  %v5623_v62 = vld [vmem:[#allocation2 + $0xe8] sm:$0xff]  ;;  %v4913_v27 = vld [vmem:[%s5723_s23 + $0xb8] sm:$0xff] }
 0x4b6   : > { %3664 = vst.msk [vmem:[#allocation2 + $0xf0] sm:$0xf] %vm1272_vm6, %v5676_v1  ;;  %v4762_v31 = vrot.slane %v4419_v29, 2  ;;  %v4571_v21 = vsel %vm2191_vm8, %v4569_v15, %v4570_v13 }
 0x4b7   : > { %v4651_v36 = vadd.f32 %v4571_v21, %v4117_v4 }
 0x4b8   : > { %v4763_v57 = vsel %vm2384_vm9, %v4761_v10, %v4762_v31 }
 0x4b9   : > { %v4119_v24 = vpop.f32.mrf.mxu3  ;;  %v4843_v35 = vadd.f32 %v4763_v57, %v4651_v36 }
 0x4bb   : > { %v4878_v38 = vadd.f32 %v7382_v60, %v4843_v35  ;;  %v4269_v37 = vpop.f32.mrf.mxu0 }
 0x4bc   : > { %v3295_v53 = vpop.permute.xlu1 %3294  ;;  %v4572_v49 = vrot.slane %v4269_v37, 1 }
 0x4bd   : > { %3423 = vst.msk [vmem:[#allocation2 + $0xfc] sm:$0xf] %vm1027_vm5, %v3295_v53  ;;  %v4422_v9 = vpop.f32.mrf.mxu1  ;;  %v4942_v7 = vadd.f32 %v4910_v14, %v4878_v38  ;;  %v5624_v11 = vld [vmem:[#allocation2 + $0xf0] sm:$0xff] }
 0x4be   : > { %3667 = vst.msk [vmem:[#allocation2 + $0xfc] sm:$0xf] %vm1272_vm6, %v5676_v1  ;;  %v4764_v52 = vrot.slane %v4422_v9, 2  ;;  %5488 = vmatmul.msk.bf16.gmra.mxu3 %vm1593_vm7, %v5623_v62  ;;  %5520 = vmatmul.msk.bf16.gmra.mxu0 %vm1593_vm7, %v5623_v62  ;;  %v4573_v12 = vsel %vm2191_vm8, %v4570_v13, %v4572_v49 }
 0x4bf   : > { %5552 = vmatmul.msk.bf16.gmra.mxu1 %vm1593_vm7, %v5623_v62  ;;  %v4974_v48 = vmax.f32 %v4942_v7, 0.0  ;;  %v4652_v8 = vadd.f32 %v4573_v12, %v4119_v24  ;;  %v4914_v12 = vld [vmem:[%s5723_s23 + $0xc0] sm:$0xff] }
 0x4c0   : > { %v4765_v51 = vsel %vm2384_vm9, %v4762_v31, %v4764_v52 }
 0x4c1   : > { %v4122_v46 = vpop.f32.mrf.mxu3  ;;  %5007 = vst.msk [vmem:[%s7073_s28 + $0xa0] sm:$0xff] %vm4986_vm10, %v4974_v48  ;;  %v4844_v1 = vadd.f32 %v4765_v51, %v4652_v8 }
 0x4c3   : > { %v4879_v23 = vadd.f32 %v7382_v60, %v4844_v1  ;;  %v4271_v19 = vpop.f32.mrf.mxu0 }
 0x4c5   : > { %v4424_v43 = vpop.f32.mrf.mxu1  ;;  %v4943_v42 = vadd.f32 %v4911_v22, %v4879_v23  ;;  %v5625_v50 = vld [vmem:[#allocation2 + $0xf8] sm:$0xff] }
 0x4c7   : > { %v4975_v3 = vmax.f32 %v4943_v42, 0.0 }
 0x4c9   : > { %v4123_v2 = vpop.f32.mrf.mxu3  ;;  %5008 = vst.msk [vmem:[%s7073_s28 + $0xa8] sm:$0xff] %vm4986_vm10, %v4975_v3 }
 0x4cb   : > { %v4273_v33 = vpop.f32.mrf.mxu0 }
 0x4cc   : > { %v4574_v63 = vrot.slane %v4273_v33, 1 }
 0x4cd   : > { %v4426_v28 = vpop.f32.mrf.mxu1 }
 0x4ce   : > { %5489 = vmatmul.msk.bf16.gmra.mxu3 %vm1593_vm7, %v5624_v11  ;;  %5521 = vmatmul.msk.bf16.gmra.mxu0 %vm1593_vm7, %v5624_v11  ;;  %v4766_v26 = vrot.slane %v4426_v28, 2 }
 0x4cf   : > { %5553 = vmatmul.msk.bf16.gmra.mxu1 %vm1593_vm7, %v5624_v11  ;;  %v4915_v11 = vld [vmem:[%s5723_s23 + $0xc8] sm:$0xff] }
 0x4d1   : > { %v4125_v20 = vpop.f32.mrf.mxu3 }
 0x4d3   : > { %v4275_v32 = vpop.f32.mrf.mxu0 }
 0x4d4   : > { %v4575_v58 = vrot.slane %v4275_v32, 1 }
 0x4d5   : > { %v4428_v61 = vpop.f32.mrf.mxu1 }
 0x4d6   : > { %v4767_v59 = vrot.slane %v4428_v61, 2  ;;  %v4576_v44 = vsel %vm2191_vm8, %v4574_v63, %v4575_v58 }
 0x4d7   : > { %v4653_v6 = vadd.f32 %v4576_v44, %v4125_v20 }
 0x4d8   : > { %v4768_v45 = vsel %vm2384_vm9, %v4766_v26, %v4767_v59 }
 0x4d9   : > { %v4127_v47 = vpop.f32.mrf.mxu3  ;;  %v4845_v30 = vadd.f32 %v4768_v45, %v4653_v6 }
 0x4db   : > { %v4880_v25 = vadd.f32 %v7382_v60, %v4845_v30  ;;  %v4278_v55 = vpop.f32.mrf.mxu0 }
 0x4dc   : > { %v4577_v34 = vrot.slane %v4278_v55, 1 }
 0x4dd   : > { %v4431_v54 = vpop.f32.mrf.mxu1  ;;  %v4944_v40 = vadd.f32 %v4912_v41, %v4880_v25 }
 0x4de   : > { %v4769_v18 = vrot.slane %v4431_v54, 2  ;;  %5490 = vmatmul.msk.bf16.gmra.mxu3 %vm1593_vm7, %v5625_v50  ;;  %5522 = vmatmul.msk.bf16.gmra.mxu0 %vm1593_vm7, %v5625_v50  ;;  %v4578_v5 = vsel %vm2191_vm8, %v4575_v58, %v4577_v34 }
 0x4df   : > { %5554 = vmatmul.msk.bf16.gmra.mxu1 %vm1593_vm7, %v5625_v50  ;;  %v4976_v16 = vmax.f32 %v4944_v40, 0.0  ;;  %v4654_v17 = vadd.f32 %v4578_v5, %v4127_v47 }
 0x4e0   : > { %v4770_v0 = vsel %vm2384_vm9, %v4767_v59, %v4769_v18  ;;  %v4916_v18 = vld [vmem:[%s5723_s23 + $0xd0] sm:$0xff] }
 0x4e1   : > { %v4130_v56 = vpop.f32.mrf.mxu3  ;;  %5009 = vst.msk [vmem:[%s7073_s28 + $0xb0] sm:$0xff] %vm4986_vm10, %v4976_v16  ;;  %v4846_v4 = vadd.f32 %v4770_v0, %v4654_v17 }
 0x4e3   : > { %v4881_v39 = vadd.f32 %v7382_v60, %v4846_v4  ;;  %v4280_v15 = vpop.f32.mrf.mxu0 }
 0x4e5   : > { %v4433_v29 = vpop.f32.mrf.mxu1  ;;  %v4945_v13 = vadd.f32 %v4913_v27, %v4881_v39 }
 0x4e7   : > { %v4977_v31 = vmax.f32 %v4945_v13, 0.0 }
 0x4e9   : > { %v4131_v10 = vpop.f32.mrf.mxu3  ;;  %5010 = vst.msk [vmem:[%s7073_s28 + $0xb8] sm:$0xff] %vm4986_vm10, %v4977_v31  ;;  %v4917_v31 = vld [vmem:[%s5723_s23 + $0xd8] sm:$0xff] }
 0x4eb   : > { %v4282_v36 = vpop.f32.mrf.mxu0 }
 0x4ec   : > { %v4579_v53 = vrot.slane %v4282_v36, 1 }
 0x4ed   : > { %v4435_v21 = vpop.f32.mrf.mxu1 }
 0x4ee   : > { %v4771_v62 = vrot.slane %v4435_v21, 2 }
 0x4f1   : > { %v4133_v24 = vpop.f32.mrf.mxu3 }
 0x4f3   : > { %v4284_v35 = vpop.f32.mrf.mxu0 }
 0x4f4   : > { %v4580_v14 = vrot.slane %v4284_v35, 1 }
 0x4f5   : > { %v4437_v57 = vpop.f32.mrf.mxu1 }
 0x4f6   : > { %v4772_v9 = vrot.slane %v4437_v57, 2  ;;  %v4581_v38 = vsel %vm2191_vm8, %v4579_v53, %v4580_v14 }
 0x4f7   : > { %v4655_v37 = vadd.f32 %v4581_v38, %v4133_v24 }
 0x4f8   : > { %v4773_v52 = vsel %vm2384_vm9, %v4771_v62, %v4772_v9 }
 0x4f9   : > { %v4135_v49 = vpop.f32.mrf.mxu3  ;;  %v4847_v7 = vadd.f32 %v4773_v52, %v4655_v37 }
 0x4fb   : > { %v4882_v8 = vadd.f32 %v7382_v60, %v4847_v7  ;;  %v4287_v46 = vpop.f32.mrf.mxu0 }
 0x4fc   : > { %v4582_v51 = vrot.slane %v4287_v46, 1 }
 0x4fd   : > { %v4440_v48 = vpop.f32.mrf.mxu1  ;;  %v4946_v22 = vadd.f32 %v4914_v12, %v4882_v8 }
 0x4fe   : > { %v4774_v1 = vrot.slane %v4440_v48, 2  ;;  %v4583_v43 = vsel %vm2191_vm8, %v4580_v14, %v4582_v51 }
 0x4ff   : > { %v4978_v23 = vmax.f32 %v4946_v22, 0.0  ;;  %v4656_v19 = vadd.f32 %v4583_v43, %v4135_v49 }
 0x500   : > { %v4775_v3 = vsel %vm2384_vm9, %v4772_v9, %v4774_v1  ;;  %v4918_v1 = vld [vmem:[%s5723_s23 + $0xe0] sm:$0xff] }
 0x501   : > { %v4138_v42 = vpop.f32.mrf.mxu3  ;;  %5011 = vst.msk [vmem:[%s7073_s28 + $0xc0] sm:$0xff] %vm4986_vm10, %v4978_v23  ;;  %v4848_v2 = vadd.f32 %v4775_v3, %v4656_v19 }
 0x503   : > { %v4883_v33 = vadd.f32 %v7382_v60, %v4848_v2  ;;  %v4289_v20 = vpop.f32.mrf.mxu0 }
 0x505   : > { %v4442_v28 = vpop.f32.mrf.mxu1  ;;  %v4947_v61 = vadd.f32 %v4915_v11, %v4883_v33 }
 0x507   : > { %v4979_v32 = vmax.f32 %v4947_v61, 0.0 }
 0x509   : > { %v4139_v63 = vpop.f32.mrf.mxu3  ;;  %5012 = vst.msk [vmem:[%s7073_s28 + $0xc8] sm:$0xff] %vm4986_vm10, %v4979_v32  ;;  %v4919_v32 = vld [vmem:[%s5723_s23 + $0xe8] sm:$0xff] }
 0x50b   : > { %v4291_v59 = vpop.f32.mrf.mxu0 }
 0x50c   : > { %v4584_v47 = vrot.slane %v4291_v59, 1 }
 0x50d   : > { %v4444_v58 = vpop.f32.mrf.mxu1 }
 0x50e   : > { %v4776_v30 = vrot.slane %v4444_v58, 2 }
 0x511   : > { %v4141_v26 = vpop.f32.mrf.mxu3 }
 0x513   : > { %v4293_v6 = vpop.f32.mrf.mxu0 }
 0x514   : > { %v4585_v45 = vrot.slane %v4293_v6, 1 }
 0x515   : > { %v4446_v44 = vpop.f32.mrf.mxu1 }
 0x516   : > { %v4777_v50 = vrot.slane %v4446_v44, 2  ;;  %v4586_v41 = vsel %vm2191_vm8, %v4584_v47, %v4585_v45 }
 0x517   : > { %v4657_v54 = vadd.f32 %v4586_v41, %v4141_v26 }
 0x518   : > { %v4778_v55 = vsel %vm2384_vm9, %v4776_v30, %v4777_v50 }
 0x519   : > { %v4143_v25 = vpop.f32.mrf.mxu3  ;;  %v4849_v34 = vadd.f32 %v4778_v55, %v4657_v54 }
 0x51b   : > { %v4884_v5 = vadd.f32 %v7382_v60, %v4849_v34  ;;  %v4296_v16 = vpop.f32.mrf.mxu0 }
 0x51c   : > { %v4587_v17 = vrot.slane %v4296_v16, 1 }
 0x51d   : > { %v4449_v40 = vpop.f32.mrf.mxu1  ;;  %v4948_v0 = vadd.f32 %v4916_v18, %v4884_v5 }
 0x51e   : > { %v4779_v56 = vrot.slane %v4449_v40, 2  ;;  %v4588_v4 = vsel %vm2191_vm8, %v4585_v45, %v4587_v17  ;;  %v4920_v17 = vld [vmem:[%s5723_s23 + $0xf0] sm:$0xff] }
 0x51f   : > { %v4980_v27 = vmax.f32 %v4948_v0, 0.0  ;;  %v4658_v29 = vadd.f32 %v4588_v4, %v4143_v25  ;;  %v5665_v0 = vld [vmem:[%s7626_s4] ss:$0 sm:$0xff] }
 0x520   : > { %v4780_v15 = vsel %vm2384_vm9, %v4777_v50, %v4779_v56 }
 0x521   : > { %v4146_v39 = vpop.f32.mrf.mxu3  ;;  %5013 = vst.msk [vmem:[%s7073_s28 + $0xd0] sm:$0xff] %vm4986_vm10, %v4980_v27  ;;  %v4850_v13 = vadd.f32 %v4780_v15, %v4658_v29 }
 0x523   : > { %v4885_v21 = vadd.f32 %v7382_v60, %v4850_v13  ;;  %v4298_v36 = vpop.f32.mrf.mxu0 }
 0x525   : > { %v4451_v10 = vpop.f32.mrf.mxu1  ;;  %v4949_v24 = vadd.f32 %v4917_v31, %v4885_v21 }
 0x527   : > { %v4981_v57 = vmax.f32 %v4949_v24, 0.0 }
 0x529   : > { %v4147_v35 = vpop.f32.mrf.mxu3  ;;  %5014 = vst.msk [vmem:[%s7073_s28 + $0xd8] sm:$0xff] %vm4986_vm10, %v4981_v57  ;;  %v4921_v57 = vld [vmem:[%s5723_s23 + $0xf8] sm:$0xff] }
 0x52b   : > { %v4300_v14 = vpop.f32.mrf.mxu0 }
 0x52c   : > { %v4589_v37 = vrot.slane %v4300_v14, 1 }
 0x52d   : > { %v4453_v53 = vpop.f32.mrf.mxu1 }
 0x52e   : > { %v4781_v7 = vrot.slane %v4453_v53, 2 }
 0x531   : > { %v4149_v9 = vpop.f32.mrf.mxu3 }
 0x533   : > { %v4302_v38 = vpop.f32.mrf.mxu0 }
 0x534   : > { %v4590_v49 = vrot.slane %v4302_v38, 1 }
 0x535   : > { %v4455_v62 = vpop.f32.mrf.mxu1 }
 0x536   : > { %v4782_v52 = vrot.slane %v4455_v62, 2  ;;  %v4591_v12 = vsel %vm2191_vm8, %v4589_v37, %v4590_v49 }
 0x537   : > { %v4659_v48 = vadd.f32 %v4591_v12, %v4149_v9 }
 0x538   : > { %v4783_v46 = vsel %vm2384_vm9, %v4781_v7, %v4782_v52 }
 0x539   : > { %v4151_v8 = vpop.f32.mrf.mxu3  ;;  %v4851_v51 = vadd.f32 %v4783_v46, %v4659_v48 }
 0x53b   : > { %v4886_v43 = vadd.f32 %v7382_v60, %v4851_v51  ;;  %v4305_v23 = vpop.f32.mrf.mxu0 }
 0x53c   : > { %v4592_v19 = vrot.slane %v4305_v23, 1 }
 0x53d   : > { %v4458_v22 = vpop.f32.mrf.mxu1  ;;  %v4950_v3 = vadd.f32 %v4918_v1, %v4886_v43 }
 0x53e   : > { %v4784_v42 = vrot.slane %v4458_v22, 2  ;;  %v4593_v2 = vsel %vm2191_vm8, %v4590_v49, %v4592_v19 }
 0x53f   : > { %v4982_v11 = vmax.f32 %v4950_v3, 0.0  ;;  %v4660_v28 = vadd.f32 %v4593_v2, %v4151_v8 }
 0x540   : > { %v4785_v20 = vsel %vm2384_vm9, %v4782_v52, %v4784_v42 }
 0x541   : > { %v4154_v33 = vpop.f32.mrf.mxu3  ;;  %5015 = vst.msk [vmem:[%s7073_s28 + $0xe0] sm:$0xff] %vm4986_vm10, %v4982_v11  ;;  %v4852_v61 = vadd.f32 %v4785_v20, %v4660_v28 }
 0x543   : > { %v4887_v58 = vadd.f32 %v7382_v60, %v4852_v61  ;;  %v4307_v59 = vpop.f32.mrf.mxu0 }
 0x545   : > { %v4460_v63 = vpop.f32.mrf.mxu1  ;;  %v4951_v26 = vadd.f32 %v4919_v32, %v4887_v58 }
 0x547   : > { %v4983_v44 = vmax.f32 %v4951_v26, 0.0 }
 0x549   : > { %v4155_v6 = vpop.f32.mrf.mxu3  ;;  %5016 = vst.msk [vmem:[%s7073_s28 + $0xe8] sm:$0xff] %vm4986_vm10, %v4983_v44 }
 0x54b   : > { %v4309_v45 = vpop.f32.mrf.mxu0 }
 0x54c   : > { %v4594_v54 = vrot.slane %v4309_v45, 1 }
 0x54d   : > { %v4462_v47 = vpop.f32.mrf.mxu1 }
 0x54e   : > { %v4786_v34 = vrot.slane %v4462_v47, 2 }
 0x551   : > { %v4157_v50 = vpop.f32.mrf.mxu3 }
 0x553   : > { %v4311_v41 = vpop.f32.mrf.mxu0 }
 0x554   : > { %v4595_v25 = vrot.slane %v4311_v41, 1 }
 0x555   : > { %v4464_v30 = vpop.f32.mrf.mxu1 }
 0x556   : > { %v4787_v55 = vrot.slane %v4464_v30, 2  ;;  %v4596_v18 = vsel %vm2191_vm8, %v4594_v54, %v4595_v25 }
 0x557   : > { %v4661_v40 = vadd.f32 %v4596_v18, %v4157_v50 }
 0x558   : > { %v4788_v5 = vsel %vm2384_vm9, %v4786_v34, %v4787_v55 }
 0x559   : > { %v4159_v60 = vpop.f32.mrf.mxu3  ;;  %v4853_v16 = vadd.f32 %v4788_v5, %v4661_v40 }
 0x55b   : > { %v4888_v4 = vadd.f32 %v5665_v0, %v4853_v16  ;;  %v4314_v27 = vpop.f32.mrf.mxu0 }
 0x55c   : > { %v4597_v29 = vrot.slane %v4314_v27, 1 }
 0x55d   : > { %v4467_v56 = vpop.f32.mrf.mxu1  ;;  %v4952_v15 = vadd.f32 %v4920_v17, %v4888_v4 }
 0x55e   : > { %v4789_v39 = vrot.slane %v4467_v56, 2  ;;  %v4598_v13 = vsel %vm2191_vm8, %v4595_v25, %v4597_v29 }
 0x55f   : > { %v4984_v31 = vmax.f32 %v4952_v15, 0.0  ;;  %v4662_v10 = vadd.f32 %v4598_v13, %v4159_v60 }
 0x560   : > { %v4790_v36 = vsel %vm2384_vm9, %v4787_v55, %v4789_v39 }
 0x561   : > { %v4162_v21 = vpop.f32.mrf.mxu3  ;;  %5017 = vst.msk [vmem:[%s7073_s28 + $0xf0] sm:$0xff] %vm4986_vm10, %v4984_v31  ;;  %v4854_v24 = vadd.f32 %v4790_v36, %v4662_v10 }
 0x563   : > { %v4889_v53 = vadd.f32 %v5665_v0, %v4854_v24  ;;  %v4316_v14 = vpop.f32.mrf.mxu0 }
 0x565   : > { %v4469_v35 = vpop.f32.mrf.mxu1  ;;  %v4953_v9 = vadd.f32 %v4921_v57, %v4889_v53 }
 0x567   : > { %v4985_v62 = vmax.f32 %v4953_v9, 0.0 }
 0x569   : > { %v4163_v38 = vpop.f32.mrf.mxu3  ;;  %5018 = vst.msk [vmem:[%s7073_s28 + $0xf8] sm:$0xff] %vm4986_vm10, %v4985_v62 }
 0x56a PF: > { %s15_s18 = sadd.s32 1, %s5672_s18  }
 0x56b   : > { %p12_p4 = scmp.ge.s32.totalorder %s15_s18, 4  }
 0x56d   :  { %14 = sbr.rel (!%p12_p4) target bundleno = 1 (0x1), region = 72 }

</bundles_post_ra>
